<compile_context>
chip_gen: v6e
topology: v6e:2x2x1
jax: 0.10.0
libtpu: 0.0.40
codegen_flags: <defaults>
</compile_context>

<pallas_src>
import jax
import jax.numpy as jnp
from jax import lax
from jax.experimental import pallas as pl
from jax.experimental.pallas import tpu as pltpu

# Default TristouNet config: recurrent=[16], bidirectional=False,
# pooling='sum', linear=[16, 16]
H = 16      # LSTM hidden dim
L1 = 16     # first linear layer
L2 = 16     # second linear layer (output embedding dim)
GP = 128    # per-gate lane padding (full f32 vreg lane width)
NG = 4      # gates packed as (i, f, o, g)


def tristounet_kernel(x_ref, wih_ref, whh_ref, b_ref,
                      w1_ref, b1_ref, w2_ref, b2_ref,
                      out_ref, h_ref, c_ref, pool_ref):
    t_blk = pl.program_id(1)

    # ---- init persistent recurrent state at the first time chunk ----
    @pl.when(t_blk == 0)
    def _init():
        h_ref[...] = jnp.zeros_like(h_ref)
        c_ref[...] = jnp.zeros_like(c_ref)
        pool_ref[...] = jnp.zeros_like(pool_ref)

    BB, TC, F = x_ref.shape

    # ---- hoisted input projection: one large MXU matmul per chunk ----
    # (bias folded in here, so nothing is re-broadcast inside the step loop)
    x2 = x_ref[...].reshape(BB * TC, F)                              # (BB*TC, F)
    xw = jnp.dot(x2, wih_ref[...],
                 preferred_element_type=jnp.float32) + b_ref[...]    # (BB*TC, NG*GP)
    xw = xw.reshape(BB, TC, NG * GP)

    W_hh = whh_ref[...]                                              # (GP, NG*GP)
    h = h_ref[...]
    c = c_ref[...]
    pool = pool_ref[...]

    # ---- recurrent loop over the chunk, fully statically unrolled ----
    for t in range(TC):
        gates = xw[:, t, :] + jnp.dot(h, W_hh,
                                      preferred_element_type=jnp.float32)  # (BB, NG*GP)
        sig = jax.nn.sigmoid(gates[:, :3 * GP])   # i | f | o  -> one EUP dispatch
        g_g = jnp.tanh(gates[:, 3 * GP:])         # g          -> one EUP dispatch
        i_g = sig[:, 0 * GP:1 * GP]               # 128-lane-aligned (free) slices
        f_g = sig[:, 1 * GP:2 * GP]
        o_g = sig[:, 2 * GP:3 * GP]
        c = f_g * c + i_g * g_g
        h = o_g * jnp.tanh(c)
        pool = pool + h                           # 'sum' temporal pooling

    h_ref[...] = h
    c_ref[...] = c
    pool_ref[...] = pool

    # ---- finalize on the last time chunk: MLP + L2 normalize ----
    @pl.when(t_blk == pl.num_programs(1) - 1)
    def _finalize():
        y = jnp.tanh(jnp.dot(pool, w1_ref[...],
                             preferred_element_type=jnp.float32) + b1_ref[...])
        y = jnp.tanh(jnp.dot(y, w2_ref[...],
                             preferred_element_type=jnp.float32) + b2_ref[...])
        # padded lanes of y are tanh(0) == 0 -> they do not perturb the norm
        ss = jnp.sum(y * y, axis=-1, keepdims=True)
        out_ref[...] = y * lax.rsqrt(ss + 1e-12)   # rsqrt (EUP) + eps, no divide


def pack_params(p):
    """Re-pack natural (PyTorch-equivalent, pre-transposed) params into the
    padded, gate-reordered layout the kernel expects."""
    F = p['W_ih'].shape[0]

    def regate(w):  # (..., 4H) in PyTorch order (i, f, g, o) -> (..., NG*GP) as (i, f, o, g)
        i, f, g, o = jnp.split(w.astype(jnp.float32), 4, axis=-1)
        out = jnp.zeros(w.shape[:-1] + (NG * GP,), jnp.float32)
        for k, blk in enumerate((i, f, o, g)):
            out = out.at[..., k * GP:k * GP + H].set(blk)
        return out

    W_ih = regate(p['W_ih'])                                                   # (F, NG*GP)
    W_hh = jnp.zeros((GP, NG * GP), jnp.float32).at[:H, :].set(regate(p['W_hh']))
    b = regate(p['b'])                                                         # (1, NG*GP)
    W1 = jnp.zeros((GP, GP), jnp.float32).at[:H, :L1].set(p['W1'])
    b1 = jnp.zeros((1, GP), jnp.float32).at[:, :L1].set(p['b1'])
    W2 = jnp.zeros((GP, GP), jnp.float32).at[:L1, :L2].set(p['W2'])
    b2 = jnp.zeros((1, GP), jnp.float32).at[:, :L2].set(p['b2'])
    return dict(W_ih=W_ih, W_hh=W_hh, b=b, W1=W1, b1=b1, W2=W2, b2=b2)


def tristounet_forward(x_btf, packed, time_chunk=8):
    """x_btf: (batch, n_samples, n_features) float32 — same as the torch module."""
    B, T, F = x_btf.shape
    BB = 8                               # sublane-dense batch tile
    TC = min(time_chunk, T)
    assert T % TC == 0  # TODO(synk): mask the last chunk for ragged sequence lengths
    B_pad = -(-B // BB) * BB
    if B_pad != B:
        # pad batch to a full sublane tile; pad rows are sliced off below
        x_btf = jnp.concatenate(
            [x_btf, jnp.zeros((B_pad - B, T, F), x_btf.dtype)], axis=0)

    grid = (B_pad // BB, T // TC)
    # NOTE: on v6e/v7x the matmul operands (x chunk / weights) could be cast to
    # bf16 (keeping f32 accumulation + f32 gate math) to halve VMEM/HBM traffic;
    # kept f32 here so the kernel is numerically identical on v5e as well.
    out = pl.pallas_call(
        tristounet_kernel,
        out_shape=jax.ShapeDtypeStruct((B_pad, GP), jnp.float32),
        grid_spec=pltpu.PrefetchScalarGridSpec(
            num_scalar_prefetch=0,
            grid=grid,
            in_specs=[
                pl.BlockSpec((BB, TC, F), lambda b, t: (b, t, 0)),       # x: time-chunked
                pl.BlockSpec((F, NG * GP), lambda b, t: (0, 0)),         # W_ih
                pl.BlockSpec((GP, NG * GP), lambda b, t: (0, 0)),        # W_hh
                pl.BlockSpec((1, NG * GP), lambda b, t: (0, 0)),         # b
                pl.BlockSpec((GP, GP), lambda b, t: (0, 0)),             # W1
                pl.BlockSpec((1, GP), lambda b, t: (0, 0)),              # b1
                pl.BlockSpec((GP, GP), lambda b, t: (0, 0)),             # W2
                pl.BlockSpec((1, GP), lambda b, t: (0, 0)),              # b2
            ],
            out_specs=pl.BlockSpec((BB, GP), lambda b, t: (b, 0)),       # lane-dense slab
            scratch_shapes=[pltpu.VMEM((BB, GP), jnp.float32),           # h
                            pltpu.VMEM((BB, GP), jnp.float32),           # c
                            pltpu.VMEM((BB, GP), jnp.float32)],          # pool
        ),
        compiler_params=pltpu.CompilerParams(
            dimension_semantics=("parallel", "arbitrary"),
            vmem_limit_bytes=32 * 1024 * 1024),
    )(x_btf, packed['W_ih'], packed['W_hh'], packed['b'],
      packed['W1'], packed['b1'], packed['W2'], packed['b2'])
    return out[:B, :L2]


def reference_forward(x_btf, p):
    """Pure-JAX reference replicating the PyTorch forward semantics."""
    B, T, F = x_btf.shape
    h = jnp.zeros((B, H), jnp.float32)
    c = jnp.zeros((B, H), jnp.float32)
    pool = jnp.zeros((B, H), jnp.float32)
    for t in range(T):
        gates = x_btf[:, t, :] @ p['W_ih'] + h @ p['W_hh'] + p['b']
        i_g = jax.nn.sigmoid(gates[:, 0 * H:1 * H])
        f_g = jax.nn.sigmoid(gates[:, 1 * H:2 * H])
        g_g = jnp.tanh(gates[:, 2 * H:3 * H])
        o_g = jax.nn.sigmoid(gates[:, 3 * H:4 * H])
        c = f_g * c + i_g * g_g
        h = o_g * jnp.tanh(c)
        pool = pool + h
    y = jnp.tanh(pool @ p['W1'] + p['b1'])
    y = jnp.tanh(y @ p['W2'] + p['b2'])
    return y / jnp.linalg.norm(y, axis=-1, keepdims=True)


if __name__ == "__main__":
    key = jax.random.PRNGKey(0)
    B, T, F = 2, 32, 32  # batch, n_samples, n_features (4 time chunks of 8)
    ks = jax.random.split(key, 8)
    s = 0.25  # ~ PyTorch uniform(-1/sqrt(H), 1/sqrt(H)) scale

    x = jax.random.normal(ks[0], (B, T, F), jnp.float32)
    params = {
        'W_ih': jax.random.uniform(ks[1], (F, 4 * H), jnp.float32, -s, s),
        'W_hh': jax.random.uniform(ks[2], (H, 4 * H), jnp.float32, -s, s),
        'b':    jax.random.uniform(ks[3], (1, 4 * H), jnp.float32, -s, s),
        'W1':   jax.random.uniform(ks[4], (H, L1), jnp.float32, -s, s),
        'b1':   jax.random.uniform(ks[5], (1, L1), jnp.float32, -s, s),
        'W2':   jax.random.uniform(ks[6], (L1, L2), jnp.float32, -s, s),
        'b2':   jax.random.uniform(ks[7], (1, L2), jnp.float32, -s, s),
    }

    packed = pack_params(params)
    out = tristounet_forward(x, packed)
    jax.block_until_ready(out)

    ref = reference_forward(x, params)
    assert out.shape == (B, L2), out.shape
    err = float(jnp.max(jnp.abs(out - ref)))
    assert err < 1e-4, f"max abs err {err}"
    print("KERNEL_OK")
</pallas_src>

<mosaic_0001>
module attributes {stable_mosaic.version = 11 : i64} {
  func.func @tristounet_kernel(%arg0: i32, %arg1: i32, %arg2: memref<8x8x32xf32, #tpu.memory_space<vmem>>, %arg3: memref<32x512xf32, #tpu.memory_space<vmem>>, %arg4: memref<128x512xf32, #tpu.memory_space<vmem>>, %arg5: memref<1x512xf32, #tpu.memory_space<vmem>>, %arg6: memref<128x128xf32, #tpu.memory_space<vmem>>, %arg7: memref<1x128xf32, #tpu.memory_space<vmem>>, %arg8: memref<128x128xf32, #tpu.memory_space<vmem>>, %arg9: memref<1x128xf32, #tpu.memory_space<vmem>>, %arg10: memref<8x128xf32, #tpu.memory_space<vmem>>, %arg11: memref<8x128xf32, #tpu.memory_space<vmem>>, %arg12: memref<8x128xf32, #tpu.memory_space<vmem>>, %arg13: memref<8x128xf32, #tpu.memory_space<vmem>>) attributes {dimension_semantics = [#tpu.dimension_semantics<parallel>, #tpu.dimension_semantics<arbitrary>], iteration_bounds = array<i64: 1, 4>, scalar_prefetch = 0 : i64, scratch_operands = 3 : i64, tpu.core_type = #tpu.core_type<tc>, window_params = [{transform_indices = @transform_0, window_bounds = array<i64: 8, 8, 32>}, {pipeline_mode = #tpu.pipeline_mode<synchronous>, transform_indices = @transform_1, window_bounds = array<i64: 32, 512>}, {pipeline_mode = #tpu.pipeline_mode<synchronous>, transform_indices = @transform_2, window_bounds = array<i64: 128, 512>}, {pipeline_mode = #tpu.pipeline_mode<synchronous>, transform_indices = @transform_3, window_bounds = array<i64: 1, 512>}, {pipeline_mode = #tpu.pipeline_mode<synchronous>, transform_indices = @transform_4, window_bounds = array<i64: 128, 128>}, {pipeline_mode = #tpu.pipeline_mode<synchronous>, transform_indices = @transform_5, window_bounds = array<i64: 1, 128>}, {pipeline_mode = #tpu.pipeline_mode<synchronous>, transform_indices = @transform_6, window_bounds = array<i64: 128, 128>}, {pipeline_mode = #tpu.pipeline_mode<synchronous>, transform_indices = @transform_7, window_bounds = array<i64: 1, 128>}, {transform_indices = @transform_8, window_bounds = array<i64: 8, 128>}]} {
    %c0_i32 = arith.constant 0 : i32
    %0 = arith.cmpi eq, %arg1, %c0_i32 : i32
    %1 = arith.extui %0 : i1 to i32
    %c0_i32_0 = arith.constant 0 : i32
    %2 = arith.cmpi ne, %1, %c0_i32_0 : i32
    scf.if %2 {
      %cst_38 = arith.constant 0.000000e+00 : f32
      %189 = vector.broadcast %cst_38 : f32 to vector<8x128xf32>
      %c0_39 = arith.constant 0 : index
      %c0_40 = arith.constant 0 : index
      %190 = vector.load %arg11[%c0_39, %c0_40] : memref<8x128xf32, #tpu.memory_space<vmem>>, vector<8x128xf32>
      tpu.vector_store %arg11[%c0_39, %c0_40], %189 {strides = array<i32>} : memref<8x128xf32, #tpu.memory_space<vmem>>, vector<8x128xf32>,
      %cst_41 = arith.constant 0.000000e+00 : f32
      %191 = vector.broadcast %cst_41 : f32 to vector<8x128xf32>
      %c0_42 = arith.constant 0 : index
      %c0_43 = arith.constant 0 : index
      %192 = vector.load %arg12[%c0_42, %c0_43] : memref<8x128xf32, #tpu.memory_space<vmem>>, vector<8x128xf32>
      tpu.vector_store %arg12[%c0_42, %c0_43], %191 {strides = array<i32>} : memref<8x128xf32, #tpu.memory_space<vmem>>, vector<8x128xf32>,
      %cst_44 = arith.constant 0.000000e+00 : f32
      %193 = vector.broadcast %cst_44 : f32 to vector<8x128xf32>
      %c0_45 = arith.constant 0 : index
      %c0_46 = arith.constant 0 : index
      %194 = vector.load %arg13[%c0_45, %c0_46] : memref<8x128xf32, #tpu.memory_space<vmem>>, vector<8x128xf32>
      tpu.vector_store %arg13[%c0_45, %c0_46], %193 {strides = array<i32>} : memref<8x128xf32, #tpu.memory_space<vmem>>, vector<8x128xf32>,
    } else {
    }
    %c0 = arith.constant 0 : index
    %c0_1 = arith.constant 0 : index
    %c0_2 = arith.constant 0 : index
    %3 = vector.load %arg2[%c0, %c0_1, %c0_2] : memref<8x8x32xf32, #tpu.memory_space<vmem>>, vector<8x8x32xf32>
    %4 = vector.shape_cast %3 : vector<8x8x32xf32> to vector<64x32xf32>
    %c0_3 = arith.constant 0 : index
    %c0_4 = arith.constant 0 : index
    %5 = vector.load %arg3[%c0_3, %c0_4] : memref<32x512xf32, #tpu.memory_space<vmem>>, vector<32x512xf32>
    %cst = arith.constant dense<0.000000e+00> : vector<64x512xf32>
    %6 = tpu.matmul %4, %5, %cst {dimension_numbers = #tpu.dot_dimension_numbers<[1], [0], [0], [1], [0, 0, 1, 1], [], []>} : vector<64x32xf32>, vector<32x512xf32>, vector<64x512xf32> -> vector<64x512xf32>
    %c0_5 = arith.constant 0 : index
    %c0_6 = arith.constant 0 : index
    %7 = vector.load %arg5[%c0_5, %c0_6] : memref<1x512xf32, #tpu.memory_space<vmem>>, vector<1x512xf32>
    %8 = vector.broadcast %7 : vector<1x512xf32> to vector<64x512xf32>
    %9 = arith.addf %6, %8 : vector<64x512xf32>
    %10 = vector.shape_cast %9 : vector<64x512xf32> to vector<8x8x512xf32>
    %c0_7 = arith.constant 0 : index
    %c0_8 = arith.constant 0 : index
    %11 = vector.load %arg4[%c0_7, %c0_8] : memref<128x512xf32, #tpu.memory_space<vmem>>, vector<128x512xf32>
    %c0_9 = arith.constant 0 : index
    %c0_10 = arith.constant 0 : index
    %12 = vector.load %arg11[%c0_9, %c0_10] : memref<8x128xf32, #tpu.memory_space<vmem>>, vector<8x128xf32>
    %c0_11 = arith.constant 0 : index
    %c0_12 = arith.constant 0 : index
    %13 = vector.load %arg12[%c0_11, %c0_12] : memref<8x128xf32, #tpu.memory_space<vmem>>, vector<8x128xf32>
    %c0_13 = arith.constant 0 : index
    %c0_14 = arith.constant 0 : index
    %14 = vector.load %arg13[%c0_13, %c0_14] : memref<8x128xf32, #tpu.memory_space<vmem>>, vector<8x128xf32>
    %15 = vector.extract_strided_slice %10 {offsets = [0, 0, 0], sizes = [8, 1, 512], strides = [1, 1, 1]} : vector<8x8x512xf32> to vector<8x1x512xf32>
    %16 = vector.shape_cast %15 : vector<8x1x512xf32> to vector<8x512xf32>
    %cst_15 = arith.constant dense<0.000000e+00> : vector<8x512xf32>
    %17 = tpu.matmul %12, %11, %cst_15 {dimension_numbers = #tpu.dot_dimension_numbers<[1], [0], [0], [1], [0, 0, 1, 1], [], []>} : vector<8x128xf32>, vector<128x512xf32>, vector<8x512xf32> -> vector<8x512xf32>
    %18 = arith.addf %16, %17 : vector<8x512xf32>
    %19 = vector.extract_strided_slice %18 {offsets = [0, 0], sizes = [8, 384], strides = [1, 1]} : vector<8x512xf32> to vector<8x384xf32>
    %20 = arith.negf %19 : vector<8x384xf32>
    %21 = math.exp %20 : vector<8x384xf32>
    %cst_16 = arith.constant 1.000000e+00 : f32
    %22 = vector.broadcast %cst_16 : f32 to vector<8x384xf32>
    %23 = arith.addf %22, %21 : vector<8x384xf32>
    %24 = arith.divf %22, %23 : vector<8x384xf32>
    %25 = vector.extract_strided_slice %18 {offsets = [0, 384], sizes = [8, 128], strides = [1, 1]} : vector<8x512xf32> to vector<8x128xf32>
    %26 = math.tanh %25 : vector<8x128xf32>
    %27 = vector.extract_strided_slice %24 {offsets = [0, 0], sizes = [8, 128], strides = [1, 1]} : vector<8x384xf32> to vector<8x128xf32>
    %28 = vector.extract_strided_slice %24 {offsets = [0, 128], sizes = [8, 128], strides = [1, 1]} : vector<8x384xf32> to vector<8x128xf32>
    %29 = vector.extract_strided_slice %24 {offsets = [0, 256], sizes = [8, 128], strides = [1, 1]} : vector<8x384xf32> to vector<8x128xf32>
    %30 = arith.mulf %28, %13 : vector<8x128xf32>
    %31 = arith.mulf %27, %26 : vector<8x128xf32>
    %32 = arith.addf %30, %31 : vector<8x128xf32>
    %33 = math.tanh %32 : vector<8x128xf32>
    %34 = arith.mulf %29, %33 : vector<8x128xf32>
    %35 = arith.addf %14, %34 : vector<8x128xf32>
    %36 = vector.extract_strided_slice %10 {offsets = [0, 1, 0], sizes = [8, 1, 512], strides = [1, 1, 1]} : vector<8x8x512xf32> to vector<8x1x512xf32>
    %37 = vector.shape_cast %36 : vector<8x1x512xf32> to vector<8x512xf32>
    %cst_17 = arith.constant dense<0.000000e+00> : vector<8x512xf32>
    %38 = tpu.matmul %34, %11, %cst_17 {dimension_numbers = #tpu.dot_dimension_numbers<[1], [0], [0], [1], [0, 0, 1, 1], [], []>} : vector<8x128xf32>, vector<128x512xf32>, vector<8x512xf32> -> vector<8x512xf32>
    %39 = arith.addf %37, %38 : vector<8x512xf32>
    %40 = vector.extract_strided_slice %39 {offsets = [0, 0], sizes = [8, 384], strides = [1, 1]} : vector<8x512xf32> to vector<8x384xf32>
    %41 = arith.negf %40 : vector<8x384xf32>
    %42 = math.exp %41 : vector<8x384xf32>
    %cst_18 = arith.constant 1.000000e+00 : f32
    %43 = vector.broadcast %cst_18 : f32 to vector<8x384xf32>
    %44 = arith.addf %43, %42 : vector<8x384xf32>
    %45 = arith.divf %43, %44 : vector<8x384xf32>
    %46 = vector.extract_strided_slice %39 {offsets = [0, 384], sizes = [8, 128], strides = [1, 1]} : vector<8x512xf32> to vector<8x128xf32>
    %47 = math.tanh %46 : vector<8x128xf32>
    %48 = vector.extract_strided_slice %45 {offsets = [0, 0], sizes = [8, 128], strides = [1, 1]} : vector<8x384xf32> to vector<8x128xf32>
    %49 = vector.extract_strided_slice %45 {offsets = [0, 128], sizes = [8, 128], strides = [1, 1]} : vector<8x384xf32> to vector<8x128xf32>
    %50 = vector.extract_strided_slice %45 {offsets = [0, 256], sizes = [8, 128], strides = [1, 1]} : vector<8x384xf32> to vector<8x128xf32>
    %51 = arith.mulf %49, %32 : vector<8x128xf32>
    %52 = arith.mulf %48, %47 : vector<8x128xf32>
    %53 = arith.addf %51, %52 : vector<8x128xf32>
    %54 = math.tanh %53 : vector<8x128xf32>
    %55 = arith.mulf %50, %54 : vector<8x128xf32>
    %56 = arith.addf %35, %55 : vector<8x128xf32>
    %57 = vector.extract_strided_slice %10 {offsets = [0, 2, 0], sizes = [8, 1, 512], strides = [1, 1, 1]} : vector<8x8x512xf32> to vector<8x1x512xf32>
    %58 = vector.shape_cast %57 : vector<8x1x512xf32> to vector<8x512xf32>
    %cst_19 = arith.constant dense<0.000000e+00> : vector<8x512xf32>
    %59 = tpu.matmul %55, %11, %cst_19 {dimension_numbers = #tpu.dot_dimension_numbers<[1], [0], [0], [1], [0, 0, 1, 1], [], []>} : vector<8x128xf32>, vector<128x512xf32>, vector<8x512xf32> -> vector<8x512xf32>
    %60 = arith.addf %58, %59 : vector<8x512xf32>
    %61 = vector.extract_strided_slice %60 {offsets = [0, 0], sizes = [8, 384], strides = [1, 1]} : vector<8x512xf32> to vector<8x384xf32>
    %62 = arith.negf %61 : vector<8x384xf32>
    %63 = math.exp %62 : vector<8x384xf32>
    %cst_20 = arith.constant 1.000000e+00 : f32
    %64 = vector.broadcast %cst_20 : f32 to vector<8x384xf32>
    %65 = arith.addf %64, %63 : vector<8x384xf32>
    %66 = arith.divf %64, %65 : vector<8x384xf32>
    %67 = vector.extract_strided_slice %60 {offsets = [0, 384], sizes = [8, 128], strides = [1, 1]} : vector<8x512xf32> to vector<8x128xf32>
    %68 = math.tanh %67 : vector<8x128xf32>
    %69 = vector.extract_strided_slice %66 {offsets = [0, 0], sizes = [8, 128], strides = [1, 1]} : vector<8x384xf32> to vector<8x128xf32>
    %70 = vector.extract_strided_slice %66 {offsets = [0, 128], sizes = [8, 128], strides = [1, 1]} : vector<8x384xf32> to vector<8x128xf32>
    %71 = vector.extract_strided_slice %66 {offsets = [0, 256], sizes = [8, 128], strides = [1, 1]} : vector<8x384xf32> to vector<8x128xf32>
    %72 = arith.mulf %70, %53 : vector<8x128xf32>
    %73 = arith.mulf %69, %68 : vector<8x128xf32>
    %74 = arith.addf %72, %73 : vector<8x128xf32>
    %75 = math.tanh %74 : vector<8x128xf32>
    %76 = arith.mulf %71, %75 : vector<8x128xf32>
    %77 = arith.addf %56, %76 : vector<8x128xf32>
    %78 = vector.extract_strided_slice %10 {offsets = [0, 3, 0], sizes = [8, 1, 512], strides = [1, 1, 1]} : vector<8x8x512xf32> to vector<8x1x512xf32>
    %79 = vector.shape_cast %78 : vector<8x1x512xf32> to vector<8x512xf32>
    %cst_21 = arith.constant dense<0.000000e+00> : vector<8x512xf32>
    %80 = tpu.matmul %76, %11, %cst_21 {dimension_numbers = #tpu.dot_dimension_numbers<[1], [0], [0], [1], [0, 0, 1, 1], [], []>} : vector<8x128xf32>, vector<128x512xf32>, vector<8x512xf32> -> vector<8x512xf32>
    %81 = arith.addf %79, %80 : vector<8x512xf32>
    %82 = vector.extract_strided_slice %81 {offsets = [0, 0], sizes = [8, 384], strides = [1, 1]} : vector<8x512xf32> to vector<8x384xf32>
    %83 = arith.negf %82 : vector<8x384xf32>
    %84 = math.exp %83 : vector<8x384xf32>
    %cst_22 = arith.constant 1.000000e+00 : f32
    %85 = vector.broadcast %cst_22 : f32 to vector<8x384xf32>
    %86 = arith.addf %85, %84 : vector<8x384xf32>
    %87 = arith.divf %85, %86 : vector<8x384xf32>
    %88 = vector.extract_strided_slice %81 {offsets = [0, 384], sizes = [8, 128], strides = [1, 1]} : vector<8x512xf32> to vector<8x128xf32>
    %89 = math.tanh %88 : vector<8x128xf32>
    %90 = vector.extract_strided_slice %87 {offsets = [0, 0], sizes = [8, 128], strides = [1, 1]} : vector<8x384xf32> to vector<8x128xf32>
    %91 = vector.extract_strided_slice %87 {offsets = [0, 128], sizes = [8, 128], strides = [1, 1]} : vector<8x384xf32> to vector<8x128xf32>
    %92 = vector.extract_strided_slice %87 {offsets = [0, 256], sizes = [8, 128], strides = [1, 1]} : vector<8x384xf32> to vector<8x128xf32>
    %93 = arith.mulf %91, %74 : vector<8x128xf32>
    %94 = arith.mulf %90, %89 : vector<8x128xf32>
    %95 = arith.addf %93, %94 : vector<8x128xf32>
    %96 = math.tanh %95 : vector<8x128xf32>
    %97 = arith.mulf %92, %96 : vector<8x128xf32>
    %98 = arith.addf %77, %97 : vector<8x128xf32>
    %99 = vector.extract_strided_slice %10 {offsets = [0, 4, 0], sizes = [8, 1, 512], strides = [1, 1, 1]} : vector<8x8x512xf32> to vector<8x1x512xf32>
    %100 = vector.shape_cast %99 : vector<8x1x512xf32> to vector<8x512xf32>
    %cst_23 = arith.constant dense<0.000000e+00> : vector<8x512xf32>
    %101 = tpu.matmul %97, %11, %cst_23 {dimension_numbers = #tpu.dot_dimension_numbers<[1], [0], [0], [1], [0, 0, 1, 1], [], []>} : vector<8x128xf32>, vector<128x512xf32>, vector<8x512xf32> -> vector<8x512xf32>
    %102 = arith.addf %100, %101 : vector<8x512xf32>
    %103 = vector.extract_strided_slice %102 {offsets = [0, 0], sizes = [8, 384], strides = [1, 1]} : vector<8x512xf32> to vector<8x384xf32>
    %104 = arith.negf %103 : vector<8x384xf32>
    %105 = math.exp %104 : vector<8x384xf32>
    %cst_24 = arith.constant 1.000000e+00 : f32
    %106 = vector.broadcast %cst_24 : f32 to vector<8x384xf32>
    %107 = arith.addf %106, %105 : vector<8x384xf32>
    %108 = arith.divf %106, %107 : vector<8x384xf32>
    %109 = vector.extract_strided_slice %102 {offsets = [0, 384], sizes = [8, 128], strides = [1, 1]} : vector<8x512xf32> to vector<8x128xf32>
    %110 = math.tanh %109 : vector<8x128xf32>
    %111 = vector.extract_strided_slice %108 {offsets = [0, 0], sizes = [8, 128], strides = [1, 1]} : vector<8x384xf32> to vector<8x128xf32>
    %112 = vector.extract_strided_slice %108 {offsets = [0, 128], sizes = [8, 128], strides = [1, 1]} : vector<8x384xf32> to vector<8x128xf32>
    %113 = vector.extract_strided_slice %108 {offsets = [0, 256], sizes = [8, 128], strides = [1, 1]} : vector<8x384xf32> to vector<8x128xf32>
    %114 = arith.mulf %112, %95 : vector<8x128xf32>
    %115 = arith.mulf %111, %110 : vector<8x128xf32>
    %116 = arith.addf %114, %115 : vector<8x128xf32>
    %117 = math.tanh %116 : vector<8x128xf32>
    %118 = arith.mulf %113, %117 : vector<8x128xf32>
    %119 = arith.addf %98, %118 : vector<8x128xf32>
    %120 = vector.extract_strided_slice %10 {offsets = [0, 5, 0], sizes = [8, 1, 512], strides = [1, 1, 1]} : vector<8x8x512xf32> to vector<8x1x512xf32>
    %121 = vector.shape_cast %120 : vector<8x1x512xf32> to vector<8x512xf32>
    %cst_25 = arith.constant dense<0.000000e+00> : vector<8x512xf32>
    %122 = tpu.matmul %118, %11, %cst_25 {dimension_numbers = #tpu.dot_dimension_numbers<[1], [0], [0], [1], [0, 0, 1, 1], [], []>} : vector<8x128xf32>, vector<128x512xf32>, vector<8x512xf32> -> vector<8x512xf32>
    %123 = arith.addf %121, %122 : vector<8x512xf32>
    %124 = vector.extract_strided_slice %123 {offsets = [0, 0], sizes = [8, 384], strides = [1, 1]} : vector<8x512xf32> to vector<8x384xf32>
    %125 = arith.negf %124 : vector<8x384xf32>
    %126 = math.exp %125 : vector<8x384xf32>
    %cst_26 = arith.constant 1.000000e+00 : f32
    %127 = vector.broadcast %cst_26 : f32 to vector<8x384xf32>
    %128 = arith.addf %127, %126 : vector<8x384xf32>
    %129 = arith.divf %127, %128 : vector<8x384xf32>
    %130 = vector.extract_strided_slice %123 {offsets = [0, 384], sizes = [8, 128], strides = [1, 1]} : vector<8x512xf32> to vector<8x128xf32>
    %131 = math.tanh %130 : vector<8x128xf32>
    %132 = vector.extract_strided_slice %129 {offsets = [0, 0], sizes = [8, 128], strides = [1, 1]} : vector<8x384xf32> to vector<8x128xf32>
    %133 = vector.extract_strided_slice %129 {offsets = [0, 128], sizes = [8, 128], strides = [1, 1]} : vector<8x384xf32> to vector<8x128xf32>
    %134 = vector.extract_strided_slice %129 {offsets = [0, 256], sizes = [8, 128], strides = [1, 1]} : vector<8x384xf32> to vector<8x128xf32>
    %135 = arith.mulf %133, %116 : vector<8x128xf32>
    %136 = arith.mulf %132, %131 : vector<8x128xf32>
    %137 = arith.addf %135, %136 : vector<8x128xf32>
    %138 = math.tanh %137 : vector<8x128xf32>
    %139 = arith.mulf %134, %138 : vector<8x128xf32>
    %140 = arith.addf %119, %139 : vector<8x128xf32>
    %141 = vector.extract_strided_slice %10 {offsets = [0, 6, 0], sizes = [8, 1, 512], strides = [1, 1, 1]} : vector<8x8x512xf32> to vector<8x1x512xf32>
    %142 = vector.shape_cast %141 : vector<8x1x512xf32> to vector<8x512xf32>
    %cst_27 = arith.constant dense<0.000000e+00> : vector<8x512xf32>
    %143 = tpu.matmul %139, %11, %cst_27 {dimension_numbers = #tpu.dot_dimension_numbers<[1], [0], [0], [1], [0, 0, 1, 1], [], []>} : vector<8x128xf32>, vector<128x512xf32>, vector<8x512xf32> -> vector<8x512xf32>
    %144 = arith.addf %142, %143 : vector<8x512xf32>
    %145 = vector.extract_strided_slice %144 {offsets = [0, 0], sizes = [8, 384], strides = [1, 1]} : vector<8x512xf32> to vector<8x384xf32>
    %146 = arith.negf %145 : vector<8x384xf32>
    %147 = math.exp %146 : vector<8x384xf32>
    %cst_28 = arith.constant 1.000000e+00 : f32
    %148 = vector.broadcast %cst_28 : f32 to vector<8x384xf32>
    %149 = arith.addf %148, %147 : vector<8x384xf32>
    %150 = arith.divf %148, %149 : vector<8x384xf32>
    %151 = vector.extract_strided_slice %144 {offsets = [0, 384], sizes = [8, 128], strides = [1, 1]} : vector<8x512xf32> to vector<8x128xf32>
    %152 = math.tanh %151 : vector<8x128xf32>
    %153 = vector.extract_strided_slice %150 {offsets = [0, 0], sizes = [8, 128], strides = [1, 1]} : vector<8x384xf32> to vector<8x128xf32>
    %154 = vector.extract_strided_slice %150 {offsets = [0, 128], sizes = [8, 128], strides = [1, 1]} : vector<8x384xf32> to vector<8x128xf32>
    %155 = vector.extract_strided_slice %150 {offsets = [0, 256], sizes = [8, 128], strides = [1, 1]} : vector<8x384xf32> to vector<8x128xf32>
    %156 = arith.mulf %154, %137 : vector<8x128xf32>
    %157 = arith.mulf %153, %152 : vector<8x128xf32>
    %158 = arith.addf %156, %157 : vector<8x128xf32>
    %159 = math.tanh %158 : vector<8x128xf32>
    %160 = arith.mulf %155, %159 : vector<8x128xf32>
    %161 = arith.addf %140, %160 : vector<8x128xf32>
    %162 = vector.extract_strided_slice %10 {offsets = [0, 7, 0], sizes = [8, 1, 512], strides = [1, 1, 1]} : vector<8x8x512xf32> to vector<8x1x512xf32>
    %163 = vector.shape_cast %162 : vector<8x1x512xf32> to vector<8x512xf32>
    %cst_29 = arith.constant dense<0.000000e+00> : vector<8x512xf32>
    %164 = tpu.matmul %160, %11, %cst_29 {dimension_numbers = #tpu.dot_dimension_numbers<[1], [0], [0], [1], [0, 0, 1, 1], [], []>} : vector<8x128xf32>, vector<128x512xf32>, vector<8x512xf32> -> vector<8x512xf32>
    %165 = arith.addf %163, %164 : vector<8x512xf32>
    %166 = vector.extract_strided_slice %165 {offsets = [0, 0], sizes = [8, 384], strides = [1, 1]} : vector<8x512xf32> to vector<8x384xf32>
    %167 = arith.negf %166 : vector<8x384xf32>
    %168 = math.exp %167 : vector<8x384xf32>
    %cst_30 = arith.constant 1.000000e+00 : f32
    %169 = vector.broadcast %cst_30 : f32 to vector<8x384xf32>
    %170 = arith.addf %169, %168 : vector<8x384xf32>
    %171 = arith.divf %169, %170 : vector<8x384xf32>
    %172 = vector.extract_strided_slice %165 {offsets = [0, 384], sizes = [8, 128], strides = [1, 1]} : vector<8x512xf32> to vector<8x128xf32>
    %173 = math.tanh %172 : vector<8x128xf32>
    %174 = vector.extract_strided_slice %171 {offsets = [0, 0], sizes = [8, 128], strides = [1, 1]} : vector<8x384xf32> to vector<8x128xf32>
    %175 = vector.extract_strided_slice %171 {offsets = [0, 128], sizes = [8, 128], strides = [1, 1]} : vector<8x384xf32> to vector<8x128xf32>
    %176 = vector.extract_strided_slice %171 {offsets = [0, 256], sizes = [8, 128], strides = [1, 1]} : vector<8x384xf32> to vector<8x128xf32>
    %177 = arith.mulf %175, %158 : vector<8x128xf32>
    %178 = arith.mulf %174, %173 : vector<8x128xf32>
    %179 = arith.addf %177, %178 : vector<8x128xf32>
    %180 = math.tanh %179 : vector<8x128xf32>
    %181 = arith.mulf %176, %180 : vector<8x128xf32>
    %182 = arith.addf %161, %181 : vector<8x128xf32>
    %c0_31 = arith.constant 0 : index
    %c0_32 = arith.constant 0 : index
    %183 = vector.load %arg11[%c0_31, %c0_32] : memref<8x128xf32, #tpu.memory_space<vmem>>, vector<8x128xf32>
    tpu.vector_store %arg11[%c0_31, %c0_32], %181 {strides = array<i32>} : memref<8x128xf32, #tpu.memory_space<vmem>>, vector<8x128xf32>,
    %c0_33 = arith.constant 0 : index
    %c0_34 = arith.constant 0 : index
    %184 = vector.load %arg12[%c0_33, %c0_34] : memref<8x128xf32, #tpu.memory_space<vmem>>, vector<8x128xf32>
    tpu.vector_store %arg12[%c0_33, %c0_34], %179 {strides = array<i32>} : memref<8x128xf32, #tpu.memory_space<vmem>>, vector<8x128xf32>,
    %c0_35 = arith.constant 0 : index
    %c0_36 = arith.constant 0 : index
    %185 = vector.load %arg13[%c0_35, %c0_36] : memref<8x128xf32, #tpu.memory_space<vmem>>, vector<8x128xf32>
    tpu.vector_store %arg13[%c0_35, %c0_36], %182 {strides = array<i32>} : memref<8x128xf32, #tpu.memory_space<vmem>>, vector<8x128xf32>,
    %c3_i32 = arith.constant 3 : i32
    %186 = arith.cmpi eq, %arg1, %c3_i32 : i32
    %187 = arith.extui %186 : i1 to i32
    %c0_i32_37 = arith.constant 0 : i32
    %188 = arith.cmpi ne, %187, %c0_i32_37 : i32
    scf.if %188 {
      %c0_38 = arith.constant 0 : index
      %c0_39 = arith.constant 0 : index
      %189 = vector.load %arg6[%c0_38, %c0_39] : memref<128x128xf32, #tpu.memory_space<vmem>>, vector<128x128xf32>
      %cst_40 = arith.constant dense<0.000000e+00> : vector<8x128xf32>
      %190 = tpu.matmul %182, %189, %cst_40 {dimension_numbers = #tpu.dot_dimension_numbers<[1], [0], [0], [1], [0, 0, 1, 1], [], []>} : vector<8x128xf32>, vector<128x128xf32>, vector<8x128xf32> -> vector<8x128xf32>
      %c0_41 = arith.constant 0 : index
      %c0_42 = arith.constant 0 : index
      %191 = vector.load %arg7[%c0_41, %c0_42] : memref<1x128xf32, #tpu.memory_space<vmem>>, vector<1x128xf32>
      %192 = vector.broadcast %191 : vector<1x128xf32> to vector<8x128xf32>
      %193 = arith.addf %190, %192 : vector<8x128xf32>
      %194 = math.tanh %193 : vector<8x128xf32>
      %c0_43 = arith.constant 0 : index
      %c0_44 = arith.constant 0 : index
      %195 = vector.load %arg8[%c0_43, %c0_44] : memref<128x128xf32, #tpu.memory_space<vmem>>, vector<128x128xf32>
      %cst_45 = arith.constant dense<0.000000e+00> : vector<8x128xf32>
      %196 = tpu.matmul %194, %195, %cst_45 {dimension_numbers = #tpu.dot_dimension_numbers<[1], [0], [0], [1], [0, 0, 1, 1], [], []>} : vector<8x128xf32>, vector<128x128xf32>, vector<8x128xf32> -> vector<8x128xf32>
      %c0_46 = arith.constant 0 : index
      %c0_47 = arith.constant 0 : index
      %197 = vector.load %arg9[%c0_46, %c0_47] : memref<1x128xf32, #tpu.memory_space<vmem>>, vector<1x128xf32>
      %198 = vector.broadcast %197 : vector<1x128xf32> to vector<8x128xf32>
      %199 = arith.addf %196, %198 : vector<8x128xf32>
      %200 = math.tanh %199 : vector<8x128xf32>
      %201 = arith.mulf %200, %200 : vector<8x128xf32>
      %cst_48 = arith.constant dense<0.000000e+00> : vector<8xf32>
      %202 = vector.multi_reduction <add>, %201, %cst_48 [1] : vector<8x128xf32> to vector<8xf32>
      %203 = vector.shape_cast %202 : vector<8xf32> to vector<8x1xf32>
      %cst_49 = arith.constant 9.99999996E-13 : f32
      %204 = vector.broadcast %cst_49 : f32 to vector<8x1xf32>
      %205 = arith.addf %203, %204 : vector<8x1xf32>
      %206 = math.rsqrt %205 : vector<8x1xf32>
      %207 = vector.broadcast %206 : vector<8x1xf32> to vector<8x128xf32>
      %208 = arith.mulf %200, %207 : vector<8x128xf32>
      %c0_50 = arith.constant 0 : index
      %c0_51 = arith.constant 0 : index
      %209 = vector.load %arg10[%c0_50, %c0_51] : memref<8x128xf32, #tpu.memory_space<vmem>>, vector<8x128xf32>
      tpu.vector_store %arg10[%c0_50, %c0_51], %208 {strides = array<i32>} : memref<8x128xf32, #tpu.memory_space<vmem>>, vector<8x128xf32>,
    } else {
    }
    return
  }
  func.func @transform_0(%arg0: i32, %arg1: i32) -> (i32, i32, i32) {
    %c0_i32 = arith.constant 0 : i32
    %c0_i32_0 = arith.constant 0 : i32
    return %arg0, %arg1, %c0_i32 : i32, i32, i32
  }
  func.func @transform_1(%arg0: i32, %arg1: i32) -> (i32, i32) {
    %c0_i32 = arith.constant 0 : i32
    %c0_i32_0 = arith.constant 0 : i32
    %c0_i32_1 = arith.constant 0 : i32
    return %c0_i32, %c0_i32_0 : i32, i32
  }
  func.func @transform_2(%arg0: i32, %arg1: i32) -> (i32, i32) {
    %c0_i32 = arith.constant 0 : i32
    %c0_i32_0 = arith.constant 0 : i32
    %c0_i32_1 = arith.constant 0 : i32
    return %c0_i32, %c0_i32_0 : i32, i32
  }
  func.func @transform_3(%arg0: i32, %arg1: i32) -> (i32, i32) {
    %c0_i32 = arith.constant 0 : i32
    %c0_i32_0 = arith.constant 0 : i32
    %c0_i32_1 = arith.constant 0 : i32
    return %c0_i32, %c0_i32_0 : i32, i32
  }
  func.func @transform_4(%arg0: i32, %arg1: i32) -> (i32, i32) {
    %c0_i32 = arith.constant 0 : i32
    %c0_i32_0 = arith.constant 0 : i32
    %c0_i32_1 = arith.constant 0 : i32
    return %c0_i32, %c0_i32_0 : i32, i32
  }
  func.func @transform_5(%arg0: i32, %arg1: i32) -> (i32, i32) {
    %c0_i32 = arith.constant 0 : i32
    %c0_i32_0 = arith.constant 0 : i32
    %c0_i32_1 = arith.constant 0 : i32
    return %c0_i32, %c0_i32_0 : i32, i32
  }
  func.func @transform_6(%arg0: i32, %arg1: i32) -> (i32, i32) {
    %c0_i32 = arith.constant 0 : i32
    %c0_i32_0 = arith.constant 0 : i32
    %c0_i32_1 = arith.constant 0 : i32
    return %c0_i32, %c0_i32_0 : i32, i32
  }
  func.func @transform_7(%arg0: i32, %arg1: i32) -> (i32, i32) {
    %c0_i32 = arith.constant 0 : i32
    %c0_i32_0 = arith.constant 0 : i32
    %c0_i32_1 = arith.constant 0 : i32
    return %c0_i32, %c0_i32_0 : i32, i32
  }
  func.func @transform_8(%arg0: i32, %arg1: i32) -> (i32, i32) {
    %c0_i32 = arith.constant 0 : i32
    %c0_i32_0 = arith.constant 0 : i32
    return %arg0, %c0_i32 : i32, i32
  }
}

</mosaic_0001>

<bundles_post_ra>
// kernel: tpu_custom_call.1
= control target key start
LH: loop header
LB: loop body
LE: loop exit
PB: predicated region body
PF: predicated region fallthrough
CT: control target
= control target key end

     0   :  { %s9303_s0 = inlined_call_operand.hbm [shape: f32[8,32,32], index: 0, kind: input, shape index: {}]   ;;  %s9304_s1 = inlined_call_operand.hbm [shape: f32[32,512], index: 1, kind: input, shape index: {}]   ;;  %s9305_s2 = inlined_call_operand.hbm [shape: f32[128,512], index: 2, kind: input, shape index: {}]   ;;  %s9306_s3 = inlined_call_operand.vmem [shape: f32[1,512], index: 3, kind: input, shape index: {}]   ;;  %s9307_s4 = inlined_call_operand.hbm [shape: f32[128,128], index: 4, kind: input, shape index: {}]   ;;  %s9308_s5 = inlined_call_operand.vmem [shape: f32[1,128], index: 5, kind: input, shape index: {}]   ;;  %s9309_s6 = inlined_call_operand.hbm [shape: f32[128,128], index: 6, kind: input, shape index: {}]   ;;  %s9310_s7 = inlined_call_operand.vmem [shape: f32[1,128], index: 7, kind: input, shape index: {}]   ;;  %s9311_s8 = inlined_call_operand.hbm [shape: f32[8,128], index: 8, kind: output, shape index: {}]  }
   0x1   :  { %9549 = sst [smem:[#allocation98_spill]] %s9303_s0 }
   0x2   :  { %9550 = sst [smem:[#allocation99_spill]] %s9304_s1 }
   0x3   :  { %13 = vsyncpa [#allocation6], 0 }
   0x4   :  { %15 = vsyncpa [#allocation6 + $0x1], 0 }
   0x5   :  { %16 = vsyncpa [#allocation9], 0 }
   0x6   :  { %17 = vsyncpa [#allocation12], 0 }
   0x7   :  { %18 = vsyncpa [#allocation7], 0  ;;  %s6885_s27 = smov 0   ;;  %s6887_s28 = smov 0  }
   0x8   :  { %s6889_s29 = smov 0   ;;  %s6891_s30 = smov 0  }
   0x9   :  { %s6893_s9 = smov 0   ;;  %s6895_s10 = smov 0  }
   0xa LB: > { %s9312_s11 = sadd.s32 4294967295, %s6824_s10   ;;  %p58_p0 = scmp.ne.s32.totalorder %s6808_s28, %s6804_s27  ;;  %s6824_s10 = sphi %s6895_s10, %s24_s10   ;;  %s6820_s9 = sphi %s6893_s9, %s10018_s9   ;;  %s6816_s30 = sphi %s6891_s30, %s10017_s30   ;;  %s6812_s29 = sphi %s6889_s29, %s10016_s29   ;;  %s6808_s28 = sphi %s6887_s28, %s10015_s28   ;;  %s6804_s27 = sphi %s6885_s27, %s10014_s27  }
   0xb   : > { %p6917_p1 = scmp.eq.s32.totalorder %s9312_s11, 0  ;;  %p4939_p2 = scmp.ge.s32.totalorder %s6824_s10, 1 }
   0xc   : > { %p242_p3 = scmp.lt.s32.totalorder %s6824_s10, 5  ;;  %s6826_s15 = smov [#allocation8]  }
   0xd   : > { %p6925_p4 = por %p6917_p1, %p58_p0  ;;  %s254_s16 = sshll.u32 %s6826_s15, 4  ;;  %s255_s16 = int_to_ptr.vmem [resolvable:$true] %s254_s16 }
   0xe   : > { %p6929_p5 = pnand %p4939_p2, %p242_p3  ;;  %s6827_s18 = smov [#allocation11]  }
   0xf   : > { %s283_s19 = sshll.u32 %s6827_s18, 4  ;;  %s6617_s20 = scalar_lea.vmem %s255_s16, 2048  ;;  %s284_s19 = int_to_ptr.vmem [resolvable:$true] %s283_s19 }
  0x10   : > { %p5295_p6 = pneg %p6929_p5  ;;  %p6618_p9 = scmp.ne.s32.totalorder %s255_s16, %s6617_s20 }
  0x11   : > { %p6625_p12 = scmp.lt.s32.totalorder %s255_s16, %s255_s16  ;;  %p6626_p13 = scmp.lt.s32.totalorder %s6617_s20, %s6617_s20 }
  0x12   : > { %p6937_p7 = pnand %p5295_p6, %p6917_p1 }
  0x13   : > { %p6627_p0 = por %p6626_p13, %p6625_p12 }
  0x14   : > { %p6608_p8 = pneg %p6937_p7 }
  0x16   : > { %p6620_p10 = pnand %p6618_p9, %p6608_p8 }
  0x18   : > { %p6621_p11 = pneg %p6620_p10 }
  0x1a   : > { %p6628_p2 = pnand %p6627_p0, %p6621_p11 }
  0x1c   : > { %6631 = shalt.err (!%p6628_p2)
}
  0x1d   : > { %s9313_s21 = smov 512   ;;  %s6829_s22 = smov 32  }
  0x1e   : > { %s9555_s1 = sld [smem:[#allocation99_spill]]  ;;  %s6643_s25 = scalar_lea.vmem %s284_s19, 2048 }
  0x1f   : > { %p6644_p3 = scmp.ne.s32.totalorder %s284_s19, %s6643_s25  ;;  %p6651_p10 = scmp.lt.s32.totalorder %s284_s19, %s284_s19 }
  0x20   : > { %p6652_p11 = scmp.lt.s32.totalorder %s6643_s25, %s6643_s25 }
  0x21   : > { %p6646_p6 = pnand %p6644_p3, %p6608_p8 }
  0x22   : > { %p6653_p12 = por %p6652_p11, %p6651_p10 }
  0x23   : > { %p6647_p9 = pneg %p6646_p6 }
  0x24   : > { %5298 = dma.hbm_to_vmem [thread:$0]  (!%p6937_p7), %s9555_s1, 2048, %s255_s16, [#allocation9], %s9313_s21, %s9313_s21, %s6829_s22  }
  0x25   : > { %p6654_p13 = pnand %p6653_p12, %p6647_p9 }
  0x27   : > { %6657 = shalt.err (!%p6654_p13)
}
  0x28   : > { %s9314_s26 = smov 128   ;;  %s9315_s27 = smov 8  }
  0x29   : > { %5304 = dma.hbm_to_vmem [thread:$0]  (!%p6937_p7), %s9307_s4, 2048, %s284_s19, [#allocation12], %s9314_s26, %s9314_s26, %s9315_s27  }
  0x2a   : > { %s6832_s18 = smov [#allocation10]   ;;  %s6833_s23 = smov [#allocation13]  }
  0x2b   : > { %s267_s20 = sshll.u32 %s6832_s18, 4  ;;  %s299_s24 = sshll.u32 %s6833_s23, 4  ;;  %s268_s20 = int_to_ptr.vmem [resolvable:$true] %s267_s20  ;;  %s300_s24 = int_to_ptr.vmem [resolvable:$true] %s299_s24 }
  0x2c   : > { %s6669_s25 = scalar_lea.vmem %s268_s20, 8192  ;;  %p6677_p6 = scmp.lt.s32.totalorder %s268_s20, %s268_s20 }
  0x2d   : > { %p6670_p0 = scmp.ne.s32.totalorder %s268_s20, %s6669_s25  ;;  %p6678_p9 = scmp.lt.s32.totalorder %s6669_s25, %s6669_s25 }
  0x2f   : > { %p6672_p2 = pnand %p6670_p0, %p6608_p8  ;;  %p6679_p10 = por %p6678_p9, %p6677_p6 }
  0x31   : > { %p6673_p3 = pneg %p6672_p2 }
  0x33   : > { %p6680_p11 = pnand %p6679_p10, %p6673_p3 }
  0x35   : > { %6683 = shalt.err (!%p6680_p11)
}
  0x36   : > { %5301 = dma.hbm_to_vmem [thread:$0]  (!%p6937_p7), %s9305_s2, 8192, %s268_s20, [#allocation9], %s9313_s21, %s9313_s21, %s6829_s22  }
  0x37   : > { %s6695_s16 = scalar_lea.vmem %s300_s24, 2048  ;;  %p6703_p2 = scmp.lt.s32.totalorder %s300_s24, %s300_s24 }
  0x38   : > { %p6696_p12 = scmp.ne.s32.totalorder %s300_s24, %s6695_s16  ;;  %p6704_p6 = scmp.lt.s32.totalorder %s6695_s16, %s6695_s16 }
  0x3a   : > { %p6698_p13 = pnand %p6696_p12, %p6608_p8  ;;  %p6705_p3 = por %p6704_p6, %p6703_p2 }
  0x3c   : > { %p6699_p0 = pneg %p6698_p13 }
  0x3e   : > { %p6706_p9 = pnand %p6705_p3, %p6699_p0 }
  0x40   : > { %6709 = shalt.err (!%p6706_p9)
}
  0x41   : > { %5307 = dma.hbm_to_vmem [thread:$0]  (!%p6937_p7), %s9309_s6, 2048, %s300_s24, [#allocation12], %s9314_s26, %s9314_s26, %s9315_s27  }
  0x42   : > { %s33_s22 = sadd.s32 1, %s6820_s9  ;;  %s45_s20 = sadd.s32 1, %s6812_s29 }
  0x43   : > { %p34_p8 = scmp.ge.s32.totalorder %s33_s22, 4  ;;  %p52_p10 = scmp.ne.s32.totalorder %s6812_s29, %s6808_s28 }
  0x44   : > { %p53_p11 = scmp.eq.s32.totalorder %s6824_s10, 0  ;;  %p5316_p12 = scmp.lt.s32.totalorder %s6824_s10, 4 }
  0x45   : > { %s10020_s22 = smov (%p34_p8, %s33_s22), 0  ;;  %s316_s17 = sand.u32 1, %s6812_s29  }
  0x46   : > { %p54_p13 = por %p53_p11, %p52_p10  ;;  %s41_s25 = ssub.s32 %s6820_s9, %s10020_s22 }
  0x47   : > { %p43_p0 = scmp.eq.s32.totalorder %s41_s25, 0  ;;  %s4945_s19 = sshll.u32 %s316_s17, 6 }
  0x48   : > { %s4946_s15 = sshll.u32 %s6820_s9, 7  ;;  %s9556_s0 = sld [smem:[#allocation98_spill]] }
  0x49   : > { %s7000_s16 = scalar_select %p43_p0, %s6812_s29, %s45_s20  }
  0x4a   : > { %s320_s11 = scalar_lea.vmem [#allocation5], %s4945_s19  ;;  %p7007_p7 = pnand %p5316_p12, %p54_p13 }
  0x4b   : > { %s329_s21 = sshll.u32 %s320_s11, 4  ;;  %s317_s27 = scalar_lea.sflag [#allocation6], %s316_s17  ;;  %s330_s21 = int_to_ptr.vmem [resolvable:$true] %s329_s21 }
  0x4c   : > { %p6712_p2 = pneg %p7007_p7  ;;  %s6723_s25 = scalar_lea.vmem %s330_s21, 1024 }
  0x4d   : > { %p6724_p6 = scmp.ne.s32.totalorder %s330_s21, %s6723_s25  ;;  %s6834_s20 = smov [#allocation5]  }
  0x4e   : > { %s328_s23 = scalar_lea.hbm %s9556_s0, %s4946_s15  ;;  %s6728_s1 = sshll.u32 %s6834_s20, 4  ;;  %s6729_s1 = int_to_ptr.vmem [resolvable:$false] %s6728_s1 }
  0x4f   : > { %p6726_p3 = pnand %p6724_p6, %p6712_p2  ;;  %s6730_s15 = scalar_lea.vmem %s6729_s1, 2048 }
  0x50   : > { %p6731_p8 = scmp.lt.s32.totalorder %s330_s21, %s6729_s1  ;;  %p6732_p10 = scmp.lt.s32.totalorder %s6730_s15, %s6723_s25 }
  0x51   : > { %p6727_p9 = pneg %p6726_p3 }
  0x52   : > { %p6733_p11 = por %p6732_p10, %p6731_p8 }
  0x54   : > { %p6734_p0 = pnand %p6733_p11, %p6727_p9 }
  0x56   : > { %6737 = shalt.err (!%p6734_p0)
}
  0x57   : > { %s9558_s11 = smov 8   ;;  %s9559_s19 = smov 128  }
  0x58   : > { %s9560_s17 = smov 512   ;;  %341 = sbr.rel (%p6929_p5) target bundleno = 3054 (0xbee), region = 52 }
  0x59   : > { %5311 = dma.hbm_to_vmem [thread:$0]  (!%p7007_p7), %s328_s23, 1024, %s330_s21, %s317_s27, %s9560_s17, %s9559_s19, %s9558_s11  }
  0x5d   : > { %s343_s18 = sand.u32 1, %s6808_s28  }
  0x5e   : > { %s4948_s24 = sshll.u32 %s343_s18, 6  ;;  %s344_s20 = scalar_lea.sflag [#allocation6], %s343_s18 }
  0x5f   : > { %s7021_s0 = scalar_lea.vmem [#allocation5], %s4948_s24 }
  0x60   : > { %6787 = dma.done.wait (%p6925_p4), %s344_s20, 1024  }
  0x61   : > { %6789 = vsyncadd (%p6925_p4), %s344_s20, 4294966272 }
  0x62   : > { %6791 = dma.done.wait (%p6917_p1), [#allocation9], 10240  }
  0x63   : > { %6793 = vsyncadd (%p6917_p1), [#allocation9], 4294957056 }
  0x64   : > { %6795 = dma.done.wait (%p6917_p1), [#allocation12], 4096  }
  0x65   : > { %6797 = vsyncadd (%p6917_p1), [#allocation12], 4294963200  ;;  %p4953_p5 = scmp.ne.s32.totalorder %s6816_s30, 0 }
  0x67   : > { %395 = sbr.rel (%p4953_p5) target bundleno = 111 (0x6f), region = 76 }
  0x6c   : > { %v6835_v0 = vmov 0.0  }
  0x6d   : > { %396 = vst [vmem:[#allocation2] sm:$0xff] %v6835_v0  ;;  %397 = vst [vmem:[#allocation3] sm:$0xff] %v6835_v0 }
  0x6e   : > { %398 = vst [vmem:[#allocation4] sm:$0xff] %v6835_v0 }
  0x6f PF: > { %v420_v1 = vld [vmem:[#allocation8 + $0x68] sm:$0xff]  ;;  %v422_v2 = vld [vmem:[#allocation8 + $0x78] sm:$0xff]  ;;  %v419_v3 = vld [vmem:[#allocation8 + $0x60] sm:$0xff]  ;;  %vm445_vm0 = vcmask 261120   ;;  %v9316_v18 = vmov 0.0   ;;  %vm1218_vm1 = vcmask 1041409  }
  0x70   : > { %494 = vmatprep.subr.mxu0 %v420_v1  ;;  %607 = vmatprep.subr.mxu1 %v422_v2  ;;  %v421_v4 = vld [vmem:[#allocation8 + $0x70] sm:$0xff]  ;;  %v416_v5 = vld [vmem:[#allocation8 + $0x48] sm:$0xff]  ;;  %v418_v6 = vld [vmem:[#allocation8 + $0x58] sm:$0xff]  ;;  %vm1221_vm2 = vcmask 1042434   ;;  %vm1224_vm3 = vcmask 1043459   ;;  %vm1227_vm4 = vcmask 1044484  }
  0x71   : > { %495 = vmatpush1.msra.mxu0 %v419_v3  ;;  %608 = vmatpush1.msra.mxu1 %v421_v4  ;;  %v415_v7 = vld [vmem:[#allocation8 + $0x40] sm:$0xff]  ;;  %v417_v8 = vld [vmem:[#allocation8 + $0x50] sm:$0xff]  ;;  %v412_v9 = vld [vmem:[#allocation8 + $0x28] sm:$0xff]  ;;  %vm1230_vm5 = vcmask 1045509   ;;  %vm1233_vm6 = vcmask 1046534   ;;  %vm1236_vm7 = vcmask 1047559  }
  0x72   : > { %496 = vmatprep.subr.mxu0 %v416_v5  ;;  %609 = vmatprep.subr.mxu1 %v418_v6  ;;  %v414_v10 = vld [vmem:[#allocation8 + $0x38] sm:$0xff]  ;;  %v411_v11 = vld [vmem:[#allocation8 + $0x20] sm:$0xff]  ;;  %v413_v12 = vld [vmem:[#allocation8 + $0x30] sm:$0xff]  ;;  %p5162_p1 = scmp.ne.s32.totalorder %s6816_s30, 3 }
  0x73   : > { %497 = vmatpush1.msra.mxu0 %v415_v7  ;;  %610 = vmatpush1.msra.mxu1 %v417_v8  ;;  %v408_v13 = vld [vmem:[#allocation8 + $0x8] sm:$0xff]  ;;  %v410_v14 = vld [vmem:[#allocation8 + $0x18] sm:$0xff]  ;;  %v407_v15 = vld [vmem:[#allocation8] sm:$0xff] }
  0x74   : > { %498 = vmatprep.subr.mxu0 %v412_v9  ;;  %611 = vmatprep.subr.mxu1 %v414_v10  ;;  %v409_v16 = vld [vmem:[#allocation8 + $0x10] sm:$0xff]  ;;  %v399_v17 = vld [vmem:[%s7021_s0] sm:$0xff]  ;;  %v7038_v19 = vld [vmem:[#allocation10 + $0x1e8] sm:$0xff] }
  0x75   : > { %499 = vmatpush1.msra.mxu0 %v411_v11  ;;  %612 = vmatpush1.msra.mxu1 %v413_v12  ;;  %v7040_v20 = vld [vmem:[#allocation10 + $0x1f8] sm:$0xff]  ;;  %v7043_v21 = vld [vmem:[#allocation10 + $0x1e0] sm:$0xff]  ;;  %v7045_v22 = vld [vmem:[#allocation10 + $0x1f0] sm:$0xff] }
  0x76   : > { %500 = vmatprep.subr.mxu0 %v408_v13  ;;  %613 = vmatprep.subr.mxu1 %v410_v14  ;;  %v7049_v23 = vld [vmem:[#allocation10 + $0x1c8] sm:$0xff]  ;;  %v7051_v24 = vld [vmem:[#allocation10 + $0x1d8] sm:$0xff]  ;;  %v7057_v25 = vld [vmem:[#allocation10 + $0x1c0] sm:$0xff] }
  0x77   : > { %501 = vmatpush1.msra.mxu0 %v407_v15  ;;  %534 = vmatprep.mubr.f32.mxu0 %v9316_v18  ;;  %v7059_v26 = vld [vmem:[#allocation10 + $0x1d0] sm:$0xff]  ;;  %v400_v27 = vld [vmem:[%s7021_s0 + $0x8] sm:$0xff]  ;;  %v7068_v29 = vld [vmem:[#allocation10 + $0x1b8] sm:$0xff] }
  0x78   : > { %614 = vmatpush1.msra.mxu1 %v409_v16  ;;  %647 = vmatprep.mubr.f32.mxu1 %v9316_v18  ;;  %v7066_v28 = vld [vmem:[#allocation10 + $0x1a8] sm:$0xff]  ;;  %v7072_v30 = vld [vmem:[#allocation10 + $0x1a0] sm:$0xff]  ;;  %v7074_v31 = vld [vmem:[#allocation10 + $0x1b0] sm:$0xff] }
  0x79   : > { %4954 = vmatmul.mubr.msk.f32.vlgmr.msra.gmra.mxu0 %vm445_vm0, %v399_v17  ;;  %4962 = vmatmul.mubr.msk.f32.vlgmr.msra.gmra.mxu1 %vm445_vm0, %v399_v17  ;;  %v7078_v32 = vld [vmem:[#allocation10 + $0x188] sm:$0xff]  ;;  %v7080_v33 = vld [vmem:[#allocation10 + $0x198] sm:$0xff]  ;;  %v7086_v34 = vld [vmem:[#allocation10 + $0x180] sm:$0xff] }
  0x7a   : > { %763 = vmatprep.subr.mxu0 %v7038_v19  ;;  %834 = vmatprep.subr.mxu1 %v7040_v20  ;;  %v7088_v35 = vld [vmem:[#allocation10 + $0x190] sm:$0xff]  ;;  %v7095_v37 = vld [vmem:[#allocation10 + $0x168] sm:$0xff]  ;;  %v7097_v38 = vld [vmem:[#allocation10 + $0x178] sm:$0xff] }
  0x7b   : > { %764 = vmatpush1.msra.mxu0 %v7043_v21  ;;  %835 = vmatpush1.msra.mxu1 %v7045_v22  ;;  %v401_v36 = vld [vmem:[%s7021_s0 + $0x10] sm:$0xff]  ;;  %v7101_v39 = vld [vmem:[#allocation10 + $0x160] sm:$0xff]  ;;  %v7107_v41 = vld [vmem:[#allocation10 + $0x148] sm:$0xff] }
  0x7c   : > { %765 = vmatprep.subr.mxu0 %v7049_v23  ;;  %836 = vmatprep.subr.mxu1 %v7051_v24  ;;  %v7103_v40 = vld [vmem:[#allocation10 + $0x170] sm:$0xff]  ;;  %v7109_v42 = vld [vmem:[#allocation10 + $0x158] sm:$0xff]  ;;  %v7115_v43 = vld [vmem:[#allocation10 + $0x140] sm:$0xff] }
  0x7d   : > { %540 = vmatprep.mubr.f32.mxu0 %v9316_v18  ;;  %653 = vmatprep.mubr.f32.mxu1 %v9316_v18  ;;  %v7117_v44 = vld [vmem:[#allocation10 + $0x150] sm:$0xff]  ;;  %v402_v45 = vld [vmem:[%s7021_s0 + $0x18] sm:$0xff]  ;;  %v7124_v46 = vld [vmem:[#allocation10 + $0x128] sm:$0xff] }
  0x7e   : > { %766 = vmatpush1.msra.mxu0 %v7057_v25  ;;  %837 = vmatpush1.msra.mxu1 %v7059_v26  ;;  %v7126_v47 = vld [vmem:[#allocation10 + $0x138] sm:$0xff]  ;;  %v7130_v48 = vld [vmem:[#allocation10 + $0x120] sm:$0xff]  ;;  %v7132_v49 = vld [vmem:[#allocation10 + $0x130] sm:$0xff] }
  0x7f   : > { %4955 = vmatmul.mubr.msk.f32.gmra.mxu0 %vm445_vm0, %v400_v27  ;;  %4963 = vmatmul.mubr.msk.f32.gmra.mxu1 %vm445_vm0, %v400_v27  ;;  %v7136_v50 = vld [vmem:[#allocation10 + $0x108] sm:$0xff]  ;;  %v7138_v51 = vld [vmem:[#allocation10 + $0x118] sm:$0xff]  ;;  %v7144_v52 = vld [vmem:[#allocation10 + $0x100] sm:$0xff] }
  0x80   : > { %767 = vmatprep.subr.mxu0 %v7066_v28  ;;  %838 = vmatprep.subr.mxu1 %v7068_v29  ;;  %v7146_v53 = vld [vmem:[#allocation10 + $0x110] sm:$0xff]  ;;  %v403_v54 = vld [vmem:[%s7021_s0 + $0x20] sm:$0xff]  ;;  %v7153_v55 = vld [vmem:[#allocation10 + $0xe8] sm:$0xff] }
  0x81   : > { %768 = vmatpush1.msra.mxu0 %v7072_v30  ;;  %839 = vmatpush1.msra.mxu1 %v7074_v31  ;;  %v7155_v56 = vld [vmem:[#allocation10 + $0xf8] sm:$0xff]  ;;  %v7159_v57 = vld [vmem:[#allocation10 + $0xe0] sm:$0xff]  ;;  %v7161_v58 = vld [vmem:[#allocation10 + $0xf0] sm:$0xff] }
  0x82   : > { %769 = vmatprep.subr.mxu0 %v7078_v32  ;;  %840 = vmatprep.subr.mxu1 %v7080_v33  ;;  %v7165_v59 = vld [vmem:[#allocation10 + $0xc8] sm:$0xff]  ;;  %v7167_v60 = vld [vmem:[#allocation10 + $0xd8] sm:$0xff]  ;;  %v7173_v61 = vld [vmem:[#allocation10 + $0xc0] sm:$0xff] }
  0x83   : > { %546 = vmatprep.mubr.f32.mxu0 %v9316_v18  ;;  %659 = vmatprep.mubr.f32.mxu1 %v9316_v18  ;;  %v7175_v62 = vld [vmem:[#allocation10 + $0xd0] sm:$0xff]  ;;  %v404_v63 = vld [vmem:[%s7021_s0 + $0x28] sm:$0xff]  ;;  %v7184_v1 = vld [vmem:[#allocation10 + $0xb8] sm:$0xff] }
  0x84   : > { %770 = vmatpush1.msra.mxu0 %v7086_v34  ;;  %841 = vmatpush1.msra.mxu1 %v7088_v35  ;;  %v7182_v0 = vld [vmem:[#allocation10 + $0xa8] sm:$0xff]  ;;  %v7188_v2 = vld [vmem:[#allocation10 + $0xa0] sm:$0xff]  ;;  %v7190_v3 = vld [vmem:[#allocation10 + $0xb0] sm:$0xff] }
  0x85   : > { %4956 = vmatmul.mubr.msk.f32.gmra.mxu0 %vm445_vm0, %v401_v36  ;;  %4964 = vmatmul.mubr.msk.f32.gmra.mxu1 %vm445_vm0, %v401_v36  ;;  %v7194_v4 = vld [vmem:[#allocation10 + $0x88] sm:$0xff]  ;;  %v7196_v5 = vld [vmem:[#allocation10 + $0x98] sm:$0xff]  ;;  %v7202_v6 = vld [vmem:[#allocation10 + $0x80] sm:$0xff] }
  0x86   : > { %771 = vmatprep.subr.mxu0 %v7095_v37  ;;  %842 = vmatprep.subr.mxu1 %v7097_v38  ;;  %v7204_v7 = vld [vmem:[#allocation10 + $0x90] sm:$0xff]  ;;  %v7211_v9 = vld [vmem:[#allocation10 + $0x68] sm:$0xff]  ;;  %v7213_v10 = vld [vmem:[#allocation10 + $0x78] sm:$0xff] }
  0x87   : > { %772 = vmatpush1.msra.mxu0 %v7101_v39  ;;  %843 = vmatpush1.msra.mxu1 %v7103_v40  ;;  %v405_v8 = vld [vmem:[%s7021_s0 + $0x30] sm:$0xff]  ;;  %v7217_v11 = vld [vmem:[#allocation10 + $0x60] sm:$0xff]  ;;  %v7223_v13 = vld [vmem:[#allocation10 + $0x48] sm:$0xff] }
  0x88   : > { %773 = vmatprep.subr.mxu0 %v7107_v41  ;;  %844 = vmatprep.subr.mxu1 %v7109_v42  ;;  %v7219_v12 = vld [vmem:[#allocation10 + $0x70] sm:$0xff]  ;;  %v7225_v14 = vld [vmem:[#allocation10 + $0x58] sm:$0xff]  ;;  %v7231_v15 = vld [vmem:[#allocation10 + $0x40] sm:$0xff] }
  0x89   : > { %552 = vmatprep.mubr.f32.mxu0 %v9316_v18  ;;  %665 = vmatprep.mubr.f32.mxu1 %v9316_v18  ;;  %9561 = vst [vmem:[#allocation19_spill] sm:$0xff] %v7231_v15  ;;  %v7233_v16 = vld [vmem:[#allocation10 + $0x50] sm:$0xff]  ;;  %v406_v17 = vld [vmem:[%s7021_s0 + $0x38] sm:$0xff]  ;;  %v7240_v27 = vld [vmem:[#allocation10 + $0x28] sm:$0xff] }
  0x8a   : > { %774 = vmatpush1.msra.mxu0 %v7115_v43  ;;  %845 = vmatpush1.msra.mxu1 %v7117_v44  ;;  %9562 = vst [vmem:[#allocation20_spill] sm:$0xff] %v7233_v16  ;;  %v7242_v36 = vld [vmem:[#allocation10 + $0x38] sm:$0xff] }
  0x8b   : > { %4957 = vmatmul.mubr.msk.f32.gmra.mxu0 %vm445_vm0, %v402_v45  ;;  %4965 = vmatmul.mubr.msk.f32.gmra.mxu1 %vm445_vm0, %v402_v45  ;;  %v7246_v45 = vld [vmem:[#allocation10 + $0x20] sm:$0xff] }
  0x8c   : > { %775 = vmatprep.subr.mxu0 %v7124_v46  ;;  %846 = vmatprep.subr.mxu1 %v7126_v47 }
  0x8d   : > { %776 = vmatpush1.msra.mxu0 %v7130_v48  ;;  %847 = vmatpush1.msra.mxu1 %v7132_v49 }
  0x8e   : > { %777 = vmatprep.subr.mxu0 %v7136_v50  ;;  %848 = vmatprep.subr.mxu1 %v7138_v51 }
  0x8f   : > { %558 = vmatprep.mubr.f32.mxu0 %v9316_v18  ;;  %671 = vmatprep.mubr.f32.mxu1 %v9316_v18 }
  0x90   : > { %778 = vmatpush1.msra.mxu0 %v7144_v52  ;;  %849 = vmatpush1.msra.mxu1 %v7146_v53 }
  0x91   : > { %4958 = vmatmul.mubr.msk.f32.gmra.mxu0 %vm445_vm0, %v403_v54  ;;  %4966 = vmatmul.mubr.msk.f32.gmra.mxu1 %vm445_vm0, %v403_v54  ;;  %v7248_v54 = vld [vmem:[#allocation10 + $0x30] sm:$0xff] }
  0x92   : > { %779 = vmatprep.subr.mxu0 %v7153_v55  ;;  %850 = vmatprep.subr.mxu1 %v7155_v56 }
  0x93   : > { %780 = vmatpush1.msra.mxu0 %v7159_v57  ;;  %851 = vmatpush1.msra.mxu1 %v7161_v58 }
  0x94   : > { %781 = vmatprep.subr.mxu0 %v7165_v59  ;;  %852 = vmatprep.subr.mxu1 %v7167_v60 }
  0x95   : > { %564 = vmatprep.mubr.f32.mxu0 %v9316_v18  ;;  %677 = vmatprep.mubr.f32.mxu1 %v9316_v18 }
  0x96   : > { %782 = vmatpush1.msra.mxu0 %v7173_v61  ;;  %853 = vmatpush1.msra.mxu1 %v7175_v62 }
  0x97   : > { %4959 = vmatmul.mubr.msk.f32.gmra.mxu0 %vm445_vm0, %v404_v63  ;;  %4967 = vmatmul.mubr.msk.f32.gmra.mxu1 %vm445_vm0, %v404_v63  ;;  %v7252_v63 = vld [vmem:[#allocation10 + $0x8] sm:$0xff] }
  0x98   : > { %783 = vmatprep.subr.mxu0 %v7182_v0  ;;  %854 = vmatprep.subr.mxu1 %v7184_v1 }
  0x99   : > { %784 = vmatpush1.msra.mxu0 %v7188_v2  ;;  %855 = vmatpush1.msra.mxu1 %v7190_v3 }
  0x9a   : > { %785 = vmatprep.subr.mxu0 %v7194_v4  ;;  %856 = vmatprep.subr.mxu1 %v7196_v5 }
  0x9b   : > { %570 = vmatprep.mubr.f32.mxu0 %v9316_v18  ;;  %683 = vmatprep.mubr.f32.mxu1 %v9316_v18 }
  0x9c   : > { %786 = vmatpush1.msra.mxu0 %v7202_v6  ;;  %857 = vmatpush1.msra.mxu1 %v7204_v7 }
  0x9d   : > { %4960 = vmatmul.mubr.msk.f32.gmra.mxu0 %vm445_vm0, %v405_v8  ;;  %4968 = vmatmul.mubr.msk.f32.gmra.mxu1 %vm445_vm0, %v405_v8  ;;  %v7254_v8 = vld [vmem:[#allocation10 + $0x18] sm:$0xff] }
  0x9e   : > { %787 = vmatprep.subr.mxu0 %v7211_v9  ;;  %858 = vmatprep.subr.mxu1 %v7213_v10 }
  0x9f   : > { %788 = vmatpush1.msra.mxu0 %v7217_v11  ;;  %859 = vmatpush1.msra.mxu1 %v7219_v12 }
  0xa0   : > { %789 = vmatprep.subr.mxu0 %v7223_v13  ;;  %860 = vmatprep.subr.mxu1 %v7225_v14 }
  0xa1   : > { %576 = vmatprep.mubr.f32.mxu0 %v9316_v18  ;;  %689 = vmatprep.mubr.f32.mxu1 %v9316_v18  ;;  %v7258_v18 = vld [vmem:[#allocation10] sm:$0xff] }
  0xa2   : > { %790 = vmatpush1.msra.mxu0 %v7231_v15  ;;  %861 = vmatpush1.msra.mxu1 %v7233_v16  ;;  %v7262_v16 = vld [vmem:[#allocation10 + $0x10] sm:$0xff]  ;;  %v9563_v15 = vmov 0.0  }
  0xa3   : > { %4961 = vmatmul.mubr.msk.f32.gmra.mxu0 %vm445_vm0, %v406_v17  ;;  %4969 = vmatmul.mubr.msk.f32.gmra.mxu1 %vm445_vm0, %v406_v17  ;;  %v760_v17 = vld [vmem:[#allocation2] sm:$0xff] }
  0xa4   : > { %791 = vmatprep.subr.mxu0 %v7240_v27  ;;  %862 = vmatprep.subr.mxu1 %v7242_v36 }
  0xa5   : > { %792 = vmatpush1.msra.mxu0 %v7246_v45  ;;  %863 = vmatpush1.msra.mxu1 %v7248_v54 }
  0xa6   : > { %793 = vmatprep.subr.mxu0 %v7252_v63  ;;  %864 = vmatprep.subr.mxu1 %v7254_v8 }
  0xa7   : > { %794 = vmatpush1.msra.mxu0 %v7258_v18  ;;  %827 = vmatprep.mubr.f32.mxu0 %v9563_v15 }
  0xa8   : > { %865 = vmatpush1.msra.mxu1 %v7262_v16  ;;  %898 = vmatprep.mubr.f32.mxu1 %v9563_v15 }
  0xa9   : > { %828 = vmatmul.mubr.f32.vlgmr.msra.gmra.mxu0 %v760_v17  ;;  %899 = vmatmul.mubr.f32.vlgmr.msra.gmra.mxu1 %v760_v17 }
  0xaa   : > { %1240 = vmatprep.subr.mxu0 %v7038_v19  ;;  %1311 = vmatprep.subr.mxu1 %v7040_v20 }
  0xab   : > { %1241 = vmatpush1.msra.mxu0 %v7043_v21  ;;  %1312 = vmatpush1.msra.mxu1 %v7045_v22  ;;  %v9564_v21 = vld [vmem:[#allocation19_spill] sm:$0xff]  ;;  %v9565_v22 = vld [vmem:[#allocation20_spill] sm:$0xff] }
  0xac   : > { %1242 = vmatprep.subr.mxu0 %v7049_v23  ;;  %1313 = vmatprep.subr.mxu1 %v7051_v24 }
  0xad   : > { %1243 = vmatpush1.msra.mxu0 %v7057_v25  ;;  %1314 = vmatpush1.msra.mxu1 %v7059_v26 }
  0xae   : > { %1244 = vmatprep.subr.mxu0 %v7066_v28  ;;  %1315 = vmatprep.subr.mxu1 %v7068_v29 }
  0xaf   : > { %1245 = vmatpush1.msra.mxu0 %v7072_v30  ;;  %1316 = vmatpush1.msra.mxu1 %v7074_v31 }
  0xb0   : > { %1246 = vmatprep.subr.mxu0 %v7078_v32  ;;  %1317 = vmatprep.subr.mxu1 %v7080_v33 }
  0xb1   : > { %1247 = vmatpush1.msra.mxu0 %v7086_v34  ;;  %1318 = vmatpush1.msra.mxu1 %v7088_v35 }
  0xb2   : > { %1248 = vmatprep.subr.mxu0 %v7095_v37  ;;  %1319 = vmatprep.subr.mxu1 %v7097_v38 }
  0xb3   : > { %1249 = vmatpush1.msra.mxu0 %v7101_v39  ;;  %1320 = vmatpush1.msra.mxu1 %v7103_v40 }
  0xb4   : > { %1250 = vmatprep.subr.mxu0 %v7107_v41  ;;  %1321 = vmatprep.subr.mxu1 %v7109_v42 }
  0xb5   : > { %1251 = vmatpush1.msra.mxu0 %v7115_v43  ;;  %1322 = vmatpush1.msra.mxu1 %v7117_v44  ;;  %v425_v44 = vlaneseq }
  0xb6   : > { %1252 = vmatprep.subr.mxu0 %v7124_v46  ;;  %1323 = vmatprep.subr.mxu1 %v7126_v47 }
  0xb7   : > { %1253 = vmatpush1.msra.mxu0 %v7130_v48  ;;  %1324 = vmatpush1.msra.mxu1 %v7132_v49  ;;  %v7374_v48 = vshrl.u32 %v425_v44, 7 }
  0xb8   : > { %1254 = vmatprep.subr.mxu0 %v7136_v50  ;;  %1325 = vmatprep.subr.mxu1 %v7138_v51 }
  0xb9   : > { %1255 = vmatpush1.msra.mxu0 %v7144_v52  ;;  %1326 = vmatpush1.msra.mxu1 %v7146_v53  ;;  %v427_v52 = vsub.s32 0, %v7374_v48  ;;  %v7384_v53 = vld [vmem:[%s9306_s3] sm:$0xf]  ;;  %v431_v44 = vsub.s32 1, %v7374_v48 }
  0xba   : > { %1256 = vmatprep.subr.mxu0 %v7153_v55  ;;  %1327 = vmatprep.subr.mxu1 %v7155_v56 }
  0xbb   : > { %1257 = vmatpush1.msra.mxu0 %v7159_v57  ;;  %1328 = vmatpush1.msra.mxu1 %v7161_v58  ;;  %v428_v57 = vrot.slane %v7384_v53, %v427_v52 }
  0xbc   : > { %1258 = vmatprep.subr.mxu0 %v7165_v59  ;;  %1329 = vmatprep.subr.mxu1 %v7167_v60 }
  0xbd   : > { %1259 = vmatpush1.msra.mxu0 %v7173_v61  ;;  %1330 = vmatpush1.msra.mxu1 %v7175_v62  ;;  %v435_v61 = vsub.s32 2, %v7374_v48 }
  0xbe   : > { %1260 = vmatprep.subr.mxu0 %v7182_v0  ;;  %1331 = vmatprep.subr.mxu1 %v7184_v1 }
  0xbf   : > { %1261 = vmatpush1.msra.mxu0 %v7188_v2  ;;  %1332 = vmatpush1.msra.mxu1 %v7190_v3 }
  0xc0   : > { %1262 = vmatprep.subr.mxu0 %v7194_v4  ;;  %1333 = vmatprep.subr.mxu1 %v7196_v5 }
  0xc1   : > { %1263 = vmatpush1.msra.mxu0 %v7202_v6  ;;  %1334 = vmatpush1.msra.mxu1 %v7204_v7 }
  0xc2   : > { %1264 = vmatprep.subr.mxu0 %v7211_v9  ;;  %1335 = vmatprep.subr.mxu1 %v7213_v10 }
  0xc3   : > { %1265 = vmatpush1.msra.mxu0 %v7217_v11  ;;  %1336 = vmatpush1.msra.mxu1 %v7219_v12 }
  0xc4   : > { %1266 = vmatprep.subr.mxu0 %v7223_v13  ;;  %1337 = vmatprep.subr.mxu1 %v7225_v14 }
  0xc5   : > { %1267 = vmatpush1.msra.mxu0 %v9564_v21  ;;  %1338 = vmatpush1.msra.mxu1 %v9565_v22 }
  0xc6   : > { %1268 = vmatprep.subr.mxu0 %v7240_v27  ;;  %1339 = vmatprep.subr.mxu1 %v7242_v36 }
  0xc7   : > { %1269 = vmatpush1.msra.mxu0 %v7246_v45  ;;  %1340 = vmatpush1.msra.mxu1 %v7248_v54  ;;  %v436_v45 = vrot.slane %v7384_v53, %v435_v61 }
  0xc8   : > { %1270 = vmatprep.subr.mxu0 %v7252_v63  ;;  %1341 = vmatprep.subr.mxu1 %v7254_v8 }
  0xc9   : > { %1271 = vmatpush1.msra.mxu0 %v7258_v18  ;;  %1304 = vmatprep.mubr.f32.mxu0 %v9563_v15 }
  0xca   : > { %1342 = vmatpush1.msra.mxu1 %v7262_v16  ;;  %1375 = vmatprep.mubr.f32.mxu1 %v9563_v15 }
  0xcb   : > { %1718 = vmatprep.subr.mxu0 %v7038_v19  ;;  %1789 = vmatprep.subr.mxu1 %v7040_v20 }
 0x139   : > { %v536_v23 = vpop.f32.mrf.mxu0  ;;  %v7338_v24 = vpop.f32.mrf.mxu1 }
 0x13a   : > { %v7391_v60 = vadd.f32 %v536_v23, %v428_v57 }
 0x13b   : > { %v7340_v25 = vpop.f32.mrf.mxu0  ;;  %v7342_v26 = vpop.f32.mrf.mxu1 }
 0x13f   : > { %v542_v28 = vpop.f32.mrf.mxu0  ;;  %v7344_v29 = vpop.f32.mrf.mxu1 }
 0x140   : > { %v7394_v62 = vadd.f32 %v542_v28, %v428_v57  ;;  %v7424_v52 = vadd.f32 %v7344_v29, %v436_v45 }
 0x141   : > { %v7346_v18 = vpop.f32.mrf.mxu0  ;;  %v7348_v30 = vpop.f32.mrf.mxu1 }
 0x142   : > { %9566 = vst [vmem:[#allocation19_spill] sm:$0xff] %v7394_v62  ;;  %9570 = vst [vmem:[#allocation23_spill] sm:$0xff] %v7424_v52 }
 0x145   : > { %v548_v31 = vpop.f32.mrf.mxu0  ;;  %v7350_v32 = vpop.f32.mrf.mxu1 }
 0x146   : > { %v7396_v0 = vadd.f32 %v548_v31, %v428_v57  ;;  %v7427_v61 = vadd.f32 %v7350_v32, %v436_v45 }
 0x147   : > { %v7352_v19 = vpop.f32.mrf.mxu0  ;;  %v7354_v20 = vpop.f32.mrf.mxu1 }
 0x148   : > { %9571 = vst [vmem:[#allocation24_spill] sm:$0xff] %v7427_v61 }
 0x14b   : > { %v554_v33 = vpop.f32.mrf.mxu0  ;;  %v7356_v34 = vpop.f32.mrf.mxu1 }
 0x14c   : > { %v7398_v1 = vadd.f32 %v554_v33, %v428_v57 }
 0x14d   : > { %v7358_v35 = vpop.f32.mrf.mxu0  ;;  %v7360_v37 = vpop.f32.mrf.mxu1 }
 0x14e   : > { %9567 = vst [vmem:[#allocation20_spill] sm:$0xff] %v7398_v1 }
 0x151   : > { %v560_v38 = vpop.f32.mrf.mxu0  ;;  %v7362_v39 = vpop.f32.mrf.mxu1 }
 0x152   : > { %v7400_v2 = vadd.f32 %v560_v38, %v428_v57 }
 0x153   : > { %v7364_v40 = vpop.f32.mrf.mxu0  ;;  %v7366_v41 = vpop.f32.mrf.mxu1 }
 0x157   : > { %v566_v42 = vpop.f32.mrf.mxu0  ;;  %v7368_v43 = vpop.f32.mrf.mxu1 }
 0x158   : > { %v7402_v9 = vadd.f32 %v566_v42, %v428_v57  ;;  %v7420_v42 = vadd.f32 %v7338_v24, %v436_v45 }
 0x159   : > { %v7370_v46 = vpop.f32.mrf.mxu0  ;;  %v7372_v47 = vpop.f32.mrf.mxu1 }
 0x15a   : > { %9568 = vst [vmem:[#allocation21_spill] sm:$0xff] %v7402_v9  ;;  %9569 = vst [vmem:[#allocation22_spill] sm:$0xff] %v7420_v42 }
 0x15d   : > { %v572_v49 = vpop.f32.mrf.mxu0  ;;  %v7376_v50 = vpop.f32.mrf.mxu1 }
 0x15e   : > { %v7411_v54 = vadd.f32 %v572_v49, %v428_v57 }
 0x15f   : > { %v7378_v51 = vpop.f32.mrf.mxu0  ;;  %v7386_v55 = vpop.f32.mrf.mxu1 }
 0x163   : > { %v578_v56 = vpop.f32.mrf.mxu0  ;;  %v691_v59 = vpop.f32.mrf.mxu1 }
 0x164   : > { %v7414_v17 = vadd.f32 %v578_v56, %v428_v57 }
 0x165   : > { %v7389_v58 = vpop.f32.mrf.mxu0  ;;  %v7404_v10 = vpop.f32.mrf.mxu1 }
 0x169   : > { %v829_v3 = vpop.f32.mrf.mxu0  ;;  %v900_v31 = vpop.f32.mrf.mxu1 }
 0x16a   : > { %v909_v4 = vrot.slane %v829_v3, 1  ;;  %v913_v5 = vrot.slane %v829_v3, 2  ;;  %v917_v6 = vrot.slane %v829_v3, 3  ;;  %v921_v7 = vrot.slane %v829_v3, 4 }
 0x16b   : > { %v925_v11 = vrot.slane %v829_v3, 5  ;;  %v929_v12 = vrot.slane %v829_v3, 6  ;;  %v969_v13 = vadd.f32 %v829_v3, %v7391_v60  ;;  %v933_v14 = vrot.slane %v829_v3, 7 }
 0x16c   : > { %v973_v16 = vadd.f32 %v909_v4, %v7394_v62  ;;  %v977_v27 = vadd.f32 %v913_v5, %v7396_v0  ;;  %v981_v36 = vadd.f32 %v917_v6, %v7398_v1  ;;  %v985_v63 = vadd.f32 %v921_v7, %v7400_v2 }
 0x16d   : > { %v4970_v8 = vmul.f32 -1.442695, %v969_v13  ;;  %v989_v21 = vadd.f32 %v925_v11, %v7402_v9  ;;  %v993_v23 = vadd.f32 %v929_v12, %v7411_v54  ;;  %v997_v33 = vadd.f32 %v933_v14, %v7414_v17 }
 0x16e   : > { %v4973_v22 = vmul.f32 -1.442695, %v973_v16  ;;  %v4976_v28 = vmul.f32 -1.442695, %v977_v27  ;;  %v4979_v38 = vmul.f32 -1.442695, %v981_v36  ;;  %v7430_v5 = vadd.f32 %v7356_v34, %v436_v45 }
 0x16f   : > { %5384 = vpow2.f32 %v4970_v8  ;;  %v4982_v49 = vmul.f32 -1.442695, %v985_v63  ;;  %v4985_v56 = vmul.f32 -1.442695, %v989_v21  ;;  %v911_v57 = vrot.slane %v900_v31, 1 }
 0x170   : > { %5386 = vpow2.f32 %v4973_v22  ;;  %v4988_v3 = vmul.f32 -1.442695, %v993_v23  ;;  %v915_v4 = vrot.slane %v900_v31, 2  ;;  %9572 = vst [vmem:[#allocation25_spill] sm:$0xff] %v7430_v5  ;;  %v4991_v24 = vmul.f32 -1.442695, %v997_v33 }
 0x171   : > { %5388 = vpow2.f32 %v4976_v28  ;;  %v919_v6 = vrot.slane %v900_v31, 3  ;;  %v7433_v7 = vadd.f32 %v7362_v39, %v436_v45  ;;  %v923_v29 = vrot.slane %v900_v31, 4 }
 0x172   : > { %5390 = vpow2.f32 %v4979_v38  ;;  %v971_v11 = vadd.f32 %v900_v31, %v7420_v42  ;;  %v7437_v12 = vadd.f32 %v7368_v43, %v436_v45  ;;  %v927_v32 = vrot.slane %v900_v31, 5 }
 0x173   : > { %9573 = vst [vmem:[#allocation26_spill] sm:$0xff] %v7433_v7  ;;  %5392 = vpow2.f32 %v4982_v49  ;;  %v975_v13 = vadd.f32 %v911_v57, %v7424_v52  ;;  %v7441_v34 = vadd.f32 %v7376_v50, %v436_v45  ;;  %v931_v14 = vrot.slane %v900_v31, 6  ;;  %v831_v57 = vpop.f32.mrf.mxu0 }
 0x174   : > { %9574 = vst [vmem:[#allocation27_spill] sm:$0xff] %v7437_v12  ;;  %5394 = vpow2.f32 %v4985_v56  ;;  %v979_v16 = vadd.f32 %v915_v4, %v7427_v61  ;;  %v7444_v39 = vadd.f32 %v691_v59, %v436_v45  ;;  %v935_v27 = vrot.slane %v900_v31, 7 }
 0x175   : > { %9575 = vst [vmem:[#allocation28_spill] sm:$0xff] %v7441_v34  ;;  %5396 = vpow2.f32 %v4988_v3  ;;  %v983_v36 = vadd.f32 %v919_v6, %v7430_v5  ;;  %v987_v43 = vadd.f32 %v923_v29, %v7433_v7  ;;  %v4972_v63 = vmul.f32 -1.442695, %v971_v11 }
 0x176   : > { %9576 = vst [vmem:[#allocation29_spill] sm:$0xff] %v7444_v39  ;;  %5398 = vpow2.f32 %v4991_v24  ;;  %v991_v8 = vadd.f32 %v927_v32, %v7437_v12  ;;  %v4975_v21 = vmul.f32 -1.442695, %v975_v13  ;;  %v995_v22 = vadd.f32 %v931_v14, %v7441_v34 }
 0x177   : > { %v4978_v50 = vmul.f32 -1.442695, %v979_v16  ;;  %v432_v23 = vrot.slane %v7384_v53, %v431_v44  ;;  %v439_v28 = vsub.s32 3, %v7374_v48  ;;  %v999_v59 = vadd.f32 %v935_v27, %v7444_v39 }
 0x178   : > { %v4981_v45 = vmul.f32 -1.442695, %v983_v36  ;;  %5400 = vpow2.f32 %v4972_v63  ;;  %v4984_v31 = vmul.f32 -1.442695, %v987_v43  ;;  %v4987_v38 = vmul.f32 -1.442695, %v991_v8 }
 0x179   : > { %5402 = vpow2.f32 %v4975_v21  ;;  %v4990_v56 = vmul.f32 -1.442695, %v995_v22  ;;  %v7454_v4 = vadd.f32 %v7340_v25, %v432_v23  ;;  %v7457_v44 = vrot.slane %v7384_v53, %v439_v28 }
 0x17a   : > { %5404 = vpow2.f32 %v4978_v50  ;;  %v4993_v48 = vmul.f32 -1.442695, %v999_v59  ;;  %v7460_v6 = vadd.f32 %v7346_v18, %v432_v23  ;;  %v7463_v29 = vadd.f32 %v7352_v19, %v432_v23 }
 0x17b   : > { %9577 = vst [vmem:[#allocation30_spill] sm:$0xff] %v7454_v4  ;;  %5406 = vpow2.f32 %v4981_v45  ;;  %v7466_v13 = vadd.f32 %v7358_v35, %v432_v23  ;;  %v910_v14 = vrot.slane %v831_v57, 1  ;;  %v7469_v16 = vadd.f32 %v7364_v40, %v432_v23 }
 0x17c   : > { %v5385_v33 = vpop.eup %5384  ;;  %9578 = vst [vmem:[#allocation31_spill] sm:$0xff] %v7460_v6  ;;  %9579 = vst [vmem:[#allocation32_spill] sm:$0xff] %v7463_v29  ;;  %5408 = vpow2.f32 %v4984_v31  ;;  %v914_v18 = vrot.slane %v831_v57, 2  ;;  %v7472_v19 = vadd.f32 %v7370_v46, %v432_v23  ;;  %v918_v63 = vrot.slane %v831_v57, 3 }
 0x17d   : > { %v5387_v49 = vpop.eup %5386  ;;  %v1073_v11 = vadd.f32 1.0, %v5385_v33  ;;  %9580 = vst [vmem:[#allocation33_spill] sm:$0xff] %v7466_v13  ;;  %5410 = vpow2.f32 %v4987_v38  ;;  %9581 = vst [vmem:[#allocation34_spill] sm:$0xff] %v7469_v16  ;;  %v922_v21 = vrot.slane %v831_v57, 4  ;;  %v970_v22 = vadd.f32 %v831_v57, %v7454_v4 }
 0x17e   : > { %v5389_v3 = vpop.eup %5388  ;;  %v1076_v25 = vadd.f32 1.0, %v5387_v49  ;;  %5412 = vpow2.f32 %v4990_v56  ;;  %9582 = vst [vmem:[#allocation35_spill] sm:$0xff] %v7472_v19  ;;  %v926_v40 = vrot.slane %v831_v57, 5  ;;  %v974_v28 = vadd.f32 %v910_v14, %v7460_v6  ;;  %v902_v14 = vpop.f32.mrf.mxu1 }
 0x17f   : > { %v5391_v24 = vpop.eup %5390  ;;  %v1079_v27 = vadd.f32 1.0, %v5389_v3  ;;  %5414 = vpow2.f32 %v4993_v48  ;;  %v930_v45 = vrot.slane %v831_v57, 6  ;;  %v978_v46 = vadd.f32 %v914_v18, %v7463_v29 }
 0x180   : > { %v5393_v32 = vpop.eup %5392  ;;  %v1082_v43 = vadd.f32 1.0, %v5391_v24  ;;  %5416 = vrcp.f32 %v1073_v11  ;;  %v934_v33 = vrot.slane %v831_v57, 7  ;;  %v982_v38 = vadd.f32 %v918_v63, %v7466_v13 }
 0x181   : > { %v5395_v53 = vpop.eup %5394  ;;  %v1085_v35 = vadd.f32 1.0, %v5393_v32  ;;  %5418 = vrcp.f32 %v1076_v25  ;;  %v7479_v49 = vadd.f32 %v7378_v51, %v432_v23  ;;  %v986_v56 = vadd.f32 %v922_v21, %v7469_v16 }
 0x182   : > { %v5397_v36 = vpop.eup %5396  ;;  %v1088_v50 = vadd.f32 1.0, %v5395_v53  ;;  %5420 = vrcp.f32 %v1079_v27  ;;  %v4971_v3 = vmul.f32 -1.442695, %v970_v22  ;;  %v7485_v24 = vadd.f32 %v7389_v58, %v432_v23 }
 0x183   : > { %v5399_v8 = vpop.eup %5398  ;;  %v1091_v59 = vadd.f32 1.0, %v5397_v36  ;;  %5422 = vrcp.f32 %v1082_v43  ;;  %9583 = vst [vmem:[#allocation36_spill] sm:$0xff] %v7479_v49  ;;  %v990_v11 = vadd.f32 %v926_v40, %v7472_v19  ;;  %v4974_v32 = vmul.f32 -1.442695, %v974_v28 }
 0x184   : > { %v1094_v31 = vadd.f32 1.0, %v5399_v8  ;;  %5424 = vrcp.f32 %v1085_v35  ;;  %9584 = vst [vmem:[#allocation37_spill] sm:$0xff] %v7485_v24  ;;  %v994_v57 = vadd.f32 %v930_v45, %v7479_v49  ;;  %v4977_v51 = vmul.f32 -1.442695, %v978_v46 }
 0x185   : > { %v7482_v48 = vpop.eup %5400  ;;  %5426 = vrcp.f32 %v1088_v50  ;;  %v998_v27 = vadd.f32 %v934_v33, %v7485_v24  ;;  %v4980_v18 = vmul.f32 -1.442695, %v982_v38  ;;  %v7498_v58 = vadd.f32 %v7342_v26, %v7457_v44 }
 0x186   : > { %v7488_v25 = vpop.eup %5402  ;;  %5428 = vrcp.f32 %v1091_v59  ;;  %v4983_v23 = vmul.f32 -1.442695, %v986_v56  ;;  %v7504_v63 = vadd.f32 %v7348_v30, %v7457_v44  ;;  %v4986_v8 = vmul.f32 -1.442695, %v990_v11 }
 0x187   : > { %v7491_v53 = vpop.eup %5404  ;;  %5430 = vrcp.f32 %v1094_v31  ;;  %9585 = vst [vmem:[#allocation38_spill] sm:$0xff] %v7498_v58  ;;  %v912_v35 = vrot.slane %v902_v14, 1  ;;  %v7510_v22 = vadd.f32 %v7354_v20, %v7457_v44  ;;  %v4989_v26 = vmul.f32 -1.442695, %v994_v57 }
 0x188   : > { %v7494_v36 = vpop.eup %5406  ;;  %5432 = vpow2.f32 %v4971_v3  ;;  %9586 = vst [vmem:[#allocation39_spill] sm:$0xff] %v7504_v63  ;;  %v916_v50 = vrot.slane %v902_v14, 2  ;;  %v7516_v28 = vadd.f32 %v7360_v37, %v7457_v44  ;;  %v4992_v30 = vmul.f32 -1.442695, %v998_v27 }
 0x189   : > { %v7500_v43 = vpop.eup %5408  ;;  %5434 = vpow2.f32 %v4974_v32  ;;  %9587 = vst [vmem:[#allocation40_spill] sm:$0xff] %v7510_v22  ;;  %v920_v59 = vrot.slane %v902_v14, 3  ;;  %v7522_v46 = vadd.f32 %v7366_v41, %v7457_v44  ;;  %v924_v20 = vrot.slane %v902_v14, 4 }
 0x18a   : > { %v7506_v21 = vpop.eup %5410  ;;  %5436 = vpow2.f32 %v4977_v51  ;;  %9588 = vst [vmem:[#allocation41_spill] sm:$0xff] %v7516_v28  ;;  %v972_v31 = vadd.f32 %v902_v14, %v7498_v58  ;;  %v7529_v38 = vadd.f32 %v7372_v47, %v7457_v44  ;;  %v928_v37 = vrot.slane %v902_v14, 5 }
 0x18b   : > { %v7512_v40 = vpop.eup %5412  ;;  %5438 = vpow2.f32 %v4980_v18  ;;  %9589 = vst [vmem:[#allocation42_spill] sm:$0xff] %v7522_v46  ;;  %v976_v56 = vadd.f32 %v912_v35, %v7504_v63  ;;  %v7536_v41 = vadd.f32 %v7386_v55, %v7457_v44  ;;  %v932_v11 = vrot.slane %v902_v14, 6 }
 0x18c   : > { %v7518_v45 = vpop.eup %5414  ;;  %5440 = vpow2.f32 %v4983_v23  ;;  %9590 = vst [vmem:[#allocation43_spill] sm:$0xff] %v7529_v38  ;;  %v980_v32 = vadd.f32 %v916_v50, %v7510_v22  ;;  %v7543_v47 = vadd.f32 %v7404_v10, %v7457_v44  ;;  %v936_v51 = vrot.slane %v902_v14, 7 }
 0x18d   : > { %v7525_v33 = vpop.eup %5416  ;;  %5442 = vpow2.f32 %v4986_v8  ;;  %9591 = vst [vmem:[#allocation44_spill] sm:$0xff] %v7536_v41  ;;  %v984_v27 = vadd.f32 %v920_v59, %v7516_v28  ;;  %v988_v23 = vadd.f32 %v924_v20, %v7522_v46  ;;  %v992_v8 = vadd.f32 %v928_v37, %v7529_v38 }
 0x18e   : > { %v7532_v3 = vpop.eup %5418  ;;  %5444 = vpow2.f32 %v4989_v26  ;;  %9592 = vst [vmem:[#allocation45_spill] sm:$0xff] %v7543_v47  ;;  %v996_v26 = vadd.f32 %v932_v11, %v7536_v41  ;;  %v1000_v44 = vadd.f32 %v936_v51, %v7543_v47  ;;  %v1096_v38 = vadd.f32 1.0, %v7518_v45 }
 0x18f   : > { %v7539_v57 = vpop.eup %5420  ;;  %5446 = vpow2.f32 %v4992_v30 }
 0x190   : > { %v7546_v18 = vpop.eup %5422  ;;  %5448 = vtanh.f32 %v972_v31 }
 0x191   : > { %v7549_v55 = vpop.eup %5424  ;;  %5450 = vtanh.f32 %v976_v56 }
 0x192   : > { %v7552_v35 = vpop.eup %5426  ;;  %5452 = vtanh.f32 %v980_v32 }
 0x193   : > { %v7555_v10 = vpop.eup %5428  ;;  %5454 = vtanh.f32 %v984_v27 }
 0x194   : > { %v7558_v14 = vpop.eup %5430  ;;  %5456 = vtanh.f32 %v988_v23 }
 0x195   : > { %v5433_v50 = vpop.eup %5432  ;;  %5458 = vtanh.f32 %v992_v8 }
 0x196   : > { %v5435_v30 = vpop.eup %5434  ;;  %v1074_v59 = vadd.f32 1.0, %v5433_v50  ;;  %5460 = vtanh.f32 %v996_v26 }
 0x197   : > { %v5437_v20 = vpop.eup %5436  ;;  %v1077_v31 = vadd.f32 1.0, %v5435_v30  ;;  %5462 = vtanh.f32 %v1000_v44  ;;  %v1075_v44 = vadd.f32 1.0, %v7482_v48 }
 0x198   : > { %v5439_v37 = vpop.eup %5438  ;;  %v1080_v56 = vadd.f32 1.0, %v5437_v20  ;;  %5464 = vrcp.f32 %v1074_v59  ;;  %v1078_v20 = vadd.f32 1.0, %v7488_v25  ;;  %v1093_v25 = vadd.f32 1.0, %v7512_v40 }
 0x199   : > { %v5441_v11 = vpop.eup %5440  ;;  %v1083_v32 = vadd.f32 1.0, %v5439_v37  ;;  %5466 = vrcp.f32 %v1077_v31  ;;  %v1081_v37 = vadd.f32 1.0, %v7491_v53 }
 0x19a   : > { %v5443_v41 = vpop.eup %5442  ;;  %v1086_v51 = vadd.f32 1.0, %v5441_v11  ;;  %5468 = vrcp.f32 %v1080_v56  ;;  %v761_v56 = vld [vmem:[#allocation3] sm:$0xff]  ;;  %v1084_v11 = vadd.f32 1.0, %v7494_v36 }
 0x19b   : > { %v5445_v27 = vpop.eup %5444  ;;  %v1089_v47 = vadd.f32 1.0, %v5443_v41  ;;  %5470 = vrcp.f32 %v1083_v32  ;;  %v1154_v48 = vrot.slane %v761_v56, 1  ;;  %v1157_v36 = vrot.slane %v761_v56, 4 }
 0x19c   : > { %v5447_v23 = vpop.eup %5446  ;;  %v1092_v8 = vadd.f32 1.0, %v5445_v27  ;;  %5472 = vrcp.f32 %v1086_v51  ;;  %v1087_v51 = vadd.f32 1.0, %v7500_v43  ;;  %v1090_v27 = vadd.f32 1.0, %v7506_v21 }
 0x19d   : > { %v5449_v50 = vpop.eup %5448  ;;  %v1095_v26 = vadd.f32 1.0, %v5447_v23  ;;  %5474 = vrcp.f32 %v1089_v47  ;;  %v1158_v46 = vrot.slane %v761_v56, 5  ;;  %v1159_v21 = vrot.slane %v761_v56, 6 }
 0x19e   : > { %v5451_v30 = vpop.eup %5450  ;;  %5476 = vrcp.f32 %v1092_v8  ;;  %v1155_v8 = vrot.slane %v761_v56, 2  ;;  %v1160_v22 = vrot.slane %v761_v56, 7 }
 0x19f   : > { %v5453_v59 = vpop.eup %5452  ;;  %5478 = vrcp.f32 %v1095_v26  ;;  %v1156_v26 = vrot.slane %v761_v56, 3 }
 0x1a0   : > { %v5455_v31 = vpop.eup %5454  ;;  %5480 = vrcp.f32 %v1075_v44  ;;  %v1177_v44 = vmul.f32 %v5449_v50, %v7525_v33  ;;  %v1179_v58 = vmul.f32 %v5453_v59, %v7539_v57 }
 0x1a1   : > { %v5457_v41 = vpop.eup %5456  ;;  %5482 = vrcp.f32 %v1078_v20 }
 0x1a2   : > { %v5459_v32 = vpop.eup %5458  ;;  %5484 = vrcp.f32 %v1081_v37  ;;  %v1178_v37 = vmul.f32 %v5451_v30, %v7532_v3  ;;  %v1181_v3 = vmul.f32 %v5457_v41, %v7549_v55 }
 0x1a3   : > { %v5461_v47 = vpop.eup %5460  ;;  %5486 = vrcp.f32 %v1084_v11  ;;  %v1182_v59 = vmul.f32 %v5459_v32, %v7552_v35 }
 0x1a4   : > { %v5463_v23 = vpop.eup %5462  ;;  %5488 = vrcp.f32 %v1087_v51 }
 0x1a5   : > { %v5465_v53 = vpop.eup %5464  ;;  %5490 = vrcp.f32 %v1090_v27 }
 0x1a6   : > { %v5467_v28 = vpop.eup %5466  ;;  %v1169_v43 = vmul.f32 %v5465_v53, %v761_v56  ;;  %5492 = vrcp.f32 %v1093_v25  ;;  %v1180_v53 = vmul.f32 %v5455_v31, %v7546_v18  ;;  %v1183_v18 = vmul.f32 %v5461_v47, %v7555_v10 }
 0x1a7   : > { %v5469_v20 = vpop.eup %5468  ;;  %v1170_v40 = vmul.f32 %v5467_v28, %v1154_v48  ;;  %5494 = vrcp.f32 %v1096_v38 }
 0x1a8   : > { %v5471_v63 = vpop.eup %5470  ;;  %v7571_v11 = vadd.f32 %v1177_v44, %v1169_v43  ;;  %v1171_v45 = vmul.f32 %v5469_v20, %v1155_v8 }
 0x1a9   : > { %v5473_v24 = vpop.eup %5472  ;;  %v1172_v51 = vmul.f32 %v5471_v63, %v1156_v26  ;;  %v7574_v33 = vadd.f32 %v1178_v37, %v1170_v40 }
 0x1aa   : > { %v5475_v50 = vpop.eup %5474  ;;  %v1173_v27 = vmul.f32 %v5473_v24, %v1157_v36  ;;  %v7577_v30 = vadd.f32 %v1179_v58, %v1171_v45  ;;  %5496 = vtanh.f32 %v7571_v11  ;;  %v1184_v58 = vmul.f32 %v5463_v23, %v7558_v14 }
 0x1ab   : > { %v5477_v28 = vpop.eup %5476  ;;  %v1174_v57 = vmul.f32 %v5475_v50, %v1158_v46  ;;  %v7581_v56 = vadd.f32 %v1180_v53, %v1172_v51  ;;  %5498 = vtanh.f32 %v7574_v33 }
 0x1ac   : > { %v5479_v63 = vpop.eup %5478  ;;  %v1175_v38 = vmul.f32 %v5477_v28, %v1159_v21  ;;  %v7585_v31 = vadd.f32 %v1181_v3, %v1173_v27  ;;  %5500 = vtanh.f32 %v7577_v30 }
 0x1ad   : > { %v1176_v24 = vmul.f32 %v5479_v63, %v1160_v22  ;;  %v7589_v55 = vadd.f32 %v1182_v59, %v1174_v57  ;;  %5502 = vtanh.f32 %v7581_v56  ;;  %v5481_v35 = vpop.eup %5480 }
 0x1ae   : > { %v7592_v46 = vadd.f32 %v1183_v18, %v1175_v38  ;;  %5504 = vtanh.f32 %v7585_v31  ;;  %v5483_v10 = vpop.eup %5482 }
 0x1af   : > { %v7595_v41 = vadd.f32 %v1184_v58, %v1176_v24  ;;  %5506 = vtanh.f32 %v7589_v55  ;;  %v5485_v32 = vpop.eup %5484 }
 0x1b0   : > { %5508 = vtanh.f32 %v7592_v46  ;;  %v5487_v22 = vpop.eup %5486 }
 0x1b1   : > { %5510 = vtanh.f32 %v7595_v41  ;;  %v5489_v14 = vpop.eup %5488 }
 0x1b2   : > { %v5491_v47 = vpop.eup %5490 }
 0x1b3   : > { %v5493_v48 = vpop.eup %5492 }
 0x1b4   : > { %v5495_v23 = vpop.eup %5494 }
 0x1b7   : > { %v5497_v25 = vpop.eup %5496 }
 0x1b8   : > { %v5499_v8 = vpop.eup %5498  ;;  %v1201_v20 = vmul.f32 %v5497_v25, %v5481_v35  ;;  %v7617_v25 = vld [vmem:[#allocation10 + $0x1c8] sm:$0xff] }
 0x1b9   : > { %v5501_v26 = vpop.eup %5500  ;;  %v1202_v36 = vmul.f32 %v5499_v8, %v5483_v10  ;;  %v7620_v8 = vld [vmem:[#allocation10 + $0x1d8] sm:$0xff] }
 0x1ba   : > { %v5503_v43 = vpop.eup %5502  ;;  %v1203_v44 = vmul.f32 %v5501_v26, %v5485_v32  ;;  %v7623_v26 = vld [vmem:[#allocation10 + $0x1c0] sm:$0xff] }
 0x1bb   : > { %v5505_v21 = vpop.eup %5504  ;;  %v1204_v37 = vmul.f32 %v5503_v43, %v5487_v22  ;;  %v1217_v40 = vrot.slane %v1202_v36, 7  ;;  %v7626_v36 = vld [vmem:[#allocation10 + $0x1d0] sm:$0xff]  ;;  %v7629_v43 = vld [vmem:[#allocation10 + $0x1a8] sm:$0xff] }
 0x1bc   : > { %v5507_v45 = vpop.eup %5506  ;;  %v1205_v51 = vmul.f32 %v5505_v21, %v5489_v14  ;;  %v1220_v53 = vrot.slane %v1203_v44, 6  ;;  %v7632_v44 = vld [vmem:[#allocation10 + $0x1b8] sm:$0xff]  ;;  %v7635_v21 = vld [vmem:[#allocation10 + $0x1a0] sm:$0xff] }
 0x1bd   : > { %v5509_v50 = vpop.eup %5508  ;;  %v1206_v27 = vmul.f32 %v5507_v45, %v5491_v47  ;;  %v1219_v3 = vsel %vm1218_vm1, %v1217_v40, %v1201_v20  ;;  %v1223_v28 = vrot.slane %v1204_v37, 5  ;;  %v7638_v20 = vld [vmem:[#allocation10 + $0x1b0] sm:$0xff]  ;;  %v7641_v37 = vld [vmem:[#allocation10 + $0x188] sm:$0xff]  ;;  %v7644_v40 = vld [vmem:[#allocation10 + $0x198] sm:$0xff] }
 0x1be   : > { %v5511_v57 = vpop.eup %5510  ;;  %v1207_v59 = vmul.f32 %v5509_v50, %v5493_v48  ;;  %v1222_v63 = vsel %vm1221_vm2, %v1220_v53, %v1219_v3  ;;  %v1226_v38 = vrot.slane %v1205_v51, 4  ;;  %v7611_v48 = vld [vmem:[#allocation10 + $0x1e0] sm:$0xff]  ;;  %v7650_v51 = vld [vmem:[#allocation10 + $0x190] sm:$0xff]  ;;  %v7653_v53 = vld [vmem:[#allocation10 + $0x168] sm:$0xff] }
 0x1bf   : > { %v1208_v18 = vmul.f32 %v5511_v57, %v5495_v23  ;;  %v1225_v24 = vsel %vm1224_vm3, %v1223_v28, %v1222_v63  ;;  %v1229_v58 = vrot.slane %v1206_v27, 3  ;;  %v7614_v23 = vld [vmem:[#allocation10 + $0x1f0] sm:$0xff]  ;;  %v7647_v45 = vld [vmem:[#allocation10 + $0x180] sm:$0xff]  ;;  %9594 = vst [vmem:[#allocation47_spill] sm:$0xff] %v7650_v51  ;;  %9595 = vst [vmem:[#allocation48_spill] sm:$0xff] %v7653_v53 }
 0x1c0   : > { %v1228_v35 = vsel %vm1227_vm4, %v1226_v38, %v1225_v24  ;;  %v1232_v10 = vrot.slane %v1207_v59, 2  ;;  %9593 = vst [vmem:[#allocation46_spill] sm:$0xff] %v7647_v45  ;;  %v7656_v50 = vld [vmem:[#allocation10 + $0x178] sm:$0xff]  ;;  %v7659_v27 = vld [vmem:[#allocation10 + $0x160] sm:$0xff]  ;;  %v7662_v3 = vld [vmem:[#allocation10 + $0x170] sm:$0xff] }
 0x1c1   : > { %v1231_v32 = vsel %vm1230_vm5, %v1229_v58, %v1228_v35  ;;  %v1235_v22 = vrot.slane %v1208_v18, 1  ;;  %9596 = vst [vmem:[#allocation49_spill] sm:$0xff] %v7656_v50  ;;  %9597 = vst [vmem:[#allocation50_spill] sm:$0xff] %v7659_v27  ;;  %v7665_v28 = vld [vmem:[#allocation10 + $0x148] sm:$0xff]  ;;  %v7668_v57 = vld [vmem:[#allocation10 + $0x158] sm:$0xff] }
 0x1c2   : > { %v1234_v14 = vsel %vm1233_vm6, %v1232_v10, %v1231_v32  ;;  %9598 = vst [vmem:[#allocation51_spill] sm:$0xff] %v7662_v3  ;;  %9599 = vst [vmem:[#allocation52_spill] sm:$0xff] %v7665_v28  ;;  %v7671_v59 = vld [vmem:[#allocation10 + $0x140] sm:$0xff]  ;;  %v7674_v63 = vld [vmem:[#allocation10 + $0x150] sm:$0xff] }
 0x1c3   : > { %v7607_v47 = vsel %vm1236_vm7, %v1235_v22, %v1234_v14  ;;  %9600 = vst [vmem:[#allocation53_spill] sm:$0xff] %v7668_v57  ;;  %9601 = vst [vmem:[#allocation54_spill] sm:$0xff] %v7671_v59  ;;  %v7677_v38 = vld [vmem:[#allocation10 + $0x128] sm:$0xff]  ;;  %v7680_v18 = vld [vmem:[#allocation10 + $0x138] sm:$0xff] }
 0x1c4   : > { %1305 = vmatmul.mubr.f32.vlgmr.msra.gmra.mxu0 %v7607_v47  ;;  %1376 = vmatmul.mubr.f32.vlgmr.msra.gmra.mxu1 %v7607_v47  ;;  %9602 = vst [vmem:[#allocation55_spill] sm:$0xff] %v7674_v63  ;;  %9603 = vst [vmem:[#allocation56_spill] sm:$0xff] %v7677_v38  ;;  %v7683_v24 = vld [vmem:[#allocation10 + $0x120] sm:$0xff]  ;;  %v7686_v58 = vld [vmem:[#allocation10 + $0x130] sm:$0xff] }
 0x1c5   : > { %1719 = vmatpush1.msra.mxu0 %v7611_v48  ;;  %1790 = vmatpush1.msra.mxu1 %v7614_v23  ;;  %9604 = vst [vmem:[#allocation57_spill] sm:$0xff] %v7680_v18  ;;  %9605 = vst [vmem:[#allocation58_spill] sm:$0xff] %v7683_v24  ;;  %v7689_v35 = vld [vmem:[#allocation10 + $0x108] sm:$0xff]  ;;  %v7692_v10 = vld [vmem:[#allocation10 + $0x118] sm:$0xff] }
 0x1c6   : > { %1720 = vmatprep.subr.mxu0 %v7617_v25  ;;  %1791 = vmatprep.subr.mxu1 %v7620_v8  ;;  %9606 = vst [vmem:[#allocation59_spill] sm:$0xff] %v7686_v58  ;;  %9607 = vst [vmem:[#allocation60_spill] sm:$0xff] %v7689_v35  ;;  %v7695_v32 = vld [vmem:[#allocation10 + $0x100] sm:$0xff]  ;;  %v7698_v22 = vld [vmem:[#allocation10 + $0x110] sm:$0xff] }
 0x1c7   : > { %1721 = vmatpush1.msra.mxu0 %v7623_v26  ;;  %1792 = vmatpush1.msra.mxu1 %v7626_v36  ;;  %9608 = vst [vmem:[#allocation61_spill] sm:$0xff] %v7692_v10  ;;  %9609 = vst [vmem:[#allocation62_spill] sm:$0xff] %v7695_v32  ;;  %v7701_v14 = vld [vmem:[#allocation10 + $0xe8] sm:$0xff] }
 0x1c8   : > { %1722 = vmatprep.subr.mxu0 %v7629_v43  ;;  %1793 = vmatprep.subr.mxu1 %v7632_v44  ;;  %9610 = vst [vmem:[#allocation63_spill] sm:$0xff] %v7698_v22  ;;  %9611 = vst [vmem:[#allocation64_spill] sm:$0xff] %v7701_v14 }
 0x1c9   : > { %1723 = vmatpush1.msra.mxu0 %v7635_v21  ;;  %1794 = vmatpush1.msra.mxu1 %v7638_v20 }
 0x1ca   : > { %1724 = vmatprep.subr.mxu0 %v7641_v37  ;;  %1795 = vmatprep.subr.mxu1 %v7644_v40 }
 0x1cb   : > { %1725 = vmatpush1.msra.mxu0 %v7647_v45  ;;  %1796 = vmatpush1.msra.mxu1 %v7650_v51 }
 0x1cc   : > { %1726 = vmatprep.subr.mxu0 %v7653_v53  ;;  %1797 = vmatprep.subr.mxu1 %v7656_v50 }
 0x1cd   : > { %1727 = vmatpush1.msra.mxu0 %v7659_v27  ;;  %1798 = vmatpush1.msra.mxu1 %v7662_v3 }
 0x1ce   : > { %1728 = vmatprep.subr.mxu0 %v7665_v28  ;;  %1799 = vmatprep.subr.mxu1 %v7668_v57 }
 0x1cf   : > { %1729 = vmatpush1.msra.mxu0 %v7671_v59  ;;  %1800 = vmatpush1.msra.mxu1 %v7674_v63 }
 0x1d0   : > { %1730 = vmatprep.subr.mxu0 %v7677_v38  ;;  %1801 = vmatprep.subr.mxu1 %v7680_v18 }
 0x1d1   : > { %1731 = vmatpush1.msra.mxu0 %v7683_v24  ;;  %1802 = vmatpush1.msra.mxu1 %v7686_v58  ;;  %v7704_v58 = vld [vmem:[#allocation10 + $0xf8] sm:$0xff] }
 0x1d2   : > { %1732 = vmatprep.subr.mxu0 %v7689_v35  ;;  %1803 = vmatprep.subr.mxu1 %v7692_v10  ;;  %9612 = vst [vmem:[#allocation65_spill] sm:$0xff] %v7704_v58  ;;  %v7707_v35 = vld [vmem:[#allocation10 + $0xe0] sm:$0xff]  ;;  %v7710_v10 = vld [vmem:[#allocation10 + $0xf0] sm:$0xff] }
 0x1d3   : > { %1733 = vmatpush1.msra.mxu0 %v7695_v32  ;;  %1804 = vmatpush1.msra.mxu1 %v7698_v22  ;;  %9613 = vst [vmem:[#allocation66_spill] sm:$0xff] %v7707_v35  ;;  %9614 = vst [vmem:[#allocation67_spill] sm:$0xff] %v7710_v10  ;;  %v7713_v32 = vld [vmem:[#allocation10 + $0xc8] sm:$0xff]  ;;  %v7716_v22 = vld [vmem:[#allocation10 + $0xd8] sm:$0xff] }
 0x1d4   : > { %1734 = vmatprep.subr.mxu0 %v7701_v14  ;;  %1805 = vmatprep.subr.mxu1 %v7704_v58  ;;  %9615 = vst [vmem:[#allocation68_spill] sm:$0xff] %v7713_v32  ;;  %9616 = vst [vmem:[#allocation69_spill] sm:$0xff] %v7716_v22  ;;  %v7719_v14 = vld [vmem:[#allocation10 + $0xc0] sm:$0xff]  ;;  %v7722_v58 = vld [vmem:[#allocation10 + $0xd0] sm:$0xff] }
 0x1d5   : > { %1735 = vmatpush1.msra.mxu0 %v7707_v35  ;;  %1806 = vmatpush1.msra.mxu1 %v7710_v10  ;;  %9617 = vst [vmem:[#allocation70_spill] sm:$0xff] %v7719_v14  ;;  %9618 = vst [vmem:[#allocation71_spill] sm:$0xff] %v7722_v58  ;;  %v7725_v35 = vld [vmem:[#allocation10 + $0xa8] sm:$0xff]  ;;  %v7728_v10 = vld [vmem:[#allocation10 + $0xb8] sm:$0xff] }
 0x1d6   : > { %1736 = vmatprep.subr.mxu0 %v7713_v32  ;;  %1807 = vmatprep.subr.mxu1 %v7716_v22  ;;  %9619 = vst [vmem:[#allocation72_spill] sm:$0xff] %v7725_v35  ;;  %9620 = vst [vmem:[#allocation73_spill] sm:$0xff] %v7728_v10  ;;  %v7731_v32 = vld [vmem:[#allocation10 + $0xa0] sm:$0xff]  ;;  %v7734_v22 = vld [vmem:[#allocation10 + $0xb0] sm:$0xff] }
 0x1d7   : > { %1737 = vmatpush1.msra.mxu0 %v7719_v14  ;;  %1808 = vmatpush1.msra.mxu1 %v7722_v58  ;;  %9621 = vst [vmem:[#allocation74_spill] sm:$0xff] %v7731_v32  ;;  %9622 = vst [vmem:[#allocation75_spill] sm:$0xff] %v7734_v22  ;;  %v7737_v14 = vld [vmem:[#allocation10 + $0x88] sm:$0xff]  ;;  %v7740_v58 = vld [vmem:[#allocation10 + $0x98] sm:$0xff] }
 0x1d8   : > { %1738 = vmatprep.subr.mxu0 %v7725_v35  ;;  %1809 = vmatprep.subr.mxu1 %v7728_v10  ;;  %9623 = vst [vmem:[#allocation76_spill] sm:$0xff] %v7737_v14  ;;  %9624 = vst [vmem:[#allocation77_spill] sm:$0xff] %v7740_v58  ;;  %v7743_v35 = vld [vmem:[#allocation10 + $0x80] sm:$0xff]  ;;  %v7746_v10 = vld [vmem:[#allocation10 + $0x90] sm:$0xff] }
 0x1d9   : > { %1739 = vmatpush1.msra.mxu0 %v7731_v32  ;;  %1810 = vmatpush1.msra.mxu1 %v7734_v22  ;;  %9625 = vst [vmem:[#allocation78_spill] sm:$0xff] %v7743_v35  ;;  %9626 = vst [vmem:[#allocation79_spill] sm:$0xff] %v7746_v10  ;;  %v7749_v32 = vld [vmem:[#allocation10 + $0x68] sm:$0xff]  ;;  %v7752_v22 = vld [vmem:[#allocation10 + $0x78] sm:$0xff] }
 0x1da   : > { %1740 = vmatprep.subr.mxu0 %v7737_v14  ;;  %1811 = vmatprep.subr.mxu1 %v7740_v58  ;;  %9627 = vst [vmem:[#allocation80_spill] sm:$0xff] %v7749_v32  ;;  %9628 = vst [vmem:[#allocation81_spill] sm:$0xff] %v7752_v22  ;;  %v7755_v14 = vld [vmem:[#allocation10 + $0x60] sm:$0xff]  ;;  %v7758_v58 = vld [vmem:[#allocation10 + $0x70] sm:$0xff] }
 0x1db   : > { %1741 = vmatpush1.msra.mxu0 %v7743_v35  ;;  %1812 = vmatpush1.msra.mxu1 %v7746_v10  ;;  %9629 = vst [vmem:[#allocation82_spill] sm:$0xff] %v7755_v14  ;;  %9630 = vst [vmem:[#allocation83_spill] sm:$0xff] %v7758_v58  ;;  %v7761_v35 = vld [vmem:[#allocation10 + $0x48] sm:$0xff]  ;;  %v7764_v10 = vld [vmem:[#allocation10 + $0x58] sm:$0xff] }
 0x1dc   : > { %1742 = vmatprep.subr.mxu0 %v7749_v32  ;;  %1813 = vmatprep.subr.mxu1 %v7752_v22  ;;  %9631 = vst [vmem:[#allocation84_spill] sm:$0xff] %v7761_v35  ;;  %9632 = vst [vmem:[#allocation85_spill] sm:$0xff] %v7764_v10  ;;  %v7767_v32 = vld [vmem:[#allocation10 + $0x40] sm:$0xff]  ;;  %v7770_v22 = vld [vmem:[#allocation10 + $0x50] sm:$0xff] }
 0x1dd   : > { %1743 = vmatpush1.msra.mxu0 %v7755_v14  ;;  %1814 = vmatpush1.msra.mxu1 %v7758_v58  ;;  %9633 = vst [vmem:[#allocation86_spill] sm:$0xff] %v7767_v32  ;;  %9634 = vst [vmem:[#allocation87_spill] sm:$0xff] %v7770_v22  ;;  %v7773_v14 = vld [vmem:[#allocation10 + $0x28] sm:$0xff]  ;;  %v7776_v58 = vld [vmem:[#allocation10 + $0x38] sm:$0xff] }
 0x1de   : > { %1744 = vmatprep.subr.mxu0 %v7761_v35  ;;  %1815 = vmatprep.subr.mxu1 %v7764_v10  ;;  %9635 = vst [vmem:[#allocation88_spill] sm:$0xff] %v7773_v14  ;;  %9636 = vst [vmem:[#allocation89_spill] sm:$0xff] %v7776_v58  ;;  %v7779_v35 = vld [vmem:[#allocation10 + $0x20] sm:$0xff]  ;;  %v7782_v10 = vld [vmem:[#allocation10 + $0x30] sm:$0xff] }
 0x1df   : > { %1745 = vmatpush1.msra.mxu0 %v7767_v32  ;;  %1816 = vmatpush1.msra.mxu1 %v7770_v22  ;;  %9637 = vst [vmem:[#allocation90_spill] sm:$0xff] %v7779_v35  ;;  %9638 = vst [vmem:[#allocation91_spill] sm:$0xff] %v7782_v10  ;;  %v7785_v32 = vld [vmem:[#allocation10 + $0x8] sm:$0xff]  ;;  %v7788_v22 = vld [vmem:[#allocation10 + $0x18] sm:$0xff] }
 0x1e0   : > { %1746 = vmatprep.subr.mxu0 %v7773_v14  ;;  %1817 = vmatprep.subr.mxu1 %v7776_v58  ;;  %9639 = vst [vmem:[#allocation92_spill] sm:$0xff] %v7785_v32  ;;  %9640 = vst [vmem:[#allocation93_spill] sm:$0xff] %v7788_v22  ;;  %v7791_v14 = vld [vmem:[#allocation10] sm:$0xff]  ;;  %v7795_v58 = vld [vmem:[#allocation10 + $0x10] sm:$0xff] }
 0x1e1   : > { %1747 = vmatpush1.msra.mxu0 %v7779_v35  ;;  %1818 = vmatpush1.msra.mxu1 %v7782_v10  ;;  %9641 = vst [vmem:[#allocation94_spill] sm:$0xff] %v7791_v14  ;;  %9642 = vst [vmem:[#allocation95_spill] sm:$0xff] %v7795_v58  ;;  %v7799_v10 = vld [vmem:[#allocation10 + $0x1e8] sm:$0xff] }
 0x1e2   : > { %1748 = vmatprep.subr.mxu0 %v7785_v32  ;;  %1819 = vmatprep.subr.mxu1 %v7788_v22  ;;  %9643 = vst [vmem:[#allocation96_spill] sm:$0xff] %v7799_v10  ;;  %v7802_v32 = vld [vmem:[#allocation10 + $0x1f8] sm:$0xff] }
 0x1e3   : > { %1749 = vmatpush1.msra.mxu0 %v7791_v14  ;;  %1782 = vmatprep.mubr.f32.mxu0 %v9563_v15  ;;  %9644 = vst [vmem:[#allocation97_spill] sm:$0xff] %v7802_v32 }
 0x1e4   : > { %1820 = vmatpush1.msra.mxu1 %v7795_v58  ;;  %1853 = vmatprep.mubr.f32.mxu1 %v9563_v15 }
 0x1e5   : > { %2196 = vmatprep.subr.mxu0 %v7799_v10  ;;  %2267 = vmatprep.subr.mxu1 %v7802_v32 }
 0x284   : > { %v1306_v22 = vpop.f32.mrf.mxu0  ;;  %v1377_v50 = vpop.f32.mrf.mxu1 }
 0x285   : > { %v1386_v35 = vrot.slane %v1306_v22, 7  ;;  %v1390_v24 = vrot.slane %v1306_v22, 1  ;;  %v1394_v14 = vrot.slane %v1306_v22, 2  ;;  %v1398_v18 = vrot.slane %v1306_v22, 3 }
 0x286   : > { %v1402_v38 = vrot.slane %v1306_v22, 4  ;;  %v1406_v63 = vrot.slane %v1306_v22, 5  ;;  %v1450_v59 = vadd.f32 %v1306_v22, %v7394_v62  ;;  %v1410_v58 = vrot.slane %v1306_v22, 6 }
 0x287   : > { %v1446_v15 = vadd.f32 %v1386_v35, %v7391_v60  ;;  %v1454_v57 = vadd.f32 %v1390_v24, %v7396_v0  ;;  %v1458_v10 = vadd.f32 %v1394_v14, %v7398_v1  ;;  %v1462_v28 = vadd.f32 %v1398_v18, %v7400_v2 }
 0x288   : > { %v4997_v3 = vmul.f32 -1.442695, %v1450_v59  ;;  %v1466_v32 = vadd.f32 %v1402_v38, %v7402_v9  ;;  %v1470_v53 = vadd.f32 %v1406_v63, %v7411_v54  ;;  %v1474_v45 = vadd.f32 %v1410_v58, %v7414_v17 }
 0x289   : > { %v4994_v27 = vmul.f32 -1.442695, %v1446_v15  ;;  %v5000_v51 = vmul.f32 -1.442695, %v1454_v57  ;;  %v5003_v62 = vmul.f32 -1.442695, %v1458_v10  ;;  %v1452_v63 = vadd.f32 %v1377_v50, %v7424_v52 }
 0x28a   : > { %5512 = vpow2.f32 %v4997_v3  ;;  %v5006_v22 = vmul.f32 -1.442695, %v1462_v28  ;;  %v1388_v35 = vrot.slane %v1377_v50, 7  ;;  %v5009_v24 = vmul.f32 -1.442695, %v1466_v32 }
 0x28b   : > { %5514 = vpow2.f32 %v4994_v27  ;;  %v5012_v14 = vmul.f32 -1.442695, %v1470_v53  ;;  %v1392_v1 = vrot.slane %v1377_v50, 1  ;;  %v5015_v59 = vmul.f32 -1.442695, %v1474_v45 }
 0x28c   : > { %5516 = vpow2.f32 %v5000_v51  ;;  %v1396_v18 = vrot.slane %v1377_v50, 2  ;;  %v1400_v15 = vrot.slane %v1377_v50, 3  ;;  %v1448_v38 = vadd.f32 %v1388_v35, %v7420_v42 }
 0x28d   : > { %5518 = vpow2.f32 %v5003_v62  ;;  %v1404_v57 = vrot.slane %v1377_v50, 4  ;;  %v1408_v3 = vrot.slane %v1377_v50, 5  ;;  %v1456_v28 = vadd.f32 %v1392_v1, %v7427_v61 }
 0x28e   : > { %5520 = vpow2.f32 %v5006_v22  ;;  %v1412_v27 = vrot.slane %v1377_v50, 6  ;;  %v1460_v51 = vadd.f32 %v1396_v18, %v7430_v5  ;;  %v1464_v62 = vadd.f32 %v1400_v15, %v7433_v7  ;;  %v1308_v50 = vpop.f32.mrf.mxu0  ;;  %v9652_v7 = vld [vmem:[#allocation44_spill] sm:$0xff] }
 0x28f   : > { %5522 = vpow2.f32 %v5009_v24  ;;  %v4996_v45 = vmul.f32 -1.442695, %v1448_v38  ;;  %v1468_v53 = vadd.f32 %v1404_v57, %v7437_v12  ;;  %v4999_v58 = vmul.f32 -1.442695, %v1452_v63 }
 0x290   : > { %5524 = vpow2.f32 %v5012_v14  ;;  %v1472_v10 = vadd.f32 %v1408_v3, %v7441_v34  ;;  %v5002_v32 = vmul.f32 -1.442695, %v1456_v28  ;;  %v1476_v22 = vadd.f32 %v1412_v27, %v7444_v39 }
 0x291   : > { %5526 = vpow2.f32 %v5015_v59  ;;  %v5005_v35 = vmul.f32 -1.442695, %v1460_v51  ;;  %v5008_v24 = vmul.f32 -1.442695, %v1464_v62  ;;  %v5011_v1 = vmul.f32 -1.442695, %v1468_v53 }
 0x292   : > { %5528 = vpow2.f32 %v4996_v45  ;;  %v5014_v18 = vmul.f32 -1.442695, %v1472_v10  ;;  %v5017_v38 = vmul.f32 -1.442695, %v1476_v22  ;;  %v1387_v3 = vrot.slane %v1308_v50, 7 }
 0x293   : > { %5530 = vpow2.f32 %v4999_v58  ;;  %v1391_v62 = vrot.slane %v1308_v50, 1  ;;  %v1395_v58 = vrot.slane %v1308_v50, 2 }
 0x294   : > { %5532 = vpow2.f32 %v5002_v32  ;;  %v1447_v22 = vadd.f32 %v1387_v3, %v7454_v4 }
 0x295   : > { %5534 = vpow2.f32 %v5005_v35  ;;  %v1399_v35 = vrot.slane %v1308_v50, 3 }
 0x296   : > { %5536 = vpow2.f32 %v5008_v24  ;;  %v1403_v24 = vrot.slane %v1308_v50, 4 }
 0x297   : > { %v5513_v14 = vpop.eup %5512  ;;  %5538 = vpow2.f32 %v5011_v1 }
 0x298   : > { %v5515_v59 = vpop.eup %5514  ;;  %v1553_v63 = vadd.f32 1.0, %v5513_v14  ;;  %5540 = vpow2.f32 %v5014_v18  ;;  %v1455_v18 = vadd.f32 %v1391_v62, %v7463_v29 }
 0x299   : > { %v5517_v15 = vpop.eup %5516  ;;  %v1550_v34 = vadd.f32 1.0, %v5515_v59  ;;  %5542 = vpow2.f32 %v5017_v38  ;;  %v1451_v59 = vadd.f32 %v1308_v50, %v7460_v6  ;;  %v1411_v38 = vrot.slane %v1308_v50, 6 }
 0x29a   : > { %v5519_v57 = vpop.eup %5518  ;;  %v1556_v51 = vadd.f32 1.0, %v5517_v15  ;;  %5544 = vrcp.f32 %v1553_v63  ;;  %v1407_v15 = vrot.slane %v1308_v50, 5  ;;  %v1463_v63 = vadd.f32 %v1399_v35, %v7469_v16 }
 0x29b   : > { %v5521_v28 = vpop.eup %5520  ;;  %v1559_v53 = vadd.f32 1.0, %v5519_v57  ;;  %5546 = vrcp.f32 %v1550_v34  ;;  %v1459_v57 = vadd.f32 %v1395_v58, %v7466_v13  ;;  %v1467_v34 = vadd.f32 %v1403_v24, %v7472_v19  ;;  %v9645_v58 = vld [vmem:[#allocation37_spill] sm:$0xff]  ;;  %v9648_v13 = vld [vmem:[#allocation40_spill] sm:$0xff] }
 0x29c   : > { %v5523_v27 = vpop.eup %5522  ;;  %v1562_v10 = vadd.f32 1.0, %v5521_v28  ;;  %5548 = vrcp.f32 %v1556_v51  ;;  %v4995_v28 = vmul.f32 -1.442695, %v1447_v22  ;;  %v1471_v62 = vadd.f32 %v1407_v15, %v7479_v49 }
 0x29d   : > { %v5525_v45 = vpop.eup %5524  ;;  %v1565_v14 = vadd.f32 1.0, %v5523_v27  ;;  %5550 = vrcp.f32 %v1559_v53  ;;  %v4998_v27 = vmul.f32 -1.442695, %v1451_v59  ;;  %v5001_v53 = vmul.f32 -1.442695, %v1455_v18 }
 0x29e   : > { %v5527_v32 = vpop.eup %5526  ;;  %v1568_v1 = vadd.f32 1.0, %v5525_v45  ;;  %5552 = vrcp.f32 %v1562_v10  ;;  %v1379_v45 = vpop.f32.mrf.mxu1  ;;  %v5004_v10 = vmul.f32 -1.442695, %v1459_v57  ;;  %v5007_v22 = vmul.f32 -1.442695, %v1463_v63  ;;  %v9646_v63 = vld [vmem:[#allocation38_spill] sm:$0xff] }
 0x29f   : > { %v1571_v39 = vadd.f32 1.0, %v5527_v32  ;;  %v7826_v3 = vpop.eup %5528  ;;  %5554 = vrcp.f32 %v1565_v14  ;;  %v1475_v32 = vadd.f32 %v1411_v38, %v9645_v58  ;;  %v1389_v14 = vrot.slane %v1379_v45, 7 }
 0x2a0   : > { %v7829_v51 = vpop.eup %5530  ;;  %5556 = vrcp.f32 %v1568_v1  ;;  %v5010_v59 = vmul.f32 -1.442695, %v1467_v34  ;;  %v5013_v1 = vmul.f32 -1.442695, %v1471_v62  ;;  %v1393_v15 = vrot.slane %v1379_v45, 1 }
 0x2a1   : > { %v7832_v50 = vpop.eup %5532  ;;  %5558 = vrcp.f32 %v1571_v39  ;;  %v5016_v39 = vmul.f32 -1.442695, %v1475_v32  ;;  %v1397_v38 = vrot.slane %v1379_v45, 2  ;;  %v1449_v58 = vadd.f32 %v1389_v14, %v9646_v63  ;;  %v9650_v14 = vld [vmem:[#allocation42_spill] sm:$0xff] }
 0x2a2   : > { %v7835_v35 = vpop.eup %5534  ;;  %5560 = vpow2.f32 %v4995_v28  ;;  %v1401_v28 = vrot.slane %v1379_v45, 3  ;;  %v1405_v34 = vrot.slane %v1379_v45, 4  ;;  %v1409_v62 = vrot.slane %v1379_v45, 5 }
 0x2a3   : > { %v7837_v24 = vpop.eup %5536  ;;  %5562 = vpow2.f32 %v4998_v27  ;;  %v9647_v27 = vld [vmem:[#allocation39_spill] sm:$0xff]  ;;  %v1413_v29 = vrot.slane %v1379_v45, 6 }
 0x2a4   : > { %v7839_v19 = vpop.eup %5538  ;;  %5564 = vpow2.f32 %v5001_v53  ;;  %v1453_v16 = vadd.f32 %v1379_v45, %v9647_v27  ;;  %v1465_v63 = vadd.f32 %v1401_v28, %v9650_v14  ;;  %v9651_v27 = vld [vmem:[#allocation43_spill] sm:$0xff]  ;;  %v9653_v45 = vld [vmem:[#allocation45_spill] sm:$0xff] }
 0x2a5   : > { %v7841_v18 = vpop.eup %5540  ;;  %5566 = vpow2.f32 %v5004_v10  ;;  %v1457_v10 = vadd.f32 %v1393_v15, %v9648_v13  ;;  %v1469_v12 = vadd.f32 %v1405_v34, %v9651_v27  ;;  %v1473_v15 = vadd.f32 %v1409_v62, %v9652_v7 }
 0x2a6   : > { %v7843_v57 = vpop.eup %5542  ;;  %5568 = vpow2.f32 %v5007_v22  ;;  %v9649_v22 = vld [vmem:[#allocation41_spill] sm:$0xff] }
 0x2a7   : > { %v7846_v49 = vpop.eup %5544  ;;  %5570 = vpow2.f32 %v5010_v59  ;;  %v1461_v6 = vadd.f32 %v1397_v38, %v9649_v22 }
 0x2a8   : > { %v7849_v53 = vpop.eup %5546  ;;  %5572 = vpow2.f32 %v5013_v1 }
 0x2a9   : > { %v7852_v32 = vpop.eup %5548  ;;  %5574 = vpow2.f32 %v5016_v39  ;;  %v1477_v39 = vadd.f32 %v1413_v29, %v9653_v45 }
 0x2aa   : > { %v7855_v4 = vpop.eup %5550  ;;  %5576 = vtanh.f32 %v1449_v58 }
 0x2ab   : > { %v7858_v59 = vpop.eup %5552  ;;  %5578 = vtanh.f32 %v1453_v16 }
 0x2ac   : > { %v7861_v1 = vpop.eup %5554  ;;  %5580 = vtanh.f32 %v1457_v10 }
 0x2ad   : > { %v7864_v13 = vpop.eup %5556  ;;  %5582 = vtanh.f32 %v1461_v6 }
 0x2ae   : > { %v7867_v38 = vpop.eup %5558  ;;  %5584 = vtanh.f32 %v1465_v63 }
 0x2af   : > { %v5561_v28 = vpop.eup %5560  ;;  %5586 = vtanh.f32 %v1469_v12 }
 0x2b0   : > { %v5563_v58 = vpop.eup %5562  ;;  %v1551_v14 = vadd.f32 1.0, %v5561_v28  ;;  %5588 = vtanh.f32 %v1473_v15 }
 0x2b1   : > { %v5565_v34 = vpop.eup %5564  ;;  %v1554_v16 = vadd.f32 1.0, %v5563_v58  ;;  %5590 = vtanh.f32 %v1477_v39  ;;  %v1552_v39 = vadd.f32 1.0, %v7826_v3  ;;  %v1639_v3 = vrot.slane %v7574_v33, 7 }
 0x2b2   : > { %v5567_v27 = vpop.eup %5566  ;;  %v1557_v22 = vadd.f32 1.0, %v5565_v34  ;;  %5592 = vrcp.f32 %v1551_v14 }
 0x2b3   : > { %v5569_v62 = vpop.eup %5568  ;;  %v1560_v10 = vadd.f32 1.0, %v5567_v27  ;;  %5594 = vrcp.f32 %v1554_v16  ;;  %v1555_v27 = vadd.f32 1.0, %v7829_v51 }
 0x2b4   : > { %v5571_v7 = vpop.eup %5570  ;;  %v1563_v29 = vadd.f32 1.0, %v5569_v62  ;;  %5596 = vrcp.f32 %v1557_v22  ;;  %v1558_v22 = vadd.f32 1.0, %v7832_v50  ;;  %v1641_v50 = vrot.slane %v7581_v56, 7 }
 0x2b5   : > { %v5573_v6 = vpop.eup %5572  ;;  %v1566_v45 = vadd.f32 1.0, %v5571_v7  ;;  %5598 = vrcp.f32 %v1560_v10  ;;  %v1561_v7 = vadd.f32 1.0, %v7835_v35  ;;  %v1564_v10 = vadd.f32 1.0, %v7837_v24 }
 0x2b6   : > { %v5575_v63 = vpop.eup %5574  ;;  %v1569_v12 = vadd.f32 1.0, %v5573_v6  ;;  %5600 = vrcp.f32 %v1563_v29  ;;  %v1567_v6 = vadd.f32 1.0, %v7839_v19  ;;  %v1570_v35 = vadd.f32 1.0, %v7841_v18 }
 0x2b7   : > { %v5577_v28 = vpop.eup %5576  ;;  %v1572_v15 = vadd.f32 1.0, %v5575_v63  ;;  %5602 = vrcp.f32 %v1566_v45  ;;  %v1638_v45 = vrot.slane %v7571_v11, 7  ;;  %v1640_v63 = vrot.slane %v7577_v30, 7 }
 0x2b8   : > { %v5579_v58 = vpop.eup %5578  ;;  %5604 = vrcp.f32 %v1569_v12  ;;  %v1642_v24 = vrot.slane %v7585_v31, 7  ;;  %v1573_v11 = vadd.f32 1.0, %v7843_v57  ;;  %v1644_v19 = vrot.slane %v7592_v46, 7 }
 0x2b9   : > { %v5581_v14 = vpop.eup %5580  ;;  %5606 = vrcp.f32 %v1572_v15  ;;  %v1643_v15 = vrot.slane %v7589_v55, 7  ;;  %v1645_v56 = vrot.slane %v7595_v41, 7 }
 0x2ba   : > { %v5583_v34 = vpop.eup %5582  ;;  %5608 = vrcp.f32 %v1552_v39  ;;  %v1662_v39 = vmul.f32 %v5577_v28, %v7849_v53  ;;  %v1664_v55 = vmul.f32 %v5581_v14, %v7852_v32 }
 0x2bb   : > { %v5585_v16 = vpop.eup %5584  ;;  %5610 = vrcp.f32 %v1555_v27  ;;  %v1665_v28 = vmul.f32 %v5583_v34, %v7855_v4 }
 0x2bc   : > { %v5587_v62 = vpop.eup %5586  ;;  %5612 = vrcp.f32 %v1558_v22  ;;  %v1663_v22 = vmul.f32 %v5579_v58, %v7846_v49 }
 0x2bd   : > { %v5589_v29 = vpop.eup %5588  ;;  %5614 = vrcp.f32 %v1561_v7  ;;  %v1667_v58 = vmul.f32 %v5587_v62, %v7861_v1 }
 0x2be   : > { %v5591_v51 = vpop.eup %5590  ;;  %5616 = vrcp.f32 %v1564_v10  ;;  %v1668_v4 = vmul.f32 %v5589_v29, %v7864_v13 }
 0x2bf   : > { %v5593_v12 = vpop.eup %5592  ;;  %5618 = vrcp.f32 %v1567_v6 }
 0x2c0   : > { %v5595_v33 = vpop.eup %5594  ;;  %v1654_v30 = vmul.f32 %v5593_v12, %v1638_v45  ;;  %5620 = vrcp.f32 %v1570_v35  ;;  %v1666_v45 = vmul.f32 %v5585_v16, %v7858_v59  ;;  %v1669_v59 = vmul.f32 %v5591_v51, %v7867_v38 }
 0x2c1   : > { %v5597_v27 = vpop.eup %5596  ;;  %v1655_v18 = vmul.f32 %v5595_v33, %v1639_v3  ;;  %5622 = vrcp.f32 %v1573_v11 }
 0x2c2   : > { %v5599_v31 = vpop.eup %5598  ;;  %v1656_v7 = vmul.f32 %v5597_v27, %v1640_v63  ;;  %v7888_v57 = vadd.f32 %v1662_v39, %v1654_v30 }
 0x2c3   : > { %v5601_v5 = vpop.eup %5600  ;;  %v7890_v46 = vadd.f32 %v1663_v22, %v1655_v18  ;;  %v1657_v53 = vmul.f32 %v5599_v31, %v1641_v50 }
 0x2c4   : > { %v5603_v10 = vpop.eup %5602  ;;  %v1658_v41 = vmul.f32 %v5601_v5, %v1642_v24  ;;  %v7894_v3 = vadd.f32 %v1664_v55, %v1656_v7  ;;  %5624 = vtanh.f32 %v7888_v57 }
 0x2c5   : > { %v5605_v49 = vpop.eup %5604  ;;  %v1659_v32 = vmul.f32 %v5603_v10, %v1643_v15  ;;  %v7898_v14 = vadd.f32 %v1665_v28, %v1657_v53  ;;  %5626 = vtanh.f32 %v7890_v46 }
 0x2c6   : > { %v5607_v6 = vpop.eup %5606  ;;  %v1660_v63 = vmul.f32 %v5605_v49, %v1644_v19  ;;  %v7902_v34 = vadd.f32 %v1666_v45, %v1658_v41  ;;  %5628 = vtanh.f32 %v7894_v3 }
 0x2c7   : > { %v1661_v5 = vmul.f32 %v5607_v6, %v1645_v56  ;;  %v7906_v16 = vadd.f32 %v1667_v58, %v1659_v32  ;;  %5630 = vtanh.f32 %v7898_v14  ;;  %v5609_v62 = vpop.eup %5608  ;;  %v762_v6 = vld [vmem:[#allocation4] sm:$0xff] }
 0x2c8   : > { %v7909_v1 = vadd.f32 %v1668_v4, %v1660_v63  ;;  %5632 = vtanh.f32 %v7902_v34  ;;  %v5611_v13 = vpop.eup %5610 }
 0x2c9   : > { %v7912_v50 = vadd.f32 %v1669_v59, %v1661_v5  ;;  %5634 = vtanh.f32 %v7906_v16  ;;  %v5613_v29 = vpop.eup %5612 }
 0x2ca   : > { %5636 = vtanh.f32 %v7909_v1  ;;  %v5615_v38 = vpop.eup %5614 }
 0x2cb   : > { %5638 = vtanh.f32 %v7912_v50  ;;  %v5617_v51 = vpop.eup %5616 }
 0x2cc   : > { %v5619_v35 = vpop.eup %5618 }
 0x2cd   : > { %v5621_v12 = vpop.eup %5620 }
 0x2ce   : > { %v5623_v24 = vpop.eup %5622 }
 0x2d1   : > { %v5625_v15 = vpop.eup %5624 }
 0x2d2   : > { %v5627_v11 = vpop.eup %5626  ;;  %v1686_v33 = vmul.f32 %v5625_v15, %v5609_v62  ;;  %v9668_v15 = vld [vmem:[#allocation60_spill] sm:$0xff] }
 0x2d3   : > { %v5629_v19 = vpop.eup %5628  ;;  %v1687_v30 = vmul.f32 %v5627_v11, %v5611_v13  ;;  %v9669_v11 = vld [vmem:[#allocation61_spill] sm:$0xff] }
 0x2d4   : > { %v5631_v39 = vpop.eup %5630  ;;  %v1688_v27 = vmul.f32 %v5629_v19, %v5613_v29  ;;  %v1702_v56 = vrot.slane %v1686_v33, 1  ;;  %v9670_v33 = vld [vmem:[#allocation62_spill] sm:$0xff]  ;;  %v9671_v19 = vld [vmem:[#allocation63_spill] sm:$0xff] }
 0x2d5   : > { %v5633_v18 = vpop.eup %5632  ;;  %v1689_v22 = vmul.f32 %v5631_v39, %v5615_v38  ;;  %v1239_v38 = vadd.f32 %v7607_v47, %v762_v6  ;;  %v9654_v47 = vld [vmem:[#allocation46_spill] sm:$0xff]  ;;  %v9672_v39 = vld [vmem:[#allocation64_spill] sm:$0xff]  ;;  %v9689_v6 = vld [vmem:[#allocation81_spill] sm:$0xff] }
 0x2d6   : > { %v5635_v31 = vpop.eup %5634  ;;  %v1690_v55 = vmul.f32 %v5633_v18, %v5617_v51  ;;  %v1703_v7 = vsel %vm1218_vm1, %v1687_v30, %v1702_v56  ;;  %v1704_v53 = vrot.slane %v1688_v27, 7  ;;  %v9673_v30 = vld [vmem:[#allocation65_spill] sm:$0xff]  ;;  %v9674_v27 = vld [vmem:[#allocation66_spill] sm:$0xff]  ;;  %v9675_v56 = vld [vmem:[#allocation67_spill] sm:$0xff] }
 0x2d7   : > { %v5637_v28 = vpop.eup %5636  ;;  %v1691_v10 = vmul.f32 %v5635_v31, %v5619_v35  ;;  %v1706_v41 = vrot.slane %v1689_v22, 6  ;;  %v9676_v18 = vld [vmem:[#allocation68_spill] sm:$0xff]  ;;  %v9677_v22 = vld [vmem:[#allocation69_spill] sm:$0xff]  ;;  %v9678_v31 = vld [vmem:[#allocation70_spill] sm:$0xff] }
 0x2d8   : > { %v5639_v45 = vpop.eup %5638  ;;  %v1692_v49 = vmul.f32 %v5637_v28, %v5621_v12  ;;  %v1705_v32 = vsel %vm1221_vm2, %v1704_v53, %v1703_v7  ;;  %v1708_v58 = vrot.slane %v1690_v55, 5  ;;  %v9679_v55 = vld [vmem:[#allocation71_spill] sm:$0xff]  ;;  %v9680_v7 = vld [vmem:[#allocation72_spill] sm:$0xff]  ;;  %v9681_v53 = vld [vmem:[#allocation73_spill] sm:$0xff] }
 0x2d9   : > { %v1693_v63 = vmul.f32 %v5639_v45, %v5623_v24  ;;  %v1707_v4 = vsel %vm1224_vm3, %v1706_v41, %v1705_v32  ;;  %v1710_v5 = vrot.slane %v1691_v10, 4  ;;  %v9667_v24 = vld [vmem:[#allocation59_spill] sm:$0xff]  ;;  %v9682_v28 = vld [vmem:[#allocation74_spill] sm:$0xff]  ;;  %v9684_v41 = vld [vmem:[#allocation76_spill] sm:$0xff] }
 0x2da   : > { %v1709_v59 = vsel %vm1227_vm4, %v1708_v58, %v1707_v4  ;;  %v1712_v62 = vrot.slane %v1692_v49, 3  ;;  %v9683_v10 = vld [vmem:[#allocation75_spill] sm:$0xff]  ;;  %v9685_v45 = vld [vmem:[#allocation77_spill] sm:$0xff]  ;;  %v9686_v49 = vld [vmem:[#allocation78_spill] sm:$0xff] }
 0x2db   : > { %v1711_v13 = vsel %vm1230_vm5, %v1710_v5, %v1709_v59  ;;  %v1714_v29 = vrot.slane %v1693_v63, 2  ;;  %v9687_v32 = vld [vmem:[#allocation79_spill] sm:$0xff]  ;;  %v9688_v58 = vld [vmem:[#allocation80_spill] sm:$0xff]  ;;  %v9690_v63 = vld [vmem:[#allocation82_spill] sm:$0xff] }
 0x2dc   : > { %v1713_v51 = vsel %vm1233_vm6, %v1712_v62, %v1711_v13  ;;  %v9691_v4 = vld [vmem:[#allocation83_spill] sm:$0xff]  ;;  %v9692_v5 = vld [vmem:[#allocation84_spill] sm:$0xff]  ;;  %v9693_v59 = vld [vmem:[#allocation85_spill] sm:$0xff] }
 0x2dd   : > { %v1715_v35 = vsel %vm1236_vm7, %v1714_v29, %v1713_v51  ;;  %v9694_v62 = vld [vmem:[#allocation86_spill] sm:$0xff]  ;;  %v9695_v13 = vld [vmem:[#allocation87_spill] sm:$0xff]  ;;  %v9696_v29 = vld [vmem:[#allocation88_spill] sm:$0xff] }
 0x2de   : > { %v7925_v12 = vadd.f32 %v1715_v35, %v1239_v38  ;;  %1783 = vmatmul.mubr.f32.vlgmr.msra.gmra.mxu0 %v1715_v35  ;;  %1854 = vmatmul.mubr.f32.vlgmr.msra.gmra.mxu1 %v1715_v35  ;;  %v9697_v38 = vld [vmem:[#allocation89_spill] sm:$0xff]  ;;  %v9698_v51 = vld [vmem:[#allocation90_spill] sm:$0xff]  ;;  %v9699_v35 = vld [vmem:[#allocation91_spill] sm:$0xff] }
 0x2df   : > { %2197 = vmatpush1.msra.mxu0 %v7611_v48  ;;  %2268 = vmatpush1.msra.mxu1 %v7614_v23  ;;  %v9655_v48 = vld [vmem:[#allocation47_spill] sm:$0xff]  ;;  %v9656_v23 = vld [vmem:[#allocation48_spill] sm:$0xff] }
 0x2e0   : > { %2198 = vmatprep.subr.mxu0 %v7617_v25  ;;  %2269 = vmatprep.subr.mxu1 %v7620_v8  ;;  %v9657_v25 = vld [vmem:[#allocation49_spill] sm:$0xff]  ;;  %v9658_v8 = vld [vmem:[#allocation50_spill] sm:$0xff] }
 0x2e1   : > { %2199 = vmatpush1.msra.mxu0 %v7623_v26  ;;  %2270 = vmatpush1.msra.mxu1 %v7626_v36  ;;  %v9659_v26 = vld [vmem:[#allocation51_spill] sm:$0xff]  ;;  %v9660_v36 = vld [vmem:[#allocation52_spill] sm:$0xff] }
 0x2e2   : > { %2200 = vmatprep.subr.mxu0 %v7629_v43  ;;  %2271 = vmatprep.subr.mxu1 %v7632_v44  ;;  %v9661_v43 = vld [vmem:[#allocation53_spill] sm:$0xff]  ;;  %v9662_v44 = vld [vmem:[#allocation54_spill] sm:$0xff] }
 0x2e3   : > { %2201 = vmatpush1.msra.mxu0 %v7635_v21  ;;  %2272 = vmatpush1.msra.mxu1 %v7638_v20  ;;  %v9663_v21 = vld [vmem:[#allocation55_spill] sm:$0xff]  ;;  %v9664_v20 = vld [vmem:[#allocation56_spill] sm:$0xff] }
 0x2e4   : > { %2202 = vmatprep.subr.mxu0 %v7641_v37  ;;  %2273 = vmatprep.subr.mxu1 %v7644_v40  ;;  %v9665_v37 = vld [vmem:[#allocation57_spill] sm:$0xff]  ;;  %v9666_v40 = vld [vmem:[#allocation58_spill] sm:$0xff] }
 0x2e5   : > { %2203 = vmatpush1.msra.mxu0 %v9654_v47  ;;  %2274 = vmatpush1.msra.mxu1 %v9655_v48  ;;  %v9700_v47 = vld [vmem:[#allocation92_spill] sm:$0xff]  ;;  %v9701_v48 = vld [vmem:[#allocation93_spill] sm:$0xff] }
 0x2e6   : > { %2204 = vmatprep.subr.mxu0 %v9656_v23  ;;  %2275 = vmatprep.subr.mxu1 %v9657_v25  ;;  %v9702_v23 = vld [vmem:[#allocation94_spill] sm:$0xff]  ;;  %v9703_v25 = vmov 0.0  }
 0x2e7   : > { %2205 = vmatpush1.msra.mxu0 %v9658_v8  ;;  %2276 = vmatpush1.msra.mxu1 %v9659_v26  ;;  %v9704_v8 = vld [vmem:[#allocation95_spill] sm:$0xff]  ;;  %v9705_v26 = vld [vmem:[#allocation96_spill] sm:$0xff] }
 0x2e8   : > { %2206 = vmatprep.subr.mxu0 %v9660_v36  ;;  %2277 = vmatprep.subr.mxu1 %v9661_v43  ;;  %v9706_v36 = vld [vmem:[#allocation97_spill] sm:$0xff] }
 0x2e9   : > { %2207 = vmatpush1.msra.mxu0 %v9662_v44  ;;  %2278 = vmatpush1.msra.mxu1 %v9663_v21 }
 0x2ea   : > { %2208 = vmatprep.subr.mxu0 %v9664_v20  ;;  %2279 = vmatprep.subr.mxu1 %v9665_v37 }
 0x2eb   : > { %2209 = vmatpush1.msra.mxu0 %v9666_v40  ;;  %2280 = vmatpush1.msra.mxu1 %v9667_v24 }
 0x2ec   : > { %2210 = vmatprep.subr.mxu0 %v9668_v15  ;;  %2281 = vmatprep.subr.mxu1 %v9669_v11 }
 0x2ed   : > { %2211 = vmatpush1.msra.mxu0 %v9670_v33  ;;  %2282 = vmatpush1.msra.mxu1 %v9671_v19  ;;  %v9707_v19 = vld [vmem:[#allocation19_spill] sm:$0xff] }
 0x2ee   : > { %2212 = vmatprep.subr.mxu0 %v9672_v39  ;;  %2283 = vmatprep.subr.mxu1 %v9673_v30  ;;  %v9708_v30 = vld [vmem:[#allocation20_spill] sm:$0xff] }
 0x2ef   : > { %2213 = vmatpush1.msra.mxu0 %v9674_v27  ;;  %2284 = vmatpush1.msra.mxu1 %v9675_v56 }
 0x2f0   : > { %2214 = vmatprep.subr.mxu0 %v9676_v18  ;;  %2285 = vmatprep.subr.mxu1 %v9677_v22 }
 0x2f1   : > { %2215 = vmatpush1.msra.mxu0 %v9678_v31  ;;  %2286 = vmatpush1.msra.mxu1 %v9679_v55 }
 0x2f2   : > { %2216 = vmatprep.subr.mxu0 %v9680_v7  ;;  %2287 = vmatprep.subr.mxu1 %v9681_v53 }
 0x2f3   : > { %2217 = vmatpush1.msra.mxu0 %v9682_v28  ;;  %2288 = vmatpush1.msra.mxu1 %v9683_v10 }
 0x2f4   : > { %2218 = vmatprep.subr.mxu0 %v9684_v41  ;;  %2289 = vmatprep.subr.mxu1 %v9685_v45 }
 0x2f5   : > { %2219 = vmatpush1.msra.mxu0 %v9686_v49  ;;  %2290 = vmatpush1.msra.mxu1 %v9687_v32 }
 0x2f6   : > { %2220 = vmatprep.subr.mxu0 %v9688_v58  ;;  %2291 = vmatprep.subr.mxu1 %v9689_v6 }
 0x2f7   : > { %2221 = vmatpush1.msra.mxu0 %v9690_v63  ;;  %2292 = vmatpush1.msra.mxu1 %v9691_v4 }
 0x2f8   : > { %2222 = vmatprep.subr.mxu0 %v9692_v5  ;;  %2293 = vmatprep.subr.mxu1 %v9693_v59 }
 0x2f9   : > { %2223 = vmatpush1.msra.mxu0 %v9694_v62  ;;  %2294 = vmatpush1.msra.mxu1 %v9695_v13 }
 0x2fa   : > { %2224 = vmatprep.subr.mxu0 %v9696_v29  ;;  %2295 = vmatprep.subr.mxu1 %v9697_v38 }
 0x2fb   : > { %2225 = vmatpush1.msra.mxu0 %v9698_v51  ;;  %2296 = vmatpush1.msra.mxu1 %v9699_v35  ;;  %v9709_v51 = vld [vmem:[#allocation25_spill] sm:$0xff] }
 0x2fc   : > { %2226 = vmatprep.subr.mxu0 %v9700_v47  ;;  %2297 = vmatprep.subr.mxu1 %v9701_v48  ;;  %v9710_v47 = vld [vmem:[#allocation26_spill] sm:$0xff] }
 0x2fd   : > { %2227 = vmatpush1.msra.mxu0 %v9702_v23  ;;  %2260 = vmatprep.mubr.f32.mxu0 %v9703_v25 }
 0x2fe   : > { %2298 = vmatpush1.msra.mxu1 %v9704_v8  ;;  %2331 = vmatprep.mubr.f32.mxu1 %v9703_v25  ;;  %v9711_v8 = vld [vmem:[#allocation27_spill] sm:$0xff] }
 0x2ff   : > { %2674 = vmatprep.subr.mxu0 %v9705_v26  ;;  %2745 = vmatprep.subr.mxu1 %v9706_v36 }
 0x39e   : > { %v1784_v43 = vpop.f32.mrf.mxu0  ;;  %v1855_v55 = vpop.f32.mrf.mxu1 }
 0x39f   : > { %v1864_v44 = vrot.slane %v1784_v43, 6  ;;  %v1868_v21 = vrot.slane %v1784_v43, 7  ;;  %v1872_v20 = vrot.slane %v1784_v43, 1  ;;  %v1876_v37 = vrot.slane %v1784_v43, 2 }
 0x3a0   : > { %v1880_v40 = vrot.slane %v1784_v43, 3  ;;  %v1884_v24 = vrot.slane %v1784_v43, 4  ;;  %v1932_v15 = vadd.f32 %v1784_v43, %v7396_v0  ;;  %v1888_v11 = vrot.slane %v1784_v43, 5  ;;  %v9712_v43 = vld [vmem:[#allocation28_spill] sm:$0xff] }
 0x3a1   : > { %v1924_v33 = vadd.f32 %v1864_v44, %v7391_v60  ;;  %v1928_v39 = vadd.f32 %v1868_v21, %v9707_v19  ;;  %v1936_v27 = vadd.f32 %v1872_v20, %v9708_v30  ;;  %v1940_v56 = vadd.f32 %v1876_v37, %v7400_v2  ;;  %v9713_v20 = vld [vmem:[#allocation29_spill] sm:$0xff] }
 0x3a2   : > { %v5024_v18 = vmul.f32 -1.442695, %v1932_v15  ;;  %v1944_v22 = vadd.f32 %v1880_v40, %v7402_v9  ;;  %v1948_v7 = vadd.f32 %v1884_v24, %v7411_v54  ;;  %v1952_v28 = vadd.f32 %v1888_v11, %v7414_v17 }
 0x3a3   : > { %v5018_v31 = vmul.f32 -1.442695, %v1924_v33  ;;  %v5021_v53 = vmul.f32 -1.442695, %v1928_v39  ;;  %v5027_v10 = vmul.f32 -1.442695, %v1936_v27  ;;  %v1934_v29 = vadd.f32 %v1855_v55, %v7427_v61  ;;  %v1786_v33 = vpop.f32.mrf.mxu0 }
 0x3a4   : > { %5640 = vpow2.f32 %v5024_v18  ;;  %v5030_v41 = vmul.f32 -1.442695, %v1940_v56  ;;  %v1866_v45 = vrot.slane %v1855_v55, 6  ;;  %v5033_v49 = vmul.f32 -1.442695, %v1944_v22 }
 0x3a5   : > { %5642 = vpow2.f32 %v5018_v31  ;;  %v1870_v32 = vrot.slane %v1855_v55, 7  ;;  %v5036_v58 = vmul.f32 -1.442695, %v1948_v7  ;;  %v5039_v6 = vmul.f32 -1.442695, %v1952_v28 }
 0x3a6   : > { %5644 = vpow2.f32 %v5021_v53  ;;  %v1874_v63 = vrot.slane %v1855_v55, 1  ;;  %v1878_v4 = vrot.slane %v1855_v55, 2  ;;  %v1926_v5 = vadd.f32 %v1866_v45, %v7420_v42 }
 0x3a7   : > { %5646 = vpow2.f32 %v5027_v10  ;;  %v1882_v59 = vrot.slane %v1855_v55, 3  ;;  %v1930_v62 = vadd.f32 %v1870_v32, %v7424_v52  ;;  %v1886_v13 = vrot.slane %v1855_v55, 4 }
 0x3a8   : > { %5648 = vpow2.f32 %v5030_v41  ;;  %v1890_v38 = vrot.slane %v1855_v55, 5  ;;  %v1938_v35 = vadd.f32 %v1874_v63, %v9709_v51  ;;  %v1942_v48 = vadd.f32 %v1878_v4, %v9710_v47  ;;  %v9714_v4 = vld [vmem:[#allocation30_spill] sm:$0xff] }
 0x3a9   : > { %5650 = vpow2.f32 %v5033_v49  ;;  %v5020_v23 = vmul.f32 -1.442695, %v1926_v5  ;;  %v1946_v26 = vadd.f32 %v1882_v59, %v9711_v8  ;;  %v5023_v36 = vmul.f32 -1.442695, %v1930_v62 }
 0x3aa   : > { %5652 = vpow2.f32 %v5036_v58  ;;  %v1950_v44 = vadd.f32 %v1886_v13, %v9712_v43  ;;  %v5026_v21 = vmul.f32 -1.442695, %v1934_v29  ;;  %v1954_v37 = vadd.f32 %v1890_v38, %v9713_v20  ;;  %v9715_v13 = vld [vmem:[#allocation31_spill] sm:$0xff] }
 0x3ab   : > { %5654 = vpow2.f32 %v5039_v6  ;;  %v5029_v40 = vmul.f32 -1.442695, %v1938_v35  ;;  %v5032_v24 = vmul.f32 -1.442695, %v1942_v48  ;;  %v5035_v11 = vmul.f32 -1.442695, %v1946_v26 }
 0x3ac   : > { %5656 = vpow2.f32 %v5020_v23  ;;  %v5038_v27 = vmul.f32 -1.442695, %v1950_v44  ;;  %v5041_v18 = vmul.f32 -1.442695, %v1954_v37  ;;  %v1865_v55 = vrot.slane %v1786_v33, 6  ;;  %v9716_v48 = vld [vmem:[#allocation32_spill] sm:$0xff] }
 0x3ad   : > { %5658 = vpow2.f32 %v5023_v36  ;;  %v1869_v28 = vrot.slane %v1786_v33, 7  ;;  %v1873_v32 = vrot.slane %v1786_v33, 1  ;;  %v1877_v63 = vrot.slane %v1786_v33, 2  ;;  %v9717_v44 = vld [vmem:[#allocation33_spill] sm:$0xff]  ;;  %v9718_v37 = vld [vmem:[#allocation34_spill] sm:$0xff] }
 0x3ae   : > { %5660 = vpow2.f32 %v5026_v21  ;;  %v1925_v5 = vadd.f32 %v1865_v55, %v9714_v4  ;;  %v1881_v62 = vrot.slane %v1786_v33, 3  ;;  %v1885_v35 = vrot.slane %v1786_v33, 4 }
 0x3af   : > { %5662 = vpow2.f32 %v5029_v40  ;;  %v1929_v29 = vadd.f32 %v1869_v28, %v9715_v13  ;;  %v1933_v23 = vadd.f32 %v1786_v33, %v9716_v48  ;;  %v1889_v36 = vrot.slane %v1786_v33, 5 }
 0x3b0   : > { %5664 = vpow2.f32 %v5032_v24  ;;  %v1937_v21 = vadd.f32 %v1873_v32, %v9717_v44  ;;  %v1941_v40 = vadd.f32 %v1877_v63, %v9718_v37  ;;  %v5019_v24 = vmul.f32 -1.442695, %v1925_v5 }
 0x3b1   : > { %v5641_v15 = vpop.eup %5640  ;;  %5666 = vpow2.f32 %v5035_v11  ;;  %v9719_v11 = vld [vmem:[#allocation35_spill] sm:$0xff]  ;;  %v5025_v55 = vmul.f32 -1.442695, %v1933_v23 }
 0x3b2   : > { %v5643_v39 = vpop.eup %5642  ;;  %v2034_v31 = vadd.f32 1.0, %v5641_v15  ;;  %5668 = vpow2.f32 %v5038_v27  ;;  %v5022_v27 = vmul.f32 -1.442695, %v1929_v29  ;;  %v5028_v28 = vmul.f32 -1.442695, %v1937_v21  ;;  %v9723_v21 = vld [vmem:[#allocation39_spill] sm:$0xff] }
 0x3b3   : > { %v5645_v56 = vpop.eup %5644  ;;  %v2028_v53 = vadd.f32 1.0, %v5643_v39  ;;  %5670 = vpow2.f32 %v5041_v18  ;;  %v1945_v39 = vadd.f32 %v1881_v62, %v9719_v11 }
 0x3b4   : > { %v5647_v22 = vpop.eup %5646  ;;  %v2031_v41 = vadd.f32 1.0, %v5645_v56  ;;  %5672 = vrcp.f32 %v2034_v31  ;;  %v1857_v56 = vpop.f32.mrf.mxu1 }
 0x3b5   : > { %v5649_v7 = vpop.eup %5648  ;;  %v2037_v49 = vadd.f32 1.0, %v5647_v22  ;;  %5674 = vrcp.f32 %v2028_v53  ;;  %v9720_v22 = vld [vmem:[#allocation36_spill] sm:$0xff]  ;;  %v5034_v32 = vmul.f32 -1.442695, %v1945_v39  ;;  %v1875_v62 = vrot.slane %v1857_v56, 1 }
 0x3b6   : > { %v5651_v10 = vpop.eup %5650  ;;  %v2040_v6 = vadd.f32 1.0, %v5649_v7  ;;  %5676 = vrcp.f32 %v2031_v41  ;;  %v1949_v31 = vadd.f32 %v1885_v35, %v9720_v22  ;;  %v9721_v7 = vld [vmem:[#allocation37_spill] sm:$0xff]  ;;  %v5031_v41 = vmul.f32 -1.442695, %v1941_v40  ;;  %v9722_v35 = vld [vmem:[#allocation38_spill] sm:$0xff]  ;;  %v9728_v22 = vld [vmem:[#allocation44_spill] sm:$0xff] }
 0x3b7   : > { %v5653_v45 = vpop.eup %5652  ;;  %v2043_v59 = vadd.f32 1.0, %v5651_v10  ;;  %5678 = vrcp.f32 %v2037_v49  ;;  %v1953_v53 = vadd.f32 %v1889_v36, %v9721_v7  ;;  %v1883_v36 = vrot.slane %v1857_v56, 3 }
 0x3b8   : > { %v5655_v58 = vpop.eup %5654  ;;  %v2046_v38 = vadd.f32 1.0, %v5653_v45  ;;  %5680 = vrcp.f32 %v2040_v6  ;;  %v1867_v45 = vrot.slane %v1857_v56, 6  ;;  %v5037_v63 = vmul.f32 -1.442695, %v1949_v31 }
 0x3b9   : > { %v2049_v26 = vadd.f32 1.0, %v5655_v58  ;;  %v8014_v15 = vpop.eup %5656  ;;  %5682 = vrcp.f32 %v2043_v59  ;;  %v1871_v58 = vrot.slane %v1857_v56, 7  ;;  %v5040_v59 = vmul.f32 -1.442695, %v1953_v53 }
 0x3ba   : > { %v8017_v18 = vpop.eup %5658  ;;  %5684 = vrcp.f32 %v2046_v38  ;;  %v1879_v38 = vrot.slane %v1857_v56, 2  ;;  %v1927_v23 = vadd.f32 %v1867_v45, %v9722_v35  ;;  %v1887_v39 = vrot.slane %v1857_v56, 4  ;;  %v9726_v45 = vld [vmem:[#allocation42_spill] sm:$0xff] }
 0x3bb   : > { %v8020_v33 = vpop.eup %5660  ;;  %5686 = vrcp.f32 %v2049_v26  ;;  %v1931_v40 = vadd.f32 %v1871_v58, %v9723_v21  ;;  %v1891_v53 = vrot.slane %v1857_v56, 5  ;;  %v9727_v58 = vld [vmem:[#allocation43_spill] sm:$0xff] }
 0x3bc   : > { %v8023_v10 = vpop.eup %5662  ;;  %5688 = vpow2.f32 %v5019_v24  ;;  %v1943_v35 = vadd.f32 %v1879_v38, %v9726_v45  ;;  %v1947_v21 = vadd.f32 %v1883_v36, %v9727_v58 }
 0x3bd   : > { %v8025_v49 = vpop.eup %5664  ;;  %5690 = vpow2.f32 %v5022_v27  ;;  %v9724_v27 = vld [vmem:[#allocation40_spill] sm:$0xff] }
 0x3be   : > { %v8027_v6 = vpop.eup %5666  ;;  %5692 = vpow2.f32 %v5025_v55  ;;  %v1935_v31 = vadd.f32 %v1857_v56, %v9724_v27  ;;  %v1951_v27 = vadd.f32 %v1887_v39, %v9728_v22  ;;  %v9729_v56 = vld [vmem:[#allocation45_spill] sm:$0xff] }
 0x3bf   : > { %v8029_v5 = vpop.eup %5668  ;;  %5694 = vpow2.f32 %v5028_v28  ;;  %v9725_v28 = vld [vmem:[#allocation41_spill] sm:$0xff] }
 0x3c0   : > { %v8031_v29 = vpop.eup %5670  ;;  %5696 = vpow2.f32 %v5031_v41  ;;  %v1939_v41 = vadd.f32 %v1875_v62, %v9725_v28 }
 0x3c1   : > { %v8034_v26 = vpop.eup %5672  ;;  %5698 = vpow2.f32 %v5034_v32 }
 0x3c2   : > { %v8037_v24 = vpop.eup %5674  ;;  %5700 = vpow2.f32 %v5037_v63 }
 0x3c3   : > { %v8040_v55 = vpop.eup %5676  ;;  %5702 = vpow2.f32 %v5040_v59  ;;  %v1955_v59 = vadd.f32 %v1891_v53, %v9729_v56 }
 0x3c4   : > { %v8043_v7 = vpop.eup %5678  ;;  %5704 = vtanh.f32 %v1927_v23 }
 0x3c5   : > { %v8046_v32 = vpop.eup %5680  ;;  %5706 = vtanh.f32 %v1931_v40 }
 0x3c6   : > { %v8049_v63 = vpop.eup %5682  ;;  %5708 = vtanh.f32 %v1935_v31 }
 0x3c7   : > { %v8052_v11 = vpop.eup %5684  ;;  %5710 = vtanh.f32 %v1939_v41 }
 0x3c8   : > { %v8055_v62 = vpop.eup %5686  ;;  %5712 = vtanh.f32 %v1943_v35 }
 0x3c9   : > { %v5689_v38 = vpop.eup %5688  ;;  %5714 = vtanh.f32 %v1947_v21 }
 0x3ca   : > { %v5691_v23 = vpop.eup %5690  ;;  %v2029_v45 = vadd.f32 1.0, %v5689_v38  ;;  %5716 = vtanh.f32 %v1951_v27 }
 0x3cb   : > { %v5693_v36 = vpop.eup %5692  ;;  %v2032_v40 = vadd.f32 1.0, %v5691_v23  ;;  %5718 = vtanh.f32 %v1955_v59  ;;  %v2030_v59 = vadd.f32 1.0, %v8014_v15  ;;  %v2116_v15 = vrot.slane %v7888_v57, 7 }
 0x3cc   : > { %v5695_v58 = vpop.eup %5694  ;;  %v2035_v28 = vadd.f32 1.0, %v5693_v36  ;;  %5720 = vrcp.f32 %v2029_v45 }
 0x3cd   : > { %v5697_v39 = vpop.eup %5696  ;;  %v2038_v31 = vadd.f32 1.0, %v5695_v58  ;;  %5722 = vrcp.f32 %v2032_v40  ;;  %v2033_v58 = vadd.f32 1.0, %v8017_v18 }
 0x3ce   : > { %v5699_v22 = vpop.eup %5698  ;;  %v2041_v53 = vadd.f32 1.0, %v5697_v39  ;;  %5724 = vrcp.f32 %v2035_v28  ;;  %v2036_v28 = vadd.f32 1.0, %v8020_v33  ;;  %v2119_v33 = vrot.slane %v7898_v14, 7 }
 0x3cf   : > { %v5701_v41 = vpop.eup %5700  ;;  %v2044_v56 = vadd.f32 1.0, %v5699_v22  ;;  %5726 = vrcp.f32 %v2038_v31  ;;  %v2039_v22 = vadd.f32 1.0, %v8023_v10  ;;  %v2042_v31 = vadd.f32 1.0, %v8025_v49 }
 0x3d0   : > { %v5703_v35 = vpop.eup %5702  ;;  %v2047_v21 = vadd.f32 1.0, %v5701_v41  ;;  %5728 = vrcp.f32 %v2041_v53  ;;  %v2045_v41 = vadd.f32 1.0, %v8027_v6  ;;  %v2048_v10 = vadd.f32 1.0, %v8029_v5 }
 0x3d1   : > { %v5705_v38 = vpop.eup %5704  ;;  %v2050_v27 = vadd.f32 1.0, %v5703_v35  ;;  %5730 = vrcp.f32 %v2044_v56  ;;  %v2117_v56 = vrot.slane %v7890_v46, 7  ;;  %v2118_v35 = vrot.slane %v7894_v3, 7 }
 0x3d2   : > { %v5707_v23 = vpop.eup %5706  ;;  %5732 = vrcp.f32 %v2047_v21  ;;  %v2120_v49 = vrot.slane %v7902_v34, 7  ;;  %v2051_v46 = vadd.f32 1.0, %v8031_v29  ;;  %v2122_v6 = vrot.slane %v7909_v1, 7 }
 0x3d3   : > { %v5709_v45 = vpop.eup %5708  ;;  %5734 = vrcp.f32 %v2050_v27  ;;  %v2121_v27 = vrot.slane %v7906_v16, 7  ;;  %v2123_v14 = vrot.slane %v7912_v50, 7  ;;  %v2141_v5 = vmul.f32 %v5707_v23, %v8040_v55 }
 0x3d4   : > { %v5711_v36 = vpop.eup %5710  ;;  %5736 = vrcp.f32 %v2030_v59  ;;  %v2140_v59 = vmul.f32 %v5705_v38, %v8037_v24  ;;  %v2142_v16 = vmul.f32 %v5709_v45, %v8034_v26 }
 0x3d5   : > { %v5713_v40 = vpop.eup %5712  ;;  %5738 = vrcp.f32 %v2033_v58  ;;  %v2143_v24 = vmul.f32 %v5711_v36, %v8043_v7 }
 0x3d6   : > { %v5715_v39 = vpop.eup %5714  ;;  %5740 = vrcp.f32 %v2036_v28 }
 0x3d7   : > { %v5717_v53 = vpop.eup %5716  ;;  %5742 = vrcp.f32 %v2039_v22  ;;  %v2145_v45 = vmul.f32 %v5715_v39, %v8049_v63 }
 0x3d8   : > { %v5719_v18 = vpop.eup %5718  ;;  %5744 = vrcp.f32 %v2042_v31  ;;  %v2146_v36 = vmul.f32 %v5717_v53, %v8052_v11 }
 0x3d9   : > { %v5721_v21 = vpop.eup %5720  ;;  %5746 = vrcp.f32 %v2045_v41 }
 0x3da   : > { %v5723_v57 = vpop.eup %5722  ;;  %v2132_v3 = vmul.f32 %v5721_v21, %v2116_v15  ;;  %5748 = vrcp.f32 %v2048_v10  ;;  %v2144_v15 = vmul.f32 %v5713_v40, %v8046_v32  ;;  %v2147_v32 = vmul.f32 %v5719_v18, %v8055_v62 }
 0x3db   : > { %v5725_v58 = vpop.eup %5724  ;;  %v2133_v28 = vmul.f32 %v5723_v57, %v2117_v56  ;;  %5750 = vrcp.f32 %v2051_v46 }
 0x3dc   : > { %v5727_v34 = vpop.eup %5726  ;;  %v2134_v22 = vmul.f32 %v5725_v58, %v2118_v35  ;;  %v8076_v29 = vadd.f32 %v2140_v59, %v2132_v3 }
 0x3dd   : > { %v5729_v37 = vpop.eup %5728  ;;  %v2135_v1 = vmul.f32 %v5727_v34, %v2119_v33  ;;  %v8079_v38 = vadd.f32 %v2141_v5, %v2133_v28 }
 0x3de   : > { %v5731_v31 = vpop.eup %5730  ;;  %v2136_v50 = vmul.f32 %v5729_v37, %v2120_v49  ;;  %v8082_v55 = vadd.f32 %v2142_v16, %v2134_v22  ;;  %5752 = vtanh.f32 %v8076_v29 }
 0x3df   : > { %v5733_v26 = vpop.eup %5732  ;;  %v2137_v23 = vmul.f32 %v5731_v31, %v2121_v27  ;;  %v8086_v56 = vadd.f32 %v2143_v24, %v2135_v1  ;;  %5754 = vtanh.f32 %v8079_v38 }
 0x3e0   : > { %v5735_v41 = vpop.eup %5734  ;;  %v2138_v7 = vmul.f32 %v5733_v26, %v2122_v6  ;;  %v8090_v35 = vadd.f32 %v2144_v15, %v2136_v50  ;;  %5756 = vtanh.f32 %v8082_v55 }
 0x3e1   : > { %v2139_v37 = vmul.f32 %v5735_v41, %v2123_v14  ;;  %v8094_v40 = vadd.f32 %v2145_v45, %v2137_v23  ;;  %5758 = vtanh.f32 %v8086_v56  ;;  %v5737_v39 = vpop.eup %5736 }
 0x3e2   : > { %v8097_v63 = vadd.f32 %v2146_v36, %v2138_v7  ;;  %5760 = vtanh.f32 %v8090_v35  ;;  %v5739_v11 = vpop.eup %5738 }
 0x3e3   : > { %v8100_v33 = vadd.f32 %v2147_v32, %v2139_v37  ;;  %5762 = vtanh.f32 %v8094_v40  ;;  %v5741_v53 = vpop.eup %5740 }
 0x3e4   : > { %5764 = vtanh.f32 %v8097_v63  ;;  %v5743_v62 = vpop.eup %5742 }
 0x3e5   : > { %5766 = vtanh.f32 %v8100_v33  ;;  %v5745_v18 = vpop.eup %5744 }
 0x3e6   : > { %v5747_v10 = vpop.eup %5746 }
 0x3e7   : > { %v5749_v21 = vpop.eup %5748 }
 0x3e8   : > { %v5751_v49 = vpop.eup %5750 }
 0x3eb   : > { %v5753_v27 = vpop.eup %5752 }
 0x3ec   : > { %v5755_v46 = vpop.eup %5754  ;;  %v2164_v57 = vmul.f32 %v5753_v27, %v5737_v39  ;;  %v8124_v27 = vld [vmem:[#allocation10 + $0x1d8] sm:$0xff] }
 0x3ed   : > { %v5757_v6 = vpop.eup %5756  ;;  %v2165_v59 = vmul.f32 %v5755_v46, %v5739_v11  ;;  %v8130_v46 = vld [vmem:[#allocation10 + $0x1d0] sm:$0xff] }
 0x3ee   : > { %v5759_v3 = vpop.eup %5758  ;;  %v2180_v58 = vrot.slane %v2164_v57, 2  ;;  %v2166_v16 = vmul.f32 %v5757_v6, %v5741_v53  ;;  %v8133_v57 = vld [vmem:[#allocation10 + $0x1a8] sm:$0xff]  ;;  %v8136_v6 = vld [vmem:[#allocation10 + $0x1b8] sm:$0xff] }
 0x3ef   : > { %v5761_v14 = vpop.eup %5760  ;;  %v2167_v5 = vmul.f32 %v5759_v3, %v5743_v62  ;;  %v2181_v28 = vrot.slane %v2165_v59, 1  ;;  %v8139_v59 = vld [vmem:[#allocation10 + $0x1a0] sm:$0xff]  ;;  %v8142_v3 = vld [vmem:[#allocation10 + $0x1b0] sm:$0xff] }
 0x3f0   : > { %v5763_v34 = vpop.eup %5762  ;;  %v2168_v22 = vmul.f32 %v5761_v14, %v5745_v18  ;;  %v8148_v14 = vld [vmem:[#allocation10 + $0x198] sm:$0xff] }
 0x3f1   : > { %v5765_v1 = vpop.eup %5764  ;;  %v2169_v24 = vmul.f32 %v5763_v34, %v5747_v10  ;;  %v2182_v31 = vsel %vm1218_vm1, %v2181_v28, %v2180_v58  ;;  %v2184_v50 = vrot.slane %v2167_v5, 7  ;;  %v8115_v10 = vld [vmem:[#allocation10 + $0x1e0] sm:$0xff]  ;;  %v8145_v58 = vld [vmem:[#allocation10 + $0x188] sm:$0xff]  ;;  %v8154_v28 = vld [vmem:[#allocation10 + $0x190] sm:$0xff] }
 0x3f2   : > { %v5767_v15 = vpop.eup %5766  ;;  %v2170_v26 = vmul.f32 %v5765_v1, %v5749_v21  ;;  %v2183_v23 = vsel %vm1221_vm2, %v2166_v16, %v2182_v31  ;;  %v2186_v45 = vrot.slane %v2168_v22, 6  ;;  %v8118_v21 = vld [vmem:[#allocation10 + $0x1f0] sm:$0xff]  ;;  %v8151_v5 = vld [vmem:[#allocation10 + $0x180] sm:$0xff]  ;;  %v8157_v34 = vld [vmem:[#allocation10 + $0x168] sm:$0xff] }
 0x3f3   : > { %v2171_v41 = vmul.f32 %v5767_v15, %v5751_v49  ;;  %v2185_v7 = vsel %vm1224_vm3, %v2184_v50, %v2183_v23  ;;  %v2188_v36 = vrot.slane %v2169_v24, 5  ;;  %v8121_v49 = vld [vmem:[#allocation10 + $0x1c8] sm:$0xff]  ;;  %v8160_v16 = vld [vmem:[#allocation10 + $0x178] sm:$0xff]  ;;  %v8163_v22 = vld [vmem:[#allocation10 + $0x160] sm:$0xff] }
 0x3f4   : > { %v2187_v37 = vsel %vm1227_vm4, %v2186_v45, %v2185_v7  ;;  %v2190_v32 = vrot.slane %v2170_v26, 4  ;;  %9730 = vst [vmem:[#allocation46_spill] sm:$0xff] %v8160_v16  ;;  %9731 = vst [vmem:[#allocation47_spill] sm:$0xff] %v8163_v22  ;;  %v8166_v1 = vld [vmem:[#allocation10 + $0x170] sm:$0xff]  ;;  %v8169_v24 = vld [vmem:[#allocation10 + $0x148] sm:$0xff] }
 0x3f5   : > { %v2189_v39 = vsel %vm1230_vm5, %v2188_v36, %v2187_v37  ;;  %v2192_v11 = vrot.slane %v2171_v41, 3  ;;  %9732 = vst [vmem:[#allocation48_spill] sm:$0xff] %v8166_v1  ;;  %9733 = vst [vmem:[#allocation49_spill] sm:$0xff] %v8169_v24  ;;  %v8172_v31 = vld [vmem:[#allocation10 + $0x158] sm:$0xff]  ;;  %v8175_v50 = vld [vmem:[#allocation10 + $0x140] sm:$0xff] }
 0x3f6   : > { %v2191_v53 = vsel %vm1233_vm6, %v2190_v32, %v2189_v39  ;;  %9734 = vst [vmem:[#allocation50_spill] sm:$0xff] %v8172_v31  ;;  %9735 = vst [vmem:[#allocation51_spill] sm:$0xff] %v8175_v50  ;;  %v8178_v15 = vld [vmem:[#allocation10 + $0x150] sm:$0xff]  ;;  %v8181_v26 = vld [vmem:[#allocation10 + $0x128] sm:$0xff] }
 0x3f7   : > { %v2193_v62 = vsel %vm1236_vm7, %v2192_v11, %v2191_v53  ;;  %9736 = vst [vmem:[#allocation52_spill] sm:$0xff] %v8178_v15  ;;  %9737 = vst [vmem:[#allocation53_spill] sm:$0xff] %v8181_v26  ;;  %v8184_v23 = vld [vmem:[#allocation10 + $0x138] sm:$0xff]  ;;  %v8187_v45 = vld [vmem:[#allocation10 + $0x120] sm:$0xff] }
 0x3f8   : > { %v8113_v18 = vadd.f32 %v2193_v62, %v7925_v12  ;;  %2261 = vmatmul.mubr.f32.vlgmr.msra.gmra.mxu0 %v2193_v62  ;;  %2332 = vmatmul.mubr.f32.vlgmr.msra.gmra.mxu1 %v2193_v62  ;;  %v8127_v12 = vld [vmem:[#allocation10 + $0x1c0] sm:$0xff]  ;;  %9738 = vst [vmem:[#allocation54_spill] sm:$0xff] %v8184_v23  ;;  %9739 = vst [vmem:[#allocation55_spill] sm:$0xff] %v8187_v45  ;;  %v8190_v41 = vld [vmem:[#allocation10 + $0x130] sm:$0xff] }
 0x3f9   : > { %2675 = vmatpush1.msra.mxu0 %v8115_v10  ;;  %2746 = vmatpush1.msra.mxu1 %v8118_v21  ;;  %9740 = vst [vmem:[#allocation56_spill] sm:$0xff] %v8190_v41  ;;  %v8193_v7 = vld [vmem:[#allocation10 + $0x108] sm:$0xff]  ;;  %v8196_v36 = vld [vmem:[#allocation10 + $0x118] sm:$0xff]  ;;  %v8199_v37 = vld [vmem:[#allocation10 + $0x100] sm:$0xff] }
 0x3fa   : > { %2676 = vmatprep.subr.mxu0 %v8121_v49  ;;  %2747 = vmatprep.subr.mxu1 %v8124_v27  ;;  %9741 = vst [vmem:[#allocation57_spill] sm:$0xff] %v8193_v7  ;;  %9742 = vst [vmem:[#allocation58_spill] sm:$0xff] %v8196_v36  ;;  %v8202_v32 = vld [vmem:[#allocation10 + $0x110] sm:$0xff]  ;;  %v8205_v39 = vld [vmem:[#allocation10 + $0xe8] sm:$0xff] }
 0x3fb   : > { %2677 = vmatpush1.msra.mxu0 %v8127_v12  ;;  %2748 = vmatpush1.msra.mxu1 %v8130_v46  ;;  %9743 = vst [vmem:[#allocation59_spill] sm:$0xff] %v8199_v37  ;;  %9744 = vst [vmem:[#allocation60_spill] sm:$0xff] %v8202_v32  ;;  %v8208_v11 = vld [vmem:[#allocation10 + $0xf8] sm:$0xff]  ;;  %v8211_v53 = vld [vmem:[#allocation10 + $0xe0] sm:$0xff] }
 0x3fc   : > { %2678 = vmatprep.subr.mxu0 %v8133_v57  ;;  %2749 = vmatprep.subr.mxu1 %v8136_v6  ;;  %9745 = vst [vmem:[#allocation61_spill] sm:$0xff] %v8205_v39  ;;  %9746 = vst [vmem:[#allocation62_spill] sm:$0xff] %v8208_v11  ;;  %v8214_v62 = vld [vmem:[#allocation10 + $0xf0] sm:$0xff] }
 0x3fd   : > { %2679 = vmatpush1.msra.mxu0 %v8139_v59  ;;  %2750 = vmatpush1.msra.mxu1 %v8142_v3  ;;  %9747 = vst [vmem:[#allocation63_spill] sm:$0xff] %v8211_v53  ;;  %9748 = vst [vmem:[#allocation64_spill] sm:$0xff] %v8214_v62 }
 0x3fe   : > { %2680 = vmatprep.subr.mxu0 %v8145_v58  ;;  %2751 = vmatprep.subr.mxu1 %v8148_v14 }
 0x3ff   : > { %2681 = vmatpush1.msra.mxu0 %v8151_v5  ;;  %2752 = vmatpush1.msra.mxu1 %v8154_v28 }
 0x400   : > { %2682 = vmatprep.subr.mxu0 %v8157_v34  ;;  %2753 = vmatprep.subr.mxu1 %v8160_v16 }
 0x401   : > { %2683 = vmatpush1.msra.mxu0 %v8163_v22  ;;  %2754 = vmatpush1.msra.mxu1 %v8166_v1 }
 0x402   : > { %2684 = vmatprep.subr.mxu0 %v8169_v24  ;;  %2755 = vmatprep.subr.mxu1 %v8172_v31 }
 0x403   : > { %2685 = vmatpush1.msra.mxu0 %v8175_v50  ;;  %2756 = vmatpush1.msra.mxu1 %v8178_v15 }
 0x404   : > { %2686 = vmatprep.subr.mxu0 %v8181_v26  ;;  %2757 = vmatprep.subr.mxu1 %v8184_v23 }
 0x405   : > { %2687 = vmatpush1.msra.mxu0 %v8187_v45  ;;  %2758 = vmatpush1.msra.mxu1 %v8190_v41 }
 0x406   : > { %2688 = vmatprep.subr.mxu0 %v8193_v7  ;;  %2759 = vmatprep.subr.mxu1 %v8196_v36 }
 0x407   : > { %2689 = vmatpush1.msra.mxu0 %v8199_v37  ;;  %2760 = vmatpush1.msra.mxu1 %v8202_v32  ;;  %v8217_v37 = vld [vmem:[#allocation10 + $0xc8] sm:$0xff]  ;;  %v8220_v32 = vld [vmem:[#allocation10 + $0xd8] sm:$0xff] }
 0x408   : > { %2690 = vmatprep.subr.mxu0 %v8205_v39  ;;  %2761 = vmatprep.subr.mxu1 %v8208_v11  ;;  %9749 = vst [vmem:[#allocation65_spill] sm:$0xff] %v8217_v37  ;;  %9750 = vst [vmem:[#allocation66_spill] sm:$0xff] %v8220_v32  ;;  %v8223_v39 = vld [vmem:[#allocation10 + $0xc0] sm:$0xff]  ;;  %v8226_v11 = vld [vmem:[#allocation10 + $0xd0] sm:$0xff] }
 0x409   : > { %2691 = vmatpush1.msra.mxu0 %v8211_v53  ;;  %2762 = vmatpush1.msra.mxu1 %v8214_v62  ;;  %9751 = vst [vmem:[#allocation67_spill] sm:$0xff] %v8223_v39  ;;  %9752 = vst [vmem:[#allocation68_spill] sm:$0xff] %v8226_v11  ;;  %v8229_v53 = vld [vmem:[#allocation10 + $0xa8] sm:$0xff]  ;;  %v8232_v62 = vld [vmem:[#allocation10 + $0xb8] sm:$0xff] }
 0x40a   : > { %2692 = vmatprep.subr.mxu0 %v8217_v37  ;;  %2763 = vmatprep.subr.mxu1 %v8220_v32  ;;  %9753 = vst [vmem:[#allocation69_spill] sm:$0xff] %v8229_v53  ;;  %9754 = vst [vmem:[#allocation70_spill] sm:$0xff] %v8232_v62  ;;  %v8235_v37 = vld [vmem:[#allocation10 + $0xa0] sm:$0xff]  ;;  %v8238_v32 = vld [vmem:[#allocation10 + $0xb0] sm:$0xff] }
 0x40b   : > { %2693 = vmatpush1.msra.mxu0 %v8223_v39  ;;  %2764 = vmatpush1.msra.mxu1 %v8226_v11  ;;  %9755 = vst [vmem:[#allocation71_spill] sm:$0xff] %v8235_v37  ;;  %9756 = vst [vmem:[#allocation72_spill] sm:$0xff] %v8238_v32  ;;  %v8241_v39 = vld [vmem:[#allocation10 + $0x88] sm:$0xff]  ;;  %v8244_v11 = vld [vmem:[#allocation10 + $0x98] sm:$0xff] }
 0x40c   : > { %2694 = vmatprep.subr.mxu0 %v8229_v53  ;;  %2765 = vmatprep.subr.mxu1 %v8232_v62  ;;  %9757 = vst [vmem:[#allocation73_spill] sm:$0xff] %v8241_v39  ;;  %9758 = vst [vmem:[#allocation74_spill] sm:$0xff] %v8244_v11  ;;  %v8247_v53 = vld [vmem:[#allocation10 + $0x80] sm:$0xff]  ;;  %v8250_v62 = vld [vmem:[#allocation10 + $0x90] sm:$0xff] }
 0x40d   : > { %2695 = vmatpush1.msra.mxu0 %v8235_v37  ;;  %2766 = vmatpush1.msra.mxu1 %v8238_v32  ;;  %9759 = vst [vmem:[#allocation75_spill] sm:$0xff] %v8247_v53  ;;  %9760 = vst [vmem:[#allocation76_spill] sm:$0xff] %v8250_v62  ;;  %v8253_v37 = vld [vmem:[#allocation10 + $0x68] sm:$0xff]  ;;  %v8256_v32 = vld [vmem:[#allocation10 + $0x78] sm:$0xff] }
 0x40e   : > { %2696 = vmatprep.subr.mxu0 %v8241_v39  ;;  %2767 = vmatprep.subr.mxu1 %v8244_v11  ;;  %9761 = vst [vmem:[#allocation77_spill] sm:$0xff] %v8253_v37  ;;  %9762 = vst [vmem:[#allocation78_spill] sm:$0xff] %v8256_v32  ;;  %v8259_v39 = vld [vmem:[#allocation10 + $0x60] sm:$0xff]  ;;  %v8262_v11 = vld [vmem:[#allocation10 + $0x70] sm:$0xff] }
 0x40f   : > { %2697 = vmatpush1.msra.mxu0 %v8247_v53  ;;  %2768 = vmatpush1.msra.mxu1 %v8250_v62  ;;  %9763 = vst [vmem:[#allocation79_spill] sm:$0xff] %v8259_v39  ;;  %9764 = vst [vmem:[#allocation80_spill] sm:$0xff] %v8262_v11  ;;  %v8265_v53 = vld [vmem:[#allocation10 + $0x48] sm:$0xff]  ;;  %v8268_v62 = vld [vmem:[#allocation10 + $0x58] sm:$0xff] }
 0x410   : > { %2698 = vmatprep.subr.mxu0 %v8253_v37  ;;  %2769 = vmatprep.subr.mxu1 %v8256_v32  ;;  %9765 = vst [vmem:[#allocation81_spill] sm:$0xff] %v8265_v53  ;;  %9766 = vst [vmem:[#allocation82_spill] sm:$0xff] %v8268_v62  ;;  %v8271_v37 = vld [vmem:[#allocation10 + $0x40] sm:$0xff]  ;;  %v8274_v32 = vld [vmem:[#allocation10 + $0x50] sm:$0xff] }
 0x411   : > { %2699 = vmatpush1.msra.mxu0 %v8259_v39  ;;  %2770 = vmatpush1.msra.mxu1 %v8262_v11  ;;  %9767 = vst [vmem:[#allocation83_spill] sm:$0xff] %v8271_v37  ;;  %9768 = vst [vmem:[#allocation84_spill] sm:$0xff] %v8274_v32  ;;  %v8277_v39 = vld [vmem:[#allocation10 + $0x28] sm:$0xff]  ;;  %v8280_v11 = vld [vmem:[#allocation10 + $0x38] sm:$0xff] }
 0x412   : > { %2700 = vmatprep.subr.mxu0 %v8265_v53  ;;  %2771 = vmatprep.subr.mxu1 %v8268_v62  ;;  %9769 = vst [vmem:[#allocation85_spill] sm:$0xff] %v8277_v39  ;;  %9770 = vst [vmem:[#allocation86_spill] sm:$0xff] %v8280_v11  ;;  %v8283_v53 = vld [vmem:[#allocation10 + $0x20] sm:$0xff]  ;;  %v8286_v62 = vld [vmem:[#allocation10 + $0x30] sm:$0xff] }
 0x413   : > { %2701 = vmatpush1.msra.mxu0 %v8271_v37  ;;  %2772 = vmatpush1.msra.mxu1 %v8274_v32  ;;  %9771 = vst [vmem:[#allocation87_spill] sm:$0xff] %v8283_v53  ;;  %9772 = vst [vmem:[#allocation88_spill] sm:$0xff] %v8286_v62  ;;  %v8289_v37 = vld [vmem:[#allocation10 + $0x8] sm:$0xff]  ;;  %v8292_v32 = vld [vmem:[#allocation10 + $0x18] sm:$0xff] }
 0x414   : > { %2702 = vmatprep.subr.mxu0 %v8277_v39  ;;  %2773 = vmatprep.subr.mxu1 %v8280_v11  ;;  %9773 = vst [vmem:[#allocation89_spill] sm:$0xff] %v8289_v37  ;;  %9774 = vst [vmem:[#allocation90_spill] sm:$0xff] %v8292_v32  ;;  %v8295_v39 = vld [vmem:[#allocation10] sm:$0xff]  ;;  %v8299_v11 = vld [vmem:[#allocation10 + $0x10] sm:$0xff] }
 0x415   : > { %2703 = vmatpush1.msra.mxu0 %v8283_v53  ;;  %2774 = vmatpush1.msra.mxu1 %v8286_v62  ;;  %9775 = vst [vmem:[#allocation91_spill] sm:$0xff] %v8295_v39  ;;  %9776 = vst [vmem:[#allocation92_spill] sm:$0xff] %v8299_v11  ;;  %v8303_v62 = vld [vmem:[#allocation10 + $0x1e8] sm:$0xff] }
 0x416   : > { %2704 = vmatprep.subr.mxu0 %v8289_v37  ;;  %2775 = vmatprep.subr.mxu1 %v8292_v32  ;;  %9777 = vst [vmem:[#allocation93_spill] sm:$0xff] %v8303_v62  ;;  %v8306_v37 = vld [vmem:[#allocation10 + $0x1f8] sm:$0xff] }
 0x417   : > { %2705 = vmatpush1.msra.mxu0 %v8295_v39  ;;  %2738 = vmatprep.mubr.f32.mxu0 %v9703_v25  ;;  %9778 = vst [vmem:[#allocation94_spill] sm:$0xff] %v8306_v37 }
 0x418   : > { %2776 = vmatpush1.msra.mxu1 %v8299_v11  ;;  %2809 = vmatprep.mubr.f32.mxu1 %v9703_v25 }
 0x419   : > { %3152 = vmatprep.subr.mxu0 %v8303_v62  ;;  %3223 = vmatprep.subr.mxu1 %v8306_v37 }
 0x4b8   : > { %v2262_v32 = vpop.f32.mrf.mxu0  ;;  %v2333_v24 = vpop.f32.mrf.mxu1 }
 0x4b9   : > { %v2342_v53 = vrot.slane %v2262_v32, 5  ;;  %v2346_v36 = vrot.slane %v2262_v32, 6  ;;  %v2350_v39 = vrot.slane %v2262_v32, 7  ;;  %v2354_v7 = vrot.slane %v2262_v32, 1 }
 0x4ba   : > { %v2358_v41 = vrot.slane %v2262_v32, 2  ;;  %v2362_v45 = vrot.slane %v2262_v32, 3  ;;  %v2414_v23 = vadd.f32 %v2262_v32, %v9708_v30  ;;  %v2366_v11 = vrot.slane %v2262_v32, 4 }
 0x4bb   : > { %v2402_v25 = vadd.f32 %v2342_v53, %v7391_v60  ;;  %v2406_v26 = vadd.f32 %v2346_v36, %v9707_v19  ;;  %v2410_v62 = vadd.f32 %v2350_v39, %v7396_v0  ;;  %v2418_v15 = vadd.f32 %v2354_v7, %v7400_v2 }
 0x4bc   : > { %v5051_v50 = vmul.f32 -1.442695, %v2414_v23  ;;  %v2422_v37 = vadd.f32 %v2358_v41, %v7402_v9  ;;  %v2426_v1 = vadd.f32 %v2362_v45, %v7411_v54  ;;  %v2430_v16 = vadd.f32 %v2366_v11, %v7414_v17 }
 0x4bd   : > { %v5042_v31 = vmul.f32 -1.442695, %v2402_v25  ;;  %v5045_v22 = vmul.f32 -1.442695, %v2406_v26  ;;  %v5048_v30 = vmul.f32 -1.442695, %v2410_v62 }
 0x4be   : > { %5768 = vpow2.f32 %v5051_v50  ;;  %v5054_v32 = vmul.f32 -1.442695, %v2418_v15  ;;  %v2344_v53 = vrot.slane %v2333_v24, 5  ;;  %v5057_v36 = vmul.f32 -1.442695, %v2422_v37 }
 0x4bf   : > { %5770 = vpow2.f32 %v5042_v31  ;;  %v2348_v19 = vrot.slane %v2333_v24, 6  ;;  %v5060_v39 = vmul.f32 -1.442695, %v2426_v1  ;;  %v2352_v7 = vrot.slane %v2333_v24, 7 }
 0x4c0   : > { %5772 = vpow2.f32 %v5045_v22  ;;  %v5063_v23 = vmul.f32 -1.442695, %v2430_v16  ;;  %v2356_v25 = vrot.slane %v2333_v24, 1  ;;  %v2404_v41 = vadd.f32 %v2344_v53, %v7420_v42 }
 0x4c1   : > { %5774 = vpow2.f32 %v5048_v30  ;;  %v2360_v26 = vrot.slane %v2333_v24, 2  ;;  %v2408_v45 = vadd.f32 %v2348_v19, %v7424_v52  ;;  %v2364_v50 = vrot.slane %v2333_v24, 3 }
 0x4c2   : > { %5776 = vpow2.f32 %v5054_v32  ;;  %v2412_v15 = vadd.f32 %v2352_v7, %v7427_v61  ;;  %v2368_v31 = vrot.slane %v2333_v24, 4  ;;  %v2416_v22 = vadd.f32 %v2333_v24, %v9709_v51  ;;  %v2264_v7 = vpop.f32.mrf.mxu0  ;;  %v9789_v61 = vld [vmem:[#allocation44_spill] sm:$0xff] }
 0x4c3   : > { %5778 = vpow2.f32 %v5057_v36  ;;  %v2420_v1 = vadd.f32 %v2356_v25, %v9710_v47  ;;  %v5044_v30 = vmul.f32 -1.442695, %v2404_v41  ;;  %v2424_v16 = vadd.f32 %v2360_v26, %v9711_v8 }
 0x4c4   : > { %5780 = vpow2.f32 %v5060_v39  ;;  %v5047_v37 = vmul.f32 -1.442695, %v2408_v45  ;;  %v2428_v11 = vadd.f32 %v2364_v50, %v9712_v43  ;;  %v5050_v62 = vmul.f32 -1.442695, %v2412_v15 }
 0x4c5   : > { %5782 = vpow2.f32 %v5063_v23  ;;  %v2432_v32 = vadd.f32 %v2368_v31, %v9713_v20  ;;  %v5053_v19 = vmul.f32 -1.442695, %v2416_v22  ;;  %v5056_v53 = vmul.f32 -1.442695, %v2420_v1 }
 0x4c6   : > { %5784 = vpow2.f32 %v5044_v30  ;;  %v5059_v39 = vmul.f32 -1.442695, %v2424_v16  ;;  %v5062_v24 = vmul.f32 -1.442695, %v2428_v11  ;;  %v2343_v50 = vrot.slane %v2264_v7, 5 }
 0x4c7   : > { %5786 = vpow2.f32 %v5047_v37  ;;  %v5065_v41 = vmul.f32 -1.442695, %v2432_v32  ;;  %v2347_v31 = vrot.slane %v2264_v7, 6  ;;  %v2351_v30 = vrot.slane %v2264_v7, 7 }
 0x4c8   : > { %5788 = vpow2.f32 %v5050_v62  ;;  %v2403_v32 = vadd.f32 %v2343_v50, %v9714_v4  ;;  %v2363_v20 = vrot.slane %v2264_v7, 3 }
 0x4c9   : > { %5790 = vpow2.f32 %v5053_v19  ;;  %v2355_v19 = vrot.slane %v2264_v7, 1 }
 0x4ca   : > { %5792 = vpow2.f32 %v5056_v53  ;;  %v2359_v53 = vrot.slane %v2264_v7, 2  ;;  %v5043_v8 = vmul.f32 -1.442695, %v2403_v32 }
 0x4cb   : > { %v5769_v36 = vpop.eup %5768  ;;  %5794 = vpow2.f32 %v5059_v39 }
 0x4cc   : > { %v5771_v23 = vpop.eup %5770  ;;  %v2515_v45 = vadd.f32 1.0, %v5769_v36  ;;  %5796 = vpow2.f32 %v5062_v24  ;;  %v2411_v24 = vadd.f32 %v2351_v30, %v9716_v48  ;;  %v9781_v30 = vld [vmem:[#allocation36_spill] sm:$0xff] }
 0x4cd   : > { %v5773_v25 = vpop.eup %5772  ;;  %v2506_v43 = vadd.f32 1.0, %v5771_v23  ;;  %5798 = vpow2.f32 %v5065_v41  ;;  %v2407_v23 = vadd.f32 %v2347_v31, %v9715_v13  ;;  %v2415_v41 = vadd.f32 %v2264_v7, %v9717_v44 }
 0x4ce   : > { %v5775_v26 = vpop.eup %5774  ;;  %v2509_v1 = vadd.f32 1.0, %v5773_v25  ;;  %5800 = vrcp.f32 %v2515_v45  ;;  %v9779_v45 = vld [vmem:[#allocation34_spill] sm:$0xff] }
 0x4cf   : > { %v5777_v15 = vpop.eup %5776  ;;  %v2512_v37 = vadd.f32 1.0, %v5775_v26  ;;  %5802 = vrcp.f32 %v2506_v43  ;;  %v2367_v26 = vrot.slane %v2264_v7, 4  ;;  %v9780_v43 = vld [vmem:[#allocation35_spill] sm:$0xff]  ;;  %v5046_v31 = vmul.f32 -1.442695, %v2407_v23  ;;  %v9782_v7 = vld [vmem:[#allocation37_spill] sm:$0xff] }
 0x4d0   : > { %v5779_v22 = vpop.eup %5778  ;;  %v2518_v11 = vadd.f32 1.0, %v5777_v15  ;;  %5804 = vrcp.f32 %v2509_v1  ;;  %v2419_v15 = vadd.f32 %v2355_v19, %v9779_v45  ;;  %v5052_v19 = vmul.f32 -1.442695, %v2415_v41  ;;  %v9783_v41 = vld [vmem:[#allocation38_spill] sm:$0xff] }
 0x4d1   : > { %v5781_v16 = vpop.eup %5780  ;;  %v2521_v36 = vadd.f32 1.0, %v5779_v22  ;;  %5806 = vrcp.f32 %v2512_v37  ;;  %v2423_v22 = vadd.f32 %v2359_v53, %v9780_v43  ;;  %v5049_v37 = vmul.f32 -1.442695, %v2411_v24 }
 0x4d2   : > { %v5783_v62 = vpop.eup %5782  ;;  %v2524_v39 = vadd.f32 1.0, %v5781_v16  ;;  %5808 = vrcp.f32 %v2518_v11  ;;  %v2335_v16 = vpop.f32.mrf.mxu1  ;;  %v2431_v11 = vadd.f32 %v2367_v26, %v9782_v7 }
 0x4d3   : > { %v2527_v25 = vadd.f32 1.0, %v5783_v62  ;;  %v8330_v50 = vpop.eup %5784  ;;  %5810 = vrcp.f32 %v2521_v36  ;;  %v2427_v62 = vadd.f32 %v2363_v20, %v9781_v30  ;;  %v5055_v36 = vmul.f32 -1.442695, %v2419_v15 }
 0x4d4   : > { %v8333_v1 = vpop.eup %5786  ;;  %5812 = vrcp.f32 %v2524_v39  ;;  %v2345_v45 = vrot.slane %v2335_v16, 5  ;;  %v5058_v23 = vmul.f32 -1.442695, %v2423_v22  ;;  %v2349_v43 = vrot.slane %v2335_v16, 6 }
 0x4d5   : > { %v8336_v48 = vpop.eup %5788  ;;  %5814 = vrcp.f32 %v2527_v25  ;;  %v5061_v20 = vmul.f32 -1.442695, %v2427_v62  ;;  %v2353_v24 = vrot.slane %v2335_v16, 7  ;;  %v5064_v25 = vmul.f32 -1.442695, %v2431_v11 }
 0x4d6   : > { %v8339_v32 = vpop.eup %5790  ;;  %5816 = vpow2.f32 %v5043_v8  ;;  %v2357_v8 = vrot.slane %v2335_v16, 1  ;;  %v2405_v15 = vadd.f32 %v2345_v45, %v9783_v41  ;;  %v2361_v22 = vrot.slane %v2335_v16, 2  ;;  %v9787_v45 = vld [vmem:[#allocation42_spill] sm:$0xff] }
 0x4d7   : > { %v8341_v53 = vpop.eup %5792  ;;  %5818 = vpow2.f32 %v5046_v31  ;;  %v9784_v31 = vld [vmem:[#allocation39_spill] sm:$0xff]  ;;  %v2365_v62 = vrot.slane %v2335_v16, 3  ;;  %v2369_v11 = vrot.slane %v2335_v16, 4 }
 0x4d8   : > { %v8343_v39 = vpop.eup %5794  ;;  %5820 = vpow2.f32 %v5049_v37  ;;  %v2409_v44 = vadd.f32 %v2349_v43, %v9784_v31  ;;  %v9785_v37 = vld [vmem:[#allocation40_spill] sm:$0xff]  ;;  %v2421_v41 = vadd.f32 %v2357_v8, %v9787_v45  ;;  %v9788_v43 = vld [vmem:[#allocation43_spill] sm:$0xff] }
 0x4d9   : > { %v8345_v30 = vpop.eup %5796  ;;  %5822 = vpow2.f32 %v5052_v19  ;;  %v2413_v4 = vadd.f32 %v2353_v24, %v9785_v37  ;;  %v2425_v31 = vadd.f32 %v2361_v22, %v9788_v43  ;;  %v2429_v24 = vadd.f32 %v2365_v62, %v9789_v61 }
 0x4da   : > { %v8347_v26 = vpop.eup %5798  ;;  %5824 = vpow2.f32 %v5055_v36  ;;  %v9786_v36 = vld [vmem:[#allocation41_spill] sm:$0xff] }
 0x4db   : > { %v8350_v7 = vpop.eup %5800  ;;  %5826 = vpow2.f32 %v5058_v23  ;;  %v2417_v47 = vadd.f32 %v2335_v16, %v9786_v36 }
 0x4dc   : > { %v8353_v13 = vpop.eup %5802  ;;  %5828 = vpow2.f32 %v5061_v20 }
 0x4dd   : > { %v8356_v19 = vpop.eup %5804  ;;  %5830 = vpow2.f32 %v5064_v25  ;;  %v9790_v25 = vld [vmem:[#allocation45_spill] sm:$0xff] }
 0x4de   : > { %v8359_v51 = vpop.eup %5806  ;;  %5832 = vtanh.f32 %v2405_v15  ;;  %v2433_v52 = vadd.f32 %v2369_v11, %v9790_v25 }
 0x4df   : > { %v8362_v23 = vpop.eup %5808  ;;  %5834 = vtanh.f32 %v2409_v44 }
 0x4e0   : > { %v8365_v20 = vpop.eup %5810  ;;  %5836 = vtanh.f32 %v2413_v4 }
 0x4e1   : > { %v8368_v37 = vpop.eup %5812  ;;  %5838 = vtanh.f32 %v2417_v47 }
 0x4e2   : > { %v8371_v16 = vpop.eup %5814  ;;  %5840 = vtanh.f32 %v2421_v41 }
 0x4e3   : > { %v5817_v8 = vpop.eup %5816  ;;  %5842 = vtanh.f32 %v2425_v31 }
 0x4e4   : > { %v5819_v15 = vpop.eup %5818  ;;  %v2507_v45 = vadd.f32 1.0, %v5817_v8  ;;  %5844 = vtanh.f32 %v2429_v24 }
 0x4e5   : > { %v5821_v22 = vpop.eup %5820  ;;  %v2510_v44 = vadd.f32 1.0, %v5819_v15  ;;  %5846 = vtanh.f32 %v2433_v52  ;;  %v2508_v52 = vadd.f32 1.0, %v8330_v50  ;;  %v2595_v50 = vrot.slane %v8079_v38, 7 }
 0x4e6   : > { %v5823_v43 = vpop.eup %5822  ;;  %v2513_v36 = vadd.f32 1.0, %v5821_v22  ;;  %5848 = vrcp.f32 %v2507_v45 }
 0x4e7   : > { %v5825_v4 = vpop.eup %5824  ;;  %v2516_v62 = vadd.f32 1.0, %v5823_v43  ;;  %5850 = vrcp.f32 %v2510_v44  ;;  %v2511_v43 = vadd.f32 1.0, %v8333_v1 }
 0x4e8   : > { %v5827_v61 = vpop.eup %5826  ;;  %v2519_v11 = vadd.f32 1.0, %v5825_v4  ;;  %5852 = vrcp.f32 %v2513_v36  ;;  %v2514_v36 = vadd.f32 1.0, %v8336_v48  ;;  %v2597_v48 = vrot.slane %v8086_v56, 7 }
 0x4e9   : > { %v5829_v47 = vpop.eup %5828  ;;  %v2522_v25 = vadd.f32 1.0, %v5827_v61  ;;  %5854 = vrcp.f32 %v2516_v62  ;;  %v2517_v61 = vadd.f32 1.0, %v8339_v32  ;;  %v2520_v62 = vadd.f32 1.0, %v8341_v53 }
 0x4ea   : > { %v5831_v41 = vpop.eup %5830  ;;  %v2525_v31 = vadd.f32 1.0, %v5829_v47  ;;  %5856 = vrcp.f32 %v2519_v11  ;;  %v2523_v47 = vadd.f32 1.0, %v8343_v39  ;;  %v2526_v32 = vadd.f32 1.0, %v8345_v30 }
 0x4eb   : > { %v5833_v8 = vpop.eup %5832  ;;  %v2528_v24 = vadd.f32 1.0, %v5831_v41  ;;  %5858 = vrcp.f32 %v2522_v25  ;;  %v2594_v25 = vrot.slane %v8076_v29, 7  ;;  %v2596_v41 = vrot.slane %v8082_v55, 7 }
 0x4ec   : > { %v5835_v15 = vpop.eup %5834  ;;  %5860 = vrcp.f32 %v2525_v31  ;;  %v2598_v53 = vrot.slane %v8090_v35, 7  ;;  %v2529_v29 = vadd.f32 1.0, %v8347_v26  ;;  %v2600_v39 = vrot.slane %v8097_v63, 7 }
 0x4ed   : > { %v5837_v45 = vpop.eup %5836  ;;  %5862 = vrcp.f32 %v2528_v24  ;;  %v2599_v24 = vrot.slane %v8094_v40, 7  ;;  %v2601_v56 = vrot.slane %v8100_v33, 7  ;;  %v2619_v30 = vmul.f32 %v5835_v15, %v8356_v19 }
 0x4ee   : > { %v5839_v22 = vpop.eup %5838  ;;  %5864 = vrcp.f32 %v2508_v52  ;;  %v2618_v52 = vmul.f32 %v5833_v8, %v8353_v13  ;;  %v2620_v40 = vmul.f32 %v5837_v45, %v8359_v51 }
 0x4ef   : > { %v5841_v44 = vpop.eup %5840  ;;  %5866 = vrcp.f32 %v2511_v43  ;;  %v2621_v63 = vmul.f32 %v5839_v22, %v8350_v7 }
 0x4f0   : > { %v5843_v4 = vpop.eup %5842  ;;  %5868 = vrcp.f32 %v2514_v36 }
 0x4f1   : > { %v5845_v11 = vpop.eup %5844  ;;  %5870 = vrcp.f32 %v2517_v61  ;;  %v2623_v45 = vmul.f32 %v5843_v4, %v8365_v20 }
 0x4f2   : > { %v5847_v1 = vpop.eup %5846  ;;  %5872 = vrcp.f32 %v2520_v62 }
 0x4f3   : > { %v5849_v31 = vpop.eup %5848  ;;  %5874 = vrcp.f32 %v2523_v47  ;;  %v2624_v47 = vmul.f32 %v5845_v11, %v8368_v37 }
 0x4f4   : > { %v5851_v38 = vpop.eup %5850  ;;  %v2610_v55 = vmul.f32 %v5849_v31, %v2594_v25  ;;  %5876 = vrcp.f32 %v2526_v32  ;;  %v2622_v25 = vmul.f32 %v5841_v44, %v8362_v23  ;;  %v2625_v23 = vmul.f32 %v5847_v1, %v8371_v16 }
 0x4f5   : > { %v5853_v43 = vpop.eup %5852  ;;  %v2611_v36 = vmul.f32 %v5851_v38, %v2595_v50  ;;  %5878 = vrcp.f32 %v2529_v29 }
 0x4f6   : > { %v5855_v35 = vpop.eup %5854  ;;  %v2612_v61 = vmul.f32 %v5853_v43, %v2596_v41  ;;  %v8392_v26 = vadd.f32 %v2618_v52, %v2610_v55 }
 0x4f7   : > { %v5857_v42 = vpop.eup %5856  ;;  %v2613_v13 = vmul.f32 %v5855_v35, %v2597_v48  ;;  %v8395_v8 = vadd.f32 %v2619_v30, %v2611_v36 }
 0x4f8   : > { %v5859_v62 = vpop.eup %5858  ;;  %v2614_v33 = vmul.f32 %v5857_v42, %v2598_v53  ;;  %v8398_v19 = vadd.f32 %v2620_v40, %v2612_v61  ;;  %5880 = vtanh.f32 %v8392_v26 }
 0x4f9   : > { %v5861_v51 = vpop.eup %5860  ;;  %v2615_v15 = vmul.f32 %v5859_v62, %v2599_v24  ;;  %v8402_v50 = vadd.f32 %v2621_v63, %v2613_v13  ;;  %5882 = vtanh.f32 %v8395_v8 }
 0x4fa   : > { %v5863_v7 = vpop.eup %5862  ;;  %v2616_v22 = vmul.f32 %v5861_v51, %v2600_v39  ;;  %v8406_v41 = vadd.f32 %v2622_v25, %v2614_v33  ;;  %5884 = vtanh.f32 %v8398_v19 }
 0x4fb   : > { %v2617_v42 = vmul.f32 %v5863_v7, %v2601_v56  ;;  %v8410_v44 = vadd.f32 %v2623_v45, %v2615_v15  ;;  %5886 = vtanh.f32 %v8402_v50  ;;  %v5865_v4 = vpop.eup %5864 }
 0x4fc   : > { %v8413_v20 = vadd.f32 %v2624_v47, %v2616_v22  ;;  %5888 = vtanh.f32 %v8406_v41  ;;  %v5867_v37 = vpop.eup %5866 }
 0x4fd   : > { %v8416_v48 = vadd.f32 %v2625_v23, %v2617_v42  ;;  %5890 = vtanh.f32 %v8410_v44  ;;  %v5869_v11 = vpop.eup %5868 }
 0x4fe   : > { %5892 = vtanh.f32 %v8413_v20  ;;  %v5871_v16 = vpop.eup %5870 }
 0x4ff   : > { %5894 = vtanh.f32 %v8416_v48  ;;  %v5873_v1 = vpop.eup %5872 }
 0x500   : > { %v5875_v32 = vpop.eup %5874 }
 0x501   : > { %v5877_v31 = vpop.eup %5876 }
 0x502   : > { %v5879_v53 = vpop.eup %5878 }
 0x505   : > { %v5881_v24 = vpop.eup %5880 }
 0x506   : > { %v5883_v29 = vpop.eup %5882  ;;  %v2642_v38 = vmul.f32 %v5881_v24, %v5865_v4  ;;  %v9810_v24 = vld [vmem:[#allocation65_spill] sm:$0xff] }
 0x507   : > { %v5885_v39 = vpop.eup %5884  ;;  %v2643_v52 = vmul.f32 %v5883_v29, %v5867_v37  ;;  %v9811_v29 = vld [vmem:[#allocation66_spill] sm:$0xff] }
 0x508   : > { %v5887_v55 = vpop.eup %5886  ;;  %v2644_v43 = vmul.f32 %v5885_v39, %v5869_v11  ;;  %v2658_v56 = vrot.slane %v2642_v38, 3  ;;  %v9812_v38 = vld [vmem:[#allocation67_spill] sm:$0xff]  ;;  %v9813_v39 = vld [vmem:[#allocation68_spill] sm:$0xff] }
 0x509   : > { %v5889_v30 = vpop.eup %5888  ;;  %v2659_v36 = vrot.slane %v2643_v52, 2  ;;  %v2645_v13 = vmul.f32 %v5887_v55, %v5871_v16  ;;  %v9814_v52 = vld [vmem:[#allocation69_spill] sm:$0xff]  ;;  %v9815_v55 = vld [vmem:[#allocation70_spill] sm:$0xff] }
 0x50a   : > { %v5891_v35 = vpop.eup %5890  ;;  %v2646_v40 = vmul.f32 %v5889_v30, %v5873_v1  ;;  %v2661_v61 = vrot.slane %v2644_v43, 1  ;;  %v9816_v43 = vld [vmem:[#allocation71_spill] sm:$0xff]  ;;  %v9818_v30 = vld [vmem:[#allocation73_spill] sm:$0xff] }
 0x50b   : > { %v5893_v63 = vpop.eup %5892  ;;  %v2647_v62 = vmul.f32 %v5891_v35, %v5875_v32  ;;  %v2660_v33 = vsel %vm1218_vm1, %v2659_v36, %v2658_v56  ;;  %v9807_v32 = vld [vmem:[#allocation62_spill] sm:$0xff]  ;;  %v9817_v56 = vld [vmem:[#allocation72_spill] sm:$0xff]  ;;  %v9820_v35 = vld [vmem:[#allocation75_spill] sm:$0xff] }
 0x50c   : > { %v5895_v25 = vpop.eup %5894  ;;  %v2648_v51 = vmul.f32 %v5893_v63, %v5877_v31  ;;  %v2662_v15 = vsel %vm1221_vm2, %v2661_v61, %v2660_v33  ;;  %v2664_v45 = vrot.slane %v2646_v40, 7  ;;  %v9808_v31 = vld [vmem:[#allocation63_spill] sm:$0xff]  ;;  %v9819_v36 = vld [vmem:[#allocation74_spill] sm:$0xff]  ;;  %v9821_v40 = vld [vmem:[#allocation76_spill] sm:$0xff] }
 0x50d   : > { %v2649_v7 = vmul.f32 %v5895_v25, %v5879_v53  ;;  %v2663_v22 = vsel %vm1224_vm3, %v2645_v13, %v2662_v15  ;;  %v2666_v47 = vrot.slane %v2647_v62, 6  ;;  %v9809_v53 = vld [vmem:[#allocation64_spill] sm:$0xff]  ;;  %v9822_v61 = vld [vmem:[#allocation77_spill] sm:$0xff]  ;;  %v9823_v63 = vld [vmem:[#allocation78_spill] sm:$0xff] }
 0x50e   : > { %v2665_v42 = vsel %vm1227_vm4, %v2664_v45, %v2663_v22  ;;  %v2668_v23 = vrot.slane %v2648_v51, 5  ;;  %v9824_v13 = vld [vmem:[#allocation79_spill] sm:$0xff]  ;;  %v9825_v62 = vld [vmem:[#allocation80_spill] sm:$0xff]  ;;  %v9826_v33 = vld [vmem:[#allocation81_spill] sm:$0xff] }
 0x50f   : > { %v2667_v4 = vsel %vm1230_vm5, %v2666_v47, %v2665_v42  ;;  %v2670_v37 = vrot.slane %v2649_v7, 4  ;;  %v9827_v25 = vld [vmem:[#allocation82_spill] sm:$0xff]  ;;  %v9828_v51 = vld [vmem:[#allocation83_spill] sm:$0xff]  ;;  %v9829_v15 = vld [vmem:[#allocation84_spill] sm:$0xff] }
 0x510   : > { %v2669_v11 = vsel %vm1233_vm6, %v2668_v23, %v2667_v4  ;;  %v9830_v45 = vld [vmem:[#allocation85_spill] sm:$0xff]  ;;  %v9831_v7 = vld [vmem:[#allocation86_spill] sm:$0xff]  ;;  %v9832_v22 = vld [vmem:[#allocation87_spill] sm:$0xff] }
 0x511   : > { %v2671_v16 = vsel %vm1236_vm7, %v2670_v37, %v2669_v11  ;;  %v9833_v47 = vld [vmem:[#allocation88_spill] sm:$0xff]  ;;  %v9834_v42 = vld [vmem:[#allocation89_spill] sm:$0xff]  ;;  %v9835_v23 = vld [vmem:[#allocation90_spill] sm:$0xff]  ;;  %v9837_v37 = vmov 0.0  }
 0x512   : > { %v8429_v1 = vadd.f32 %v2671_v16, %v8113_v18  ;;  %2739 = vmatmul.mubr.f32.vlgmr.msra.gmra.mxu0 %v2671_v16  ;;  %2810 = vmatmul.mubr.f32.vlgmr.msra.gmra.mxu1 %v2671_v16  ;;  %v9791_v18 = vld [vmem:[#allocation46_spill] sm:$0xff]  ;;  %v9836_v4 = vld [vmem:[#allocation91_spill] sm:$0xff]  ;;  %v9838_v11 = vld [vmem:[#allocation92_spill] sm:$0xff] }
 0x513   : > { %3153 = vmatpush1.msra.mxu0 %v8115_v10  ;;  %3224 = vmatpush1.msra.mxu1 %v8118_v21  ;;  %v9792_v10 = vld [vmem:[#allocation47_spill] sm:$0xff]  ;;  %v9793_v21 = vld [vmem:[#allocation48_spill] sm:$0xff]  ;;  %v9839_v16 = vld [vmem:[#allocation93_spill] sm:$0xff] }
 0x514   : > { %3154 = vmatprep.subr.mxu0 %v8121_v49  ;;  %3225 = vmatprep.subr.mxu1 %v8124_v27  ;;  %v9794_v49 = vld [vmem:[#allocation49_spill] sm:$0xff]  ;;  %v9795_v27 = vld [vmem:[#allocation50_spill] sm:$0xff] }
 0x515   : > { %3155 = vmatpush1.msra.mxu0 %v8127_v12  ;;  %3226 = vmatpush1.msra.mxu1 %v8130_v46  ;;  %v9796_v12 = vld [vmem:[#allocation51_spill] sm:$0xff]  ;;  %v9797_v46 = vld [vmem:[#allocation52_spill] sm:$0xff] }
 0x516   : > { %3156 = vmatprep.subr.mxu0 %v8133_v57  ;;  %3227 = vmatprep.subr.mxu1 %v8136_v6  ;;  %v9798_v57 = vld [vmem:[#allocation53_spill] sm:$0xff]  ;;  %v9799_v6 = vld [vmem:[#allocation54_spill] sm:$0xff] }
 0x517   : > { %3157 = vmatpush1.msra.mxu0 %v8139_v59  ;;  %3228 = vmatpush1.msra.mxu1 %v8142_v3  ;;  %v9800_v59 = vld [vmem:[#allocation55_spill] sm:$0xff]  ;;  %v9801_v3 = vld [vmem:[#allocation56_spill] sm:$0xff] }
 0x518   : > { %3158 = vmatprep.subr.mxu0 %v8145_v58  ;;  %3229 = vmatprep.subr.mxu1 %v8148_v14  ;;  %v9802_v58 = vld [vmem:[#allocation57_spill] sm:$0xff]  ;;  %v9803_v14 = vld [vmem:[#allocation58_spill] sm:$0xff] }
 0x519   : > { %3159 = vmatpush1.msra.mxu0 %v8151_v5  ;;  %3230 = vmatpush1.msra.mxu1 %v8154_v28  ;;  %v9804_v5 = vld [vmem:[#allocation59_spill] sm:$0xff]  ;;  %v9805_v28 = vld [vmem:[#allocation60_spill] sm:$0xff] }
 0x51a   : > { %3160 = vmatprep.subr.mxu0 %v8157_v34  ;;  %3231 = vmatprep.subr.mxu1 %v9791_v18  ;;  %v9806_v34 = vld [vmem:[#allocation61_spill] sm:$0xff]  ;;  %v9840_v18 = vld [vmem:[#allocation94_spill] sm:$0xff] }
 0x51b   : > { %3161 = vmatpush1.msra.mxu0 %v9792_v10  ;;  %3232 = vmatpush1.msra.mxu1 %v9793_v21 }
 0x51c   : > { %3162 = vmatprep.subr.mxu0 %v9794_v49  ;;  %3233 = vmatprep.subr.mxu1 %v9795_v27 }
 0x51d   : > { %3163 = vmatpush1.msra.mxu0 %v9796_v12  ;;  %3234 = vmatpush1.msra.mxu1 %v9797_v46 }
 0x51e   : > { %3164 = vmatprep.subr.mxu0 %v9798_v57  ;;  %3235 = vmatprep.subr.mxu1 %v9799_v6 }
 0x51f   : > { %3165 = vmatpush1.msra.mxu0 %v9800_v59  ;;  %3236 = vmatpush1.msra.mxu1 %v9801_v3 }
 0x520   : > { %3166 = vmatprep.subr.mxu0 %v9802_v58  ;;  %3237 = vmatprep.subr.mxu1 %v9803_v14  ;;  %v9841_v58 = vld [vmem:[#allocation19_spill] sm:$0xff] }
 0x521   : > { %3167 = vmatpush1.msra.mxu0 %v9804_v5  ;;  %3238 = vmatpush1.msra.mxu1 %v9805_v28  ;;  %v9842_v28 = vld [vmem:[#allocation20_spill] sm:$0xff] }
 0x522   : > { %3168 = vmatprep.subr.mxu0 %v9806_v34  ;;  %3239 = vmatprep.subr.mxu1 %v9807_v32 }
 0x523   : > { %3169 = vmatpush1.msra.mxu0 %v9808_v31  ;;  %3240 = vmatpush1.msra.mxu1 %v9809_v53 }
 0x524   : > { %3170 = vmatprep.subr.mxu0 %v9810_v24  ;;  %3241 = vmatprep.subr.mxu1 %v9811_v29 }
 0x525   : > { %3171 = vmatpush1.msra.mxu0 %v9812_v38  ;;  %3242 = vmatpush1.msra.mxu1 %v9813_v39 }
 0x526   : > { %3172 = vmatprep.subr.mxu0 %v9814_v52  ;;  %3243 = vmatprep.subr.mxu1 %v9815_v55 }
 0x527   : > { %3173 = vmatpush1.msra.mxu0 %v9816_v43  ;;  %3244 = vmatpush1.msra.mxu1 %v9817_v56 }
 0x528   : > { %3174 = vmatprep.subr.mxu0 %v9818_v30  ;;  %3245 = vmatprep.subr.mxu1 %v9819_v36 }
 0x529   : > { %3175 = vmatpush1.msra.mxu0 %v9820_v35  ;;  %3246 = vmatpush1.msra.mxu1 %v9821_v40 }
 0x52a   : > { %3176 = vmatprep.subr.mxu0 %v9822_v61  ;;  %3247 = vmatprep.subr.mxu1 %v9823_v63  ;;  %v9843_v63 = vld [vmem:[#allocation22_spill] sm:$0xff] }
 0x52b   : > { %3177 = vmatpush1.msra.mxu0 %v9824_v13  ;;  %3248 = vmatpush1.msra.mxu1 %v9825_v62 }
 0x52c   : > { %3178 = vmatprep.subr.mxu0 %v9826_v33  ;;  %3249 = vmatprep.subr.mxu1 %v9827_v25  ;;  %v9844_v33 = vld [vmem:[#allocation23_spill] sm:$0xff] }
 0x52d   : > { %3179 = vmatpush1.msra.mxu0 %v9828_v51  ;;  %3250 = vmatpush1.msra.mxu1 %v9829_v15  ;;  %v9845_v15 = vld [vmem:[#allocation24_spill] sm:$0xff] }
 0x52e   : > { %3180 = vmatprep.subr.mxu0 %v9830_v45  ;;  %3251 = vmatprep.subr.mxu1 %v9831_v7 }
 0x52f   : > { %3181 = vmatpush1.msra.mxu0 %v9832_v22  ;;  %3252 = vmatpush1.msra.mxu1 %v9833_v47  ;;  %v9846_v22 = vld [vmem:[#allocation25_spill] sm:$0xff] }
 0x530   : > { %3182 = vmatprep.subr.mxu0 %v9834_v42  ;;  %3253 = vmatprep.subr.mxu1 %v9835_v23  ;;  %v9847_v42 = vld [vmem:[#allocation26_spill] sm:$0xff] }
 0x531   : > { %3183 = vmatpush1.msra.mxu0 %v9836_v4  ;;  %3216 = vmatprep.mubr.f32.mxu0 %v9837_v37 }
 0x532   : > { %3254 = vmatpush1.msra.mxu1 %v9838_v11  ;;  %3287 = vmatprep.mubr.f32.mxu1 %v9837_v37  ;;  %v9848_v11 = vld [vmem:[#allocation27_spill] sm:$0xff] }
 0x533   : > { %3630 = vmatprep.subr.mxu0 %v9839_v16  ;;  %3701 = vmatprep.subr.mxu1 %v9840_v18 }
 0x5d2   : > { %v2740_v10 = vpop.f32.mrf.mxu0  ;;  %v2811_v24 = vpop.f32.mrf.mxu1 }
 0x5d3   : > { %v2820_v21 = vrot.slane %v2740_v10, 4  ;;  %v2824_v49 = vrot.slane %v2740_v10, 5  ;;  %v2828_v27 = vrot.slane %v2740_v10, 6  ;;  %v2832_v12 = vrot.slane %v2740_v10, 7 }
 0x5d4   : > { %v2836_v46 = vrot.slane %v2740_v10, 1  ;;  %v2840_v57 = vrot.slane %v2740_v10, 2  ;;  %v2896_v6 = vadd.f32 %v2740_v10, %v7400_v2  ;;  %v2844_v59 = vrot.slane %v2740_v10, 3  ;;  %v9849_v10 = vld [vmem:[#allocation28_spill] sm:$0xff] }
 0x5d5   : > { %v2880_v3 = vadd.f32 %v2820_v21, %v7391_v60  ;;  %v2884_v14 = vadd.f32 %v2824_v49, %v9841_v58  ;;  %v2888_v5 = vadd.f32 %v2828_v27, %v7396_v0  ;;  %v2892_v34 = vadd.f32 %v2832_v12, %v9842_v28  ;;  %v9850_v27 = vld [vmem:[#allocation29_spill] sm:$0xff] }
 0x5d6   : > { %v5078_v32 = vmul.f32 -1.442695, %v2896_v6  ;;  %v2900_v31 = vadd.f32 %v2836_v46, %v7402_v9  ;;  %v2904_v29 = vadd.f32 %v2840_v57, %v7411_v54  ;;  %v2908_v39 = vadd.f32 %v2844_v59, %v7414_v17 }
 0x5d7   : > { %v5066_v53 = vmul.f32 -1.442695, %v2880_v3  ;;  %v5069_v38 = vmul.f32 -1.442695, %v2884_v14  ;;  %v5072_v52 = vmul.f32 -1.442695, %v2888_v5  ;;  %v2898_v23 = vadd.f32 %v2811_v24, %v9847_v42  ;;  %v2742_v3 = vpop.f32.mrf.mxu0 }
 0x5d8   : > { %v5075_v55 = vmul.f32 -1.442695, %v2892_v34  ;;  %5896 = vpow2.f32 %v5078_v32  ;;  %v2822_v43 = vrot.slane %v2811_v24, 4  ;;  %v5081_v56 = vmul.f32 -1.442695, %v2900_v31 }
 0x5d9   : > { %5898 = vpow2.f32 %v5066_v53  ;;  %v2826_v30 = vrot.slane %v2811_v24, 5  ;;  %v5084_v36 = vmul.f32 -1.442695, %v2904_v29  ;;  %v2830_v35 = vrot.slane %v2811_v24, 6 }
 0x5da   : > { %5900 = vpow2.f32 %v5069_v38  ;;  %v5087_v40 = vmul.f32 -1.442695, %v2908_v39  ;;  %v2834_v61 = vrot.slane %v2811_v24, 7  ;;  %v2882_v13 = vadd.f32 %v2822_v43, %v9843_v63 }
 0x5db   : > { %5902 = vpow2.f32 %v5072_v52  ;;  %v2838_v62 = vrot.slane %v2811_v24, 1  ;;  %v2886_v25 = vadd.f32 %v2826_v30, %v9844_v33  ;;  %v2842_v51 = vrot.slane %v2811_v24, 2 }
 0x5dc   : > { %5904 = vpow2.f32 %v5075_v55  ;;  %v2890_v45 = vadd.f32 %v2830_v35, %v9845_v15  ;;  %v2846_v7 = vrot.slane %v2811_v24, 3  ;;  %v2894_v47 = vadd.f32 %v2834_v61, %v9846_v22  ;;  %v9851_v61 = vld [vmem:[#allocation30_spill] sm:$0xff] }
 0x5dd   : > { %5906 = vpow2.f32 %v5081_v56  ;;  %v5068_v4 = vmul.f32 -1.442695, %v2882_v13  ;;  %v2902_v16 = vadd.f32 %v2838_v62, %v9848_v11  ;;  %v5071_v18 = vmul.f32 -1.442695, %v2886_v25 }
 0x5de   : > { %5908 = vpow2.f32 %v5084_v36  ;;  %v2906_v21 = vadd.f32 %v2842_v51, %v9849_v10  ;;  %v5074_v49 = vmul.f32 -1.442695, %v2890_v45  ;;  %v2910_v12 = vadd.f32 %v2846_v7, %v9850_v27  ;;  %v9852_v51 = vld [vmem:[#allocation31_spill] sm:$0xff] }
 0x5df   : > { %5910 = vpow2.f32 %v5087_v40  ;;  %v5077_v46 = vmul.f32 -1.442695, %v2894_v47  ;;  %v5080_v57 = vmul.f32 -1.442695, %v2898_v23  ;;  %v5083_v59 = vmul.f32 -1.442695, %v2902_v16 }
 0x5e0   : > { %5912 = vpow2.f32 %v5068_v4  ;;  %v5086_v5 = vmul.f32 -1.442695, %v2906_v21  ;;  %v5089_v32 = vmul.f32 -1.442695, %v2910_v12  ;;  %v2821_v24 = vrot.slane %v2742_v3, 4  ;;  %v9853_v23 = vld [vmem:[#allocation32_spill] sm:$0xff] }
 0x5e1   : > { %5914 = vpow2.f32 %v5071_v18  ;;  %v2825_v39 = vrot.slane %v2742_v3, 5  ;;  %v2829_v43 = vrot.slane %v2742_v3, 6  ;;  %v2833_v36 = vrot.slane %v2742_v3, 7  ;;  %v9854_v21 = vld [vmem:[#allocation33_spill] sm:$0xff]  ;;  %v9855_v12 = vld [vmem:[#allocation34_spill] sm:$0xff] }
 0x5e2   : > { %5916 = vpow2.f32 %v5074_v49  ;;  %v2881_v13 = vadd.f32 %v2821_v24, %v9851_v61  ;;  %v2837_v25 = vrot.slane %v2742_v3, 1  ;;  %v2841_v47 = vrot.slane %v2742_v3, 2 }
 0x5e3   : > { %5918 = vpow2.f32 %v5077_v46  ;;  %v2885_v45 = vadd.f32 %v2825_v39, %v9852_v51  ;;  %v2889_v4 = vadd.f32 %v2829_v43, %v9853_v23  ;;  %v2845_v18 = vrot.slane %v2742_v3, 3 }
 0x5e4   : > { %5920 = vpow2.f32 %v5080_v57  ;;  %v2893_v49 = vadd.f32 %v2833_v36, %v9854_v21  ;;  %v2897_v46 = vadd.f32 %v2742_v3, %v9855_v12  ;;  %v5067_v57 = vmul.f32 -1.442695, %v2881_v13 }
 0x5e5   : > { %v5897_v6 = vpop.eup %5896  ;;  %5922 = vpow2.f32 %v5083_v59  ;;  %v9856_v59 = vld [vmem:[#allocation35_spill] sm:$0xff]  ;;  %v5073_v24 = vmul.f32 -1.442695, %v2889_v4 }
 0x5e6   : > { %v5899_v14 = vpop.eup %5898  ;;  %v2996_v53 = vadd.f32 1.0, %v5897_v6  ;;  %5924 = vpow2.f32 %v5086_v5  ;;  %v5070_v5 = vmul.f32 -1.442695, %v2885_v45  ;;  %v5076_v3 = vmul.f32 -1.442695, %v2893_v49  ;;  %v9860_v49 = vld [vmem:[#allocation39_spill] sm:$0xff] }
 0x5e7   : > { %v5901_v34 = vpop.eup %5900  ;;  %v2984_v38 = vadd.f32 1.0, %v5899_v14  ;;  %5926 = vpow2.f32 %v5089_v32  ;;  %v2901_v14 = vadd.f32 %v2837_v25, %v9856_v59 }
 0x5e8   : > { %v5903_v31 = vpop.eup %5902  ;;  %v2987_v55 = vadd.f32 1.0, %v5901_v34  ;;  %5928 = vrcp.f32 %v2996_v53  ;;  %v2813_v34 = vpop.f32.mrf.mxu1 }
 0x5e9   : > { %v5905_v29 = vpop.eup %5904  ;;  %v2990_v30 = vadd.f32 1.0, %v5903_v31  ;;  %5930 = vrcp.f32 %v2984_v38  ;;  %v9857_v31 = vld [vmem:[#allocation36_spill] sm:$0xff]  ;;  %v9858_v38 = vld [vmem:[#allocation37_spill] sm:$0xff]  ;;  %v2823_v43 = vrot.slane %v2813_v34, 4  ;;  %v2827_v36 = vrot.slane %v2813_v34, 5 }
 0x5ea   : > { %v5907_v52 = vpop.eup %5906  ;;  %v2993_v40 = vadd.f32 1.0, %v5905_v29  ;;  %5932 = vrcp.f32 %v2987_v55  ;;  %v2905_v53 = vadd.f32 %v2841_v47, %v9857_v31  ;;  %v2909_v39 = vadd.f32 %v2845_v18, %v9858_v38  ;;  %v9859_v47 = vld [vmem:[#allocation38_spill] sm:$0xff]  ;;  %v9865_v31 = vld [vmem:[#allocation44_spill] sm:$0xff] }
 0x5eb   : > { %v5909_v56 = vpop.eup %5908  ;;  %v2999_v62 = vadd.f32 1.0, %v5907_v52  ;;  %5934 = vrcp.f32 %v2990_v30  ;;  %v5079_v55 = vmul.f32 -1.442695, %v2897_v46  ;;  %v5082_v30 = vmul.f32 -1.442695, %v2901_v14 }
 0x5ec   : > { %v5911_v35 = vpop.eup %5910  ;;  %v3002_v7 = vadd.f32 1.0, %v5909_v56  ;;  %5936 = vrcp.f32 %v2993_v40  ;;  %v5085_v40 = vmul.f32 -1.442695, %v2905_v53  ;;  %v2831_v13 = vrot.slane %v2813_v34, 6 }
 0x5ed   : > { %v3005_v16 = vadd.f32 1.0, %v5911_v35  ;;  %v8518_v6 = vpop.eup %5912  ;;  %5938 = vrcp.f32 %v2999_v62  ;;  %v5088_v25 = vmul.f32 -1.442695, %v2909_v39  ;;  %v2835_v45 = vrot.slane %v2813_v34, 7 }
 0x5ee   : > { %v8521_v32 = vpop.eup %5914  ;;  %5940 = vrcp.f32 %v3002_v7  ;;  %v2883_v4 = vadd.f32 %v2823_v43, %v9859_v47  ;;  %v2839_v18 = vrot.slane %v2813_v34, 1  ;;  %v2887_v46 = vadd.f32 %v2827_v36, %v9860_v49  ;;  %v9863_v43 = vld [vmem:[#allocation42_spill] sm:$0xff]  ;;  %v9864_v36 = vld [vmem:[#allocation43_spill] sm:$0xff] }
 0x5ef   : > { %v8524_v29 = vpop.eup %5916  ;;  %5942 = vrcp.f32 %v3005_v16  ;;  %v2843_v14 = vrot.slane %v2813_v34, 2  ;;  %v2847_v39 = vrot.slane %v2813_v34, 3  ;;  %v2899_v47 = vadd.f32 %v2813_v34, %v9863_v43 }
 0x5f0   : > { %v8527_v52 = vpop.eup %5918  ;;  %5944 = vpow2.f32 %v5067_v57  ;;  %v2903_v49 = vadd.f32 %v2839_v18, %v9864_v36 }
 0x5f1   : > { %v8529_v56 = vpop.eup %5920  ;;  %5946 = vpow2.f32 %v5070_v5  ;;  %v9861_v5 = vld [vmem:[#allocation40_spill] sm:$0xff] }
 0x5f2   : > { %v8531_v35 = vpop.eup %5922  ;;  %5948 = vpow2.f32 %v5073_v24  ;;  %v2891_v53 = vadd.f32 %v2831_v13, %v9861_v5  ;;  %v2907_v13 = vadd.f32 %v2843_v14, %v9865_v31 }
 0x5f3   : > { %v8533_v62 = vpop.eup %5924  ;;  %5950 = vpow2.f32 %v5076_v3  ;;  %v9862_v3 = vld [vmem:[#allocation41_spill] sm:$0xff] }
 0x5f4   : > { %v8535_v7 = vpop.eup %5926  ;;  %5952 = vpow2.f32 %v5079_v55  ;;  %v2895_v55 = vadd.f32 %v2835_v45, %v9862_v3 }
 0x5f5   : > { %v8538_v16 = vpop.eup %5928  ;;  %5954 = vpow2.f32 %v5082_v30 }
 0x5f6   : > { %v8541_v57 = vpop.eup %5930  ;;  %5956 = vpow2.f32 %v5085_v40 }
 0x5f7   : > { %v8544_v24 = vpop.eup %5932  ;;  %5958 = vpow2.f32 %v5088_v25  ;;  %v9866_v25 = vld [vmem:[#allocation45_spill] sm:$0xff] }
 0x5f8   : > { %v8547_v38 = vpop.eup %5934  ;;  %5960 = vtanh.f32 %v2883_v4  ;;  %v2911_v59 = vadd.f32 %v2847_v39, %v9866_v25 }
 0x5f9   : > { %v8550_v30 = vpop.eup %5936  ;;  %5962 = vtanh.f32 %v2887_v46 }
 0x5fa   : > { %v8553_v40 = vpop.eup %5938  ;;  %5964 = vtanh.f32 %v2891_v53 }
 0x5fb   : > { %v8556_v5 = vpop.eup %5940  ;;  %5966 = vtanh.f32 %v2895_v55 }
 0x5fc   : > { %v8559_v45 = vpop.eup %5942  ;;  %5968 = vtanh.f32 %v2899_v47 }
 0x5fd   : > { %v5945_v34 = vpop.eup %5944  ;;  %5970 = vtanh.f32 %v2903_v49 }
 0x5fe   : > { %v5947_v4 = vpop.eup %5946  ;;  %v2985_v43 = vadd.f32 1.0, %v5945_v34  ;;  %5972 = vtanh.f32 %v2907_v13 }
 0x5ff   : > { %v5949_v18 = vpop.eup %5948  ;;  %v2988_v46 = vadd.f32 1.0, %v5947_v4  ;;  %5974 = vtanh.f32 %v2911_v59  ;;  %v2986_v59 = vadd.f32 1.0, %v8518_v6  ;;  %v3073_v6 = vrot.slane %v8395_v8, 7 }
 0x600   : > { %v5951_v36 = vpop.eup %5950  ;;  %v2991_v3 = vadd.f32 1.0, %v5949_v18  ;;  %5976 = vrcp.f32 %v2985_v43 }
 0x601   : > { %v5953_v14 = vpop.eup %5952  ;;  %v2994_v53 = vadd.f32 1.0, %v5951_v36  ;;  %5978 = vrcp.f32 %v2988_v46  ;;  %v2989_v36 = vadd.f32 1.0, %v8521_v32 }
 0x602   : > { %v5955_v31 = vpop.eup %5954  ;;  %v2997_v39 = vadd.f32 1.0, %v5953_v14  ;;  %5980 = vrcp.f32 %v2991_v3  ;;  %v2992_v3 = vadd.f32 1.0, %v8524_v29  ;;  %v3075_v29 = vrot.slane %v8402_v50, 7 }
 0x603   : > { %v5957_v55 = vpop.eup %5956  ;;  %v3000_v25 = vadd.f32 1.0, %v5955_v31  ;;  %5982 = vrcp.f32 %v2994_v53  ;;  %v2995_v31 = vadd.f32 1.0, %v8527_v52  ;;  %v2998_v53 = vadd.f32 1.0, %v8529_v56 }
 0x604   : > { %v5959_v47 = vpop.eup %5958  ;;  %v3003_v49 = vadd.f32 1.0, %v5957_v55  ;;  %5984 = vrcp.f32 %v2997_v39  ;;  %v3001_v55 = vadd.f32 1.0, %v8531_v35  ;;  %v3004_v52 = vadd.f32 1.0, %v8533_v62 }
 0x605   : > { %v5961_v34 = vpop.eup %5960  ;;  %v3006_v13 = vadd.f32 1.0, %v5959_v47  ;;  %5986 = vrcp.f32 %v3000_v25  ;;  %v3072_v25 = vrot.slane %v8392_v26, 7  ;;  %v3074_v47 = vrot.slane %v8398_v19, 7 }
 0x606   : > { %v5963_v4 = vpop.eup %5962  ;;  %5988 = vrcp.f32 %v3003_v49  ;;  %v3076_v56 = vrot.slane %v8406_v41, 7  ;;  %v3007_v26 = vadd.f32 1.0, %v8535_v7  ;;  %v3078_v35 = vrot.slane %v8413_v20, 7 }
 0x607   : > { %v5965_v43 = vpop.eup %5964  ;;  %5990 = vrcp.f32 %v3006_v13  ;;  %v3077_v13 = vrot.slane %v8410_v44, 7  ;;  %v3079_v50 = vrot.slane %v8416_v48, 7  ;;  %v3097_v62 = vmul.f32 %v5963_v4, %v8544_v24 }
 0x608   : > { %v5967_v18 = vpop.eup %5966  ;;  %5992 = vrcp.f32 %v2986_v59  ;;  %v3096_v59 = vmul.f32 %v5961_v34, %v8541_v57  ;;  %v3098_v44 = vmul.f32 %v5965_v43, %v8547_v38 }
 0x609   : > { %v5969_v46 = vpop.eup %5968  ;;  %5994 = vrcp.f32 %v2989_v36  ;;  %v3099_v57 = vmul.f32 %v5967_v18, %v8550_v30 }
 0x60a   : > { %v5971_v14 = vpop.eup %5970  ;;  %5996 = vrcp.f32 %v2992_v3 }
 0x60b   : > { %v5973_v39 = vpop.eup %5972  ;;  %5998 = vrcp.f32 %v2995_v31  ;;  %v3101_v43 = vmul.f32 %v5971_v14, %v8553_v40 }
 0x60c   : > { %v5975_v32 = vpop.eup %5974  ;;  %6000 = vrcp.f32 %v2998_v53  ;;  %v3102_v18 = vmul.f32 %v5973_v39, %v8556_v5 }
 0x60d   : > { %v5977_v49 = vpop.eup %5976  ;;  %6002 = vrcp.f32 %v3001_v55 }
 0x60e   : > { %v5979_v8 = vpop.eup %5978  ;;  %v3088_v19 = vmul.f32 %v5977_v49, %v3072_v25  ;;  %6004 = vrcp.f32 %v3004_v52  ;;  %v3100_v25 = vmul.f32 %v5969_v46, %v8538_v16  ;;  %v3103_v16 = vmul.f32 %v5975_v32, %v8559_v45 }
 0x60f   : > { %v5981_v36 = vpop.eup %5980  ;;  %v3089_v3 = vmul.f32 %v5979_v8, %v3073_v6  ;;  %6006 = vrcp.f32 %v3007_v26 }
 0x610   : > { %v5983_v41 = vpop.eup %5982  ;;  %v3090_v31 = vmul.f32 %v5981_v36, %v3074_v47  ;;  %v8580_v7 = vadd.f32 %v3096_v59, %v3088_v19 }
 0x611   : > { %v5985_v12 = vpop.eup %5984  ;;  %v3091_v20 = vmul.f32 %v5983_v41, %v3075_v29  ;;  %v8583_v34 = vadd.f32 %v3097_v62, %v3089_v3 }
 0x612   : > { %v5987_v53 = vpop.eup %5986  ;;  %v3092_v48 = vmul.f32 %v5985_v12, %v3076_v56  ;;  %v8586_v24 = vadd.f32 %v3098_v44, %v3090_v31  ;;  %6008 = vtanh.f32 %v8580_v7 }
 0x613   : > { %v5989_v38 = vpop.eup %5988  ;;  %v3093_v4 = vmul.f32 %v5987_v53, %v3077_v13  ;;  %v8590_v6 = vadd.f32 %v3099_v57, %v3091_v20  ;;  %6010 = vtanh.f32 %v8583_v34 }
 0x614   : > { %v5991_v55 = vpop.eup %5990  ;;  %v3094_v30 = vmul.f32 %v5989_v38, %v3078_v35  ;;  %v8594_v47 = vadd.f32 %v3100_v25, %v3092_v48  ;;  %6012 = vtanh.f32 %v8586_v24 }
 0x615   : > { %v3095_v12 = vmul.f32 %v5991_v55, %v3079_v50  ;;  %v8598_v46 = vadd.f32 %v3101_v43, %v3093_v4  ;;  %6014 = vtanh.f32 %v8590_v6  ;;  %v5993_v14 = vpop.eup %5992 }
 0x616   : > { %v8601_v40 = vadd.f32 %v3102_v18, %v3094_v30  ;;  %6016 = vtanh.f32 %v8594_v47  ;;  %v5995_v5 = vpop.eup %5994 }
 0x617   : > { %v8604_v29 = vadd.f32 %v3103_v16, %v3095_v12  ;;  %6018 = vtanh.f32 %v8598_v46  ;;  %v5997_v39 = vpop.eup %5996 }
 0x618   : > { %6020 = vtanh.f32 %v8601_v40  ;;  %v5999_v45 = vpop.eup %5998 }
 0x619   : > { %6022 = vtanh.f32 %v8604_v29  ;;  %v6001_v32 = vpop.eup %6000 }
 0x61a   : > { %v6003_v52 = vpop.eup %6002 }
 0x61b   : > { %v6005_v49 = vpop.eup %6004 }
 0x61c   : > { %v6007_v56 = vpop.eup %6006 }
 0x61f   : > { %v6009_v13 = vpop.eup %6008 }
 0x620   : > { %v6011_v26 = vpop.eup %6010  ;;  %v3120_v8 = vmul.f32 %v6009_v13, %v5993_v14  ;;  %v8628_v13 = vld [vmem:[#allocation10 + $0x1d8] sm:$0xff] }
 0x621   : > { %v6013_v35 = vpop.eup %6012  ;;  %v3121_v59 = vmul.f32 %v6011_v26, %v5995_v5  ;;  %v8634_v26 = vld [vmem:[#allocation10 + $0x1d0] sm:$0xff] }
 0x622   : > { %v6015_v19 = vpop.eup %6014  ;;  %v3122_v36 = vmul.f32 %v6013_v35, %v5997_v39  ;;  %v3136_v50 = vrot.slane %v3120_v8, 4  ;;  %v8637_v8 = vld [vmem:[#allocation10 + $0x1a8] sm:$0xff]  ;;  %v8640_v35 = vld [vmem:[#allocation10 + $0x1b8] sm:$0xff] }
 0x623   : > { %v6017_v62 = vpop.eup %6016  ;;  %v3123_v3 = vmul.f32 %v6015_v19, %v5999_v45  ;;  %v3137_v41 = vrot.slane %v3121_v59, 3  ;;  %v8643_v59 = vld [vmem:[#allocation10 + $0x1a0] sm:$0xff]  ;;  %v8646_v19 = vld [vmem:[#allocation10 + $0x1b0] sm:$0xff] }
 0x624   : > { %v6019_v44 = vpop.eup %6018  ;;  %v3139_v31 = vrot.slane %v3122_v36, 2  ;;  %v3124_v38 = vmul.f32 %v6017_v62, %v6001_v32  ;;  %v8619_v32 = vld [vmem:[#allocation10 + $0x1e0] sm:$0xff]  ;;  %v8649_v36 = vld [vmem:[#allocation10 + $0x188] sm:$0xff] }
 0x625   : > { %v6021_v20 = vpop.eup %6020  ;;  %v3125_v57 = vmul.f32 %v6019_v44, %v6003_v52  ;;  %v3138_v53 = vsel %vm1218_vm1, %v3137_v41, %v3136_v50  ;;  %v3141_v48 = vrot.slane %v3123_v3, 1  ;;  %v8652_v50 = vld [vmem:[#allocation10 + $0x198] sm:$0xff]  ;;  %v8655_v62 = vld [vmem:[#allocation10 + $0x180] sm:$0xff]  ;;  %v8658_v3 = vld [vmem:[#allocation10 + $0x190] sm:$0xff] }
 0x626   : > { %v6023_v25 = vpop.eup %6022  ;;  %v3126_v4 = vmul.f32 %v6021_v20, %v6005_v49  ;;  %v3140_v43 = vsel %vm1221_vm2, %v3139_v31, %v3138_v53  ;;  %v8622_v49 = vld [vmem:[#allocation10 + $0x1f0] sm:$0xff]  ;;  %v8661_v41 = vld [vmem:[#allocation10 + $0x168] sm:$0xff]  ;;  %v8664_v44 = vld [vmem:[#allocation10 + $0x178] sm:$0xff] }
 0x627   : > { %v3127_v55 = vmul.f32 %v6023_v25, %v6007_v56  ;;  %v3142_v30 = vsel %vm1224_vm3, %v3141_v48, %v3140_v43  ;;  %v3144_v18 = vrot.slane %v3125_v57, 7  ;;  %v8625_v56 = vld [vmem:[#allocation10 + $0x1c8] sm:$0xff]  ;;  %9867 = vst [vmem:[#allocation95_spill] sm:$0xff] %v8664_v44  ;;  %v8667_v31 = vld [vmem:[#allocation10 + $0x160] sm:$0xff]  ;;  %v8670_v20 = vld [vmem:[#allocation10 + $0x170] sm:$0xff] }
 0x628   : > { %v3143_v12 = vsel %vm1227_vm4, %v3124_v38, %v3142_v30  ;;  %v3146_v16 = vrot.slane %v3126_v4, 6  ;;  %9868 = vst [vmem:[#allocation96_spill] sm:$0xff] %v8667_v31  ;;  %9869 = vst [vmem:[#allocation97_spill] sm:$0xff] %v8670_v20  ;;  %v8673_v57 = vld [vmem:[#allocation10 + $0x148] sm:$0xff]  ;;  %v8676_v53 = vld [vmem:[#allocation10 + $0x158] sm:$0xff] }
 0x629   : > { %v3145_v14 = vsel %vm1230_vm5, %v3144_v18, %v3143_v12  ;;  %v3148_v5 = vrot.slane %v3127_v55, 5  ;;  %9870 = vst [vmem:[#allocation46_spill] sm:$0xff] %v8673_v57  ;;  %9871 = vst [vmem:[#allocation47_spill] sm:$0xff] %v8676_v53  ;;  %v8679_v48 = vld [vmem:[#allocation10 + $0x140] sm:$0xff]  ;;  %v8682_v25 = vld [vmem:[#allocation10 + $0x150] sm:$0xff] }
 0x62a   : > { %v3147_v39 = vsel %vm1233_vm6, %v3146_v16, %v3145_v14  ;;  %9872 = vst [vmem:[#allocation48_spill] sm:$0xff] %v8679_v48  ;;  %9873 = vst [vmem:[#allocation49_spill] sm:$0xff] %v8682_v25  ;;  %v8685_v38 = vld [vmem:[#allocation10 + $0x128] sm:$0xff]  ;;  %v8688_v4 = vld [vmem:[#allocation10 + $0x138] sm:$0xff] }
 0x62b   : > { %v3149_v45 = vsel %vm1236_vm7, %v3148_v5, %v3147_v39  ;;  %9874 = vst [vmem:[#allocation50_spill] sm:$0xff] %v8685_v38  ;;  %9875 = vst [vmem:[#allocation51_spill] sm:$0xff] %v8688_v4  ;;  %v8691_v43 = vld [vmem:[#allocation10 + $0x120] sm:$0xff]  ;;  %v8694_v55 = vld [vmem:[#allocation10 + $0x130] sm:$0xff] }
 0x62c   : > { %v8617_v52 = vadd.f32 %v3149_v45, %v8429_v1  ;;  %3217 = vmatmul.mubr.f32.vlgmr.msra.gmra.mxu0 %v3149_v45  ;;  %3288 = vmatmul.mubr.f32.vlgmr.msra.gmra.mxu1 %v3149_v45  ;;  %v8631_v1 = vld [vmem:[#allocation10 + $0x1c0] sm:$0xff]  ;;  %9876 = vst [vmem:[#allocation52_spill] sm:$0xff] %v8691_v43  ;;  %9877 = vst [vmem:[#allocation53_spill] sm:$0xff] %v8694_v55  ;;  %v8697_v30 = vld [vmem:[#allocation10 + $0x108] sm:$0xff] }
 0x62d   : > { %3631 = vmatpush1.msra.mxu0 %v8619_v32  ;;  %3702 = vmatpush1.msra.mxu1 %v8622_v49  ;;  %9878 = vst [vmem:[#allocation54_spill] sm:$0xff] %v8697_v30  ;;  %v8700_v18 = vld [vmem:[#allocation10 + $0x118] sm:$0xff]  ;;  %v8703_v12 = vld [vmem:[#allocation10 + $0x100] sm:$0xff]  ;;  %v8706_v16 = vld [vmem:[#allocation10 + $0x110] sm:$0xff] }
 0x62e   : > { %3632 = vmatprep.subr.mxu0 %v8625_v56  ;;  %3703 = vmatprep.subr.mxu1 %v8628_v13  ;;  %9879 = vst [vmem:[#allocation55_spill] sm:$0xff] %v8700_v18  ;;  %9880 = vst [vmem:[#allocation56_spill] sm:$0xff] %v8703_v12  ;;  %v8709_v14 = vld [vmem:[#allocation10 + $0xe8] sm:$0xff]  ;;  %v8712_v5 = vld [vmem:[#allocation10 + $0xf8] sm:$0xff] }
 0x62f   : > { %3633 = vmatpush1.msra.mxu0 %v8631_v1  ;;  %3704 = vmatpush1.msra.mxu1 %v8634_v26  ;;  %9881 = vst [vmem:[#allocation57_spill] sm:$0xff] %v8706_v16  ;;  %9882 = vst [vmem:[#allocation58_spill] sm:$0xff] %v8709_v14  ;;  %v8715_v39 = vld [vmem:[#allocation10 + $0xe0] sm:$0xff]  ;;  %v8718_v45 = vld [vmem:[#allocation10 + $0xf0] sm:$0xff] }
 0x630   : > { %3634 = vmatprep.subr.mxu0 %v8637_v8  ;;  %3705 = vmatprep.subr.mxu1 %v8640_v35  ;;  %9883 = vst [vmem:[#allocation59_spill] sm:$0xff] %v8712_v5  ;;  %9884 = vst [vmem:[#allocation60_spill] sm:$0xff] %v8715_v39 }
 0x631   : > { %3635 = vmatpush1.msra.mxu0 %v8643_v59  ;;  %3706 = vmatpush1.msra.mxu1 %v8646_v19  ;;  %9885 = vst [vmem:[#allocation61_spill] sm:$0xff] %v8718_v45 }
 0x632   : > { %3636 = vmatprep.subr.mxu0 %v8649_v36  ;;  %3707 = vmatprep.subr.mxu1 %v8652_v50 }
 0x633   : > { %3637 = vmatpush1.msra.mxu0 %v8655_v62  ;;  %3708 = vmatpush1.msra.mxu1 %v8658_v3 }
 0x634   : > { %3638 = vmatprep.subr.mxu0 %v8661_v41  ;;  %3709 = vmatprep.subr.mxu1 %v8664_v44 }
 0x635   : > { %3639 = vmatpush1.msra.mxu0 %v8667_v31  ;;  %3710 = vmatpush1.msra.mxu1 %v8670_v20 }
 0x636   : > { %3640 = vmatprep.subr.mxu0 %v8673_v57  ;;  %3711 = vmatprep.subr.mxu1 %v8676_v53 }
 0x637   : > { %3641 = vmatpush1.msra.mxu0 %v8679_v48  ;;  %3712 = vmatpush1.msra.mxu1 %v8682_v25 }
 0x638   : > { %3642 = vmatprep.subr.mxu0 %v8685_v38  ;;  %3713 = vmatprep.subr.mxu1 %v8688_v4 }
 0x639   : > { %3643 = vmatpush1.msra.mxu0 %v8691_v43  ;;  %3714 = vmatpush1.msra.mxu1 %v8694_v55 }
 0x63a   : > { %3644 = vmatprep.subr.mxu0 %v8697_v30  ;;  %3715 = vmatprep.subr.mxu1 %v8700_v18 }
 0x63b   : > { %3645 = vmatpush1.msra.mxu0 %v8703_v12  ;;  %3716 = vmatpush1.msra.mxu1 %v8706_v16  ;;  %v8721_v12 = vld [vmem:[#allocation10 + $0xc8] sm:$0xff]  ;;  %v8724_v16 = vld [vmem:[#allocation10 + $0xd8] sm:$0xff] }
 0x63c   : > { %3646 = vmatprep.subr.mxu0 %v8709_v14  ;;  %3717 = vmatprep.subr.mxu1 %v8712_v5  ;;  %9886 = vst [vmem:[#allocation62_spill] sm:$0xff] %v8721_v12  ;;  %9887 = vst [vmem:[#allocation63_spill] sm:$0xff] %v8724_v16  ;;  %v8727_v14 = vld [vmem:[#allocation10 + $0xc0] sm:$0xff]  ;;  %v8730_v5 = vld [vmem:[#allocation10 + $0xd0] sm:$0xff] }
 0x63d   : > { %3647 = vmatpush1.msra.mxu0 %v8715_v39  ;;  %3718 = vmatpush1.msra.mxu1 %v8718_v45  ;;  %9888 = vst [vmem:[#allocation64_spill] sm:$0xff] %v8727_v14  ;;  %9889 = vst [vmem:[#allocation65_spill] sm:$0xff] %v8730_v5  ;;  %v8733_v39 = vld [vmem:[#allocation10 + $0xa8] sm:$0xff]  ;;  %v8736_v45 = vld [vmem:[#allocation10 + $0xb8] sm:$0xff] }
 0x63e   : > { %3648 = vmatprep.subr.mxu0 %v8721_v12  ;;  %3719 = vmatprep.subr.mxu1 %v8724_v16  ;;  %9890 = vst [vmem:[#allocation66_spill] sm:$0xff] %v8733_v39  ;;  %9891 = vst [vmem:[#allocation67_spill] sm:$0xff] %v8736_v45  ;;  %v8739_v12 = vld [vmem:[#allocation10 + $0xa0] sm:$0xff]  ;;  %v8742_v16 = vld [vmem:[#allocation10 + $0xb0] sm:$0xff] }
 0x63f   : > { %3649 = vmatpush1.msra.mxu0 %v8727_v14  ;;  %3720 = vmatpush1.msra.mxu1 %v8730_v5  ;;  %9892 = vst [vmem:[#allocation68_spill] sm:$0xff] %v8739_v12  ;;  %9893 = vst [vmem:[#allocation69_spill] sm:$0xff] %v8742_v16  ;;  %v8745_v14 = vld [vmem:[#allocation10 + $0x88] sm:$0xff]  ;;  %v8748_v5 = vld [vmem:[#allocation10 + $0x98] sm:$0xff] }
 0x640   : > { %3650 = vmatprep.subr.mxu0 %v8733_v39  ;;  %3721 = vmatprep.subr.mxu1 %v8736_v45  ;;  %9894 = vst [vmem:[#allocation70_spill] sm:$0xff] %v8745_v14  ;;  %9895 = vst [vmem:[#allocation71_spill] sm:$0xff] %v8748_v5  ;;  %v8751_v39 = vld [vmem:[#allocation10 + $0x80] sm:$0xff]  ;;  %v8754_v45 = vld [vmem:[#allocation10 + $0x90] sm:$0xff] }
 0x641   : > { %3651 = vmatpush1.msra.mxu0 %v8739_v12  ;;  %3722 = vmatpush1.msra.mxu1 %v8742_v16  ;;  %9896 = vst [vmem:[#allocation72_spill] sm:$0xff] %v8751_v39  ;;  %9897 = vst [vmem:[#allocation73_spill] sm:$0xff] %v8754_v45  ;;  %v8757_v12 = vld [vmem:[#allocation10 + $0x68] sm:$0xff]  ;;  %v8760_v16 = vld [vmem:[#allocation10 + $0x78] sm:$0xff] }
 0x642   : > { %3652 = vmatprep.subr.mxu0 %v8745_v14  ;;  %3723 = vmatprep.subr.mxu1 %v8748_v5  ;;  %9898 = vst [vmem:[#allocation74_spill] sm:$0xff] %v8757_v12  ;;  %9899 = vst [vmem:[#allocation75_spill] sm:$0xff] %v8760_v16  ;;  %v8763_v14 = vld [vmem:[#allocation10 + $0x60] sm:$0xff]  ;;  %v8766_v5 = vld [vmem:[#allocation10 + $0x70] sm:$0xff] }
 0x643   : > { %3653 = vmatpush1.msra.mxu0 %v8751_v39  ;;  %3724 = vmatpush1.msra.mxu1 %v8754_v45  ;;  %9900 = vst [vmem:[#allocation76_spill] sm:$0xff] %v8763_v14  ;;  %9901 = vst [vmem:[#allocation77_spill] sm:$0xff] %v8766_v5  ;;  %v8769_v39 = vld [vmem:[#allocation10 + $0x48] sm:$0xff]  ;;  %v8772_v45 = vld [vmem:[#allocation10 + $0x58] sm:$0xff] }
 0x644   : > { %3654 = vmatprep.subr.mxu0 %v8757_v12  ;;  %3725 = vmatprep.subr.mxu1 %v8760_v16  ;;  %9902 = vst [vmem:[#allocation78_spill] sm:$0xff] %v8769_v39  ;;  %9903 = vst [vmem:[#allocation79_spill] sm:$0xff] %v8772_v45  ;;  %v8775_v12 = vld [vmem:[#allocation10 + $0x40] sm:$0xff]  ;;  %v8778_v16 = vld [vmem:[#allocation10 + $0x50] sm:$0xff] }
 0x645   : > { %3655 = vmatpush1.msra.mxu0 %v8763_v14  ;;  %3726 = vmatpush1.msra.mxu1 %v8766_v5  ;;  %9904 = vst [vmem:[#allocation80_spill] sm:$0xff] %v8775_v12  ;;  %9905 = vst [vmem:[#allocation81_spill] sm:$0xff] %v8778_v16  ;;  %v8781_v14 = vld [vmem:[#allocation10 + $0x28] sm:$0xff]  ;;  %v8784_v5 = vld [vmem:[#allocation10 + $0x38] sm:$0xff] }
 0x646   : > { %3656 = vmatprep.subr.mxu0 %v8769_v39  ;;  %3727 = vmatprep.subr.mxu1 %v8772_v45  ;;  %9906 = vst [vmem:[#allocation82_spill] sm:$0xff] %v8781_v14  ;;  %9907 = vst [vmem:[#allocation83_spill] sm:$0xff] %v8784_v5  ;;  %v8787_v39 = vld [vmem:[#allocation10 + $0x20] sm:$0xff]  ;;  %v8790_v45 = vld [vmem:[#allocation10 + $0x30] sm:$0xff] }
 0x647   : > { %3657 = vmatpush1.msra.mxu0 %v8775_v12  ;;  %3728 = vmatpush1.msra.mxu1 %v8778_v16  ;;  %9908 = vst [vmem:[#allocation84_spill] sm:$0xff] %v8787_v39  ;;  %9909 = vst [vmem:[#allocation85_spill] sm:$0xff] %v8790_v45  ;;  %v8793_v12 = vld [vmem:[#allocation10 + $0x8] sm:$0xff]  ;;  %v8796_v16 = vld [vmem:[#allocation10 + $0x18] sm:$0xff] }
 0x648   : > { %3658 = vmatprep.subr.mxu0 %v8781_v14  ;;  %3729 = vmatprep.subr.mxu1 %v8784_v5  ;;  %9910 = vst [vmem:[#allocation86_spill] sm:$0xff] %v8793_v12  ;;  %9911 = vst [vmem:[#allocation87_spill] sm:$0xff] %v8796_v16  ;;  %v8799_v14 = vld [vmem:[#allocation10] sm:$0xff]  ;;  %v8803_v5 = vld [vmem:[#allocation10 + $0x10] sm:$0xff] }
 0x649   : > { %3659 = vmatpush1.msra.mxu0 %v8787_v39  ;;  %3730 = vmatpush1.msra.mxu1 %v8790_v45  ;;  %9912 = vst [vmem:[#allocation88_spill] sm:$0xff] %v8799_v14  ;;  %9913 = vst [vmem:[#allocation89_spill] sm:$0xff] %v8803_v5  ;;  %v6598_v45 = vld [vmem:[#allocation10 + $0x1e8] sm:$0xff]  ;;  %v6599_v39 = vld [vmem:[#allocation10 + $0x1f8] sm:$0xff] }
 0x64a   : > { %3660 = vmatprep.subr.mxu0 %v8793_v12  ;;  %3731 = vmatprep.subr.mxu1 %v8796_v16 }
 0x64b   : > { %3661 = vmatpush1.msra.mxu0 %v8799_v14  ;;  %3694 = vmatprep.mubr.f32.mxu0 %v9837_v37 }
 0x64c   : > { %3732 = vmatpush1.msra.mxu1 %v8803_v5  ;;  %3765 = vmatprep.mubr.f32.mxu1 %v9837_v37 }
 0x64d   : > { %4108 = vmatprep.subr.mxu0 %v6598_v45  ;;  %4179 = vmatprep.subr.mxu1 %v6599_v39 }
 0x6ec   : > { %v3218_v12 = vpop.f32.mrf.mxu0  ;;  %v3289_v57 = vpop.f32.mrf.mxu1 }
 0x6ed   : > { %v3298_v18 = vrot.slane %v3218_v12, 3  ;;  %v3302_v30 = vrot.slane %v3218_v12, 4  ;;  %v3306_v16 = vrot.slane %v3218_v12, 5  ;;  %v3310_v55 = vrot.slane %v3218_v12, 6 }
 0x6ee   : > { %v3314_v43 = vrot.slane %v3218_v12, 7  ;;  %v3318_v4 = vrot.slane %v3218_v12, 1  ;;  %v3378_v14 = vadd.f32 %v3218_v12, %v7402_v9  ;;  %v3322_v38 = vrot.slane %v3218_v12, 2 }
 0x6ef   : > { %v3358_v25 = vadd.f32 %v3298_v18, %v7391_v60  ;;  %v3362_v5 = vadd.f32 %v3302_v30, %v9841_v58  ;;  %v3366_v37 = vadd.f32 %v3306_v16, %v7396_v0  ;;  %v3370_v45 = vadd.f32 %v3310_v55, %v9842_v28 }
 0x6f0   : > { %v5105_v48 = vmul.f32 -1.442695, %v3378_v14  ;;  %v3374_v39 = vadd.f32 %v3314_v43, %v7400_v2  ;;  %v3382_v20 = vadd.f32 %v3318_v4, %v7411_v54  ;;  %v3386_v44 = vadd.f32 %v3322_v38, %v7414_v17 }
 0x6f1   : > { %v5090_v53 = vmul.f32 -1.442695, %v3358_v25  ;;  %v5093_v31 = vmul.f32 -1.442695, %v3362_v5  ;;  %v5096_v9 = vmul.f32 -1.442695, %v3366_v37 }
 0x6f2   : > { %v5099_v12 = vmul.f32 -1.442695, %v3370_v45  ;;  %6024 = vpow2.f32 %v5105_v48  ;;  %v3300_v18 = vrot.slane %v3289_v57, 3  ;;  %v5102_v30 = vmul.f32 -1.442695, %v3374_v39 }
 0x6f3   : > { %6026 = vpow2.f32 %v5090_v53  ;;  %v3304_v58 = vrot.slane %v3289_v57, 4  ;;  %v5108_v16 = vmul.f32 -1.442695, %v3382_v20  ;;  %v3308_v55 = vrot.slane %v3289_v57, 5 }
 0x6f4   : > { %6028 = vpow2.f32 %v5093_v31  ;;  %v5111_v14 = vmul.f32 -1.442695, %v3386_v44  ;;  %v3312_v43 = vrot.slane %v3289_v57, 6  ;;  %v3316_v25 = vrot.slane %v3289_v57, 7 }
 0x6f5   : > { %6030 = vpow2.f32 %v5096_v9  ;;  %v3360_v4 = vadd.f32 %v3300_v18, %v9843_v63  ;;  %v3364_v38 = vadd.f32 %v3304_v58, %v9844_v33  ;;  %v3320_v37 = vrot.slane %v3289_v57, 1 }
 0x6f6   : > { %6032 = vpow2.f32 %v5099_v12  ;;  %v3368_v48 = vadd.f32 %v3308_v55, %v9845_v15  ;;  %v3324_v53 = vrot.slane %v3289_v57, 2  ;;  %v3372_v31 = vadd.f32 %v3312_v43, %v9846_v22  ;;  %v3220_v55 = vpop.f32.mrf.mxu0  ;;  %v9924_v15 = vld [vmem:[#allocation44_spill] sm:$0xff] }
 0x6f7   : > { %6034 = vpow2.f32 %v5102_v30  ;;  %v3376_v20 = vadd.f32 %v3316_v25, %v9847_v42  ;;  %v5092_v9 = vmul.f32 -1.442695, %v3360_v4  ;;  %v3380_v44 = vadd.f32 %v3289_v57, %v9848_v11 }
 0x6f8   : > { %6036 = vpow2.f32 %v5108_v16  ;;  %v5095_v5 = vmul.f32 -1.442695, %v3364_v38  ;;  %v3384_v45 = vadd.f32 %v3320_v37, %v9849_v10  ;;  %v5098_v39 = vmul.f32 -1.442695, %v3368_v48 }
 0x6f9   : > { %6038 = vpow2.f32 %v5111_v14  ;;  %v3388_v12 = vadd.f32 %v3324_v53, %v9850_v27  ;;  %v5101_v58 = vmul.f32 -1.442695, %v3372_v31  ;;  %v5104_v18 = vmul.f32 -1.442695, %v3376_v20 }
 0x6fa   : > { %6040 = vpow2.f32 %v5092_v9  ;;  %v5107_v16 = vmul.f32 -1.442695, %v3380_v44  ;;  %v5110_v43 = vmul.f32 -1.442695, %v3384_v45  ;;  %v3299_v37 = vrot.slane %v3220_v55, 3 }
 0x6fb   : > { %6042 = vpow2.f32 %v5095_v5  ;;  %v5113_v4 = vmul.f32 -1.442695, %v3388_v12  ;;  %v3303_v53 = vrot.slane %v3220_v55, 4  ;;  %v3307_v9 = vrot.slane %v3220_v55, 5 }
 0x6fc   : > { %6044 = vpow2.f32 %v5098_v39  ;;  %v3311_v39 = vrot.slane %v3220_v55, 6  ;;  %v3315_v12 = vrot.slane %v3220_v55, 7 }
 0x6fd   : > { %6046 = vpow2.f32 %v5101_v58  ;;  %v3359_v58 = vadd.f32 %v3299_v37, %v9851_v61  ;;  %v9921_v61 = vld [vmem:[#allocation41_spill] sm:$0xff] }
 0x6fe   : > { %6048 = vpow2.f32 %v5104_v18 }
 0x6ff   : > { %v6025_v30 = vpop.eup %6024  ;;  %6050 = vpow2.f32 %v5107_v16  ;;  %v5091_v11 = vmul.f32 -1.442695, %v3359_v58 }
 0x700   : > { %v6027_v14 = vpop.eup %6026  ;;  %v3477_v38 = vadd.f32 1.0, %v6025_v30  ;;  %6052 = vpow2.f32 %v5110_v43  ;;  %v3363_v30 = vadd.f32 %v3303_v53, %v9852_v51  ;;  %v3367_v43 = vadd.f32 %v3307_v9, %v9853_v23  ;;  %v9916_v9 = vld [vmem:[#allocation36_spill] sm:$0xff] }
 0x701   : > { %v6029_v25 = vpop.eup %6028  ;;  %v3462_v10 = vadd.f32 1.0, %v6027_v14  ;;  %6054 = vpow2.f32 %v5113_v4  ;;  %v3319_v14 = vrot.slane %v3220_v55, 1  ;;  %v3371_v4 = vadd.f32 %v3311_v39, %v9854_v21 }
 0x702   : > { %v6031_v57 = vpop.eup %6030  ;;  %v3465_v20 = vadd.f32 1.0, %v6029_v25  ;;  %6056 = vrcp.f32 %v3477_v38  ;;  %v5094_v53 = vmul.f32 -1.442695, %v3363_v30 }
 0x703   : > { %v6033_v48 = vpop.eup %6032  ;;  %v3468_v5 = vadd.f32 1.0, %v6031_v57  ;;  %6058 = vrcp.f32 %v3462_v10  ;;  %v3323_v57 = vrot.slane %v3220_v55, 2  ;;  %v9915_v10 = vld [vmem:[#allocation35_spill] sm:$0xff] }
 0x704   : > { %v6035_v31 = vpop.eup %6034  ;;  %v3471_v27 = vadd.f32 1.0, %v6033_v48  ;;  %6060 = vrcp.f32 %v3465_v20  ;;  %v9914_v48 = vld [vmem:[#allocation34_spill] sm:$0xff]  ;;  %v3379_v37 = vadd.f32 %v3220_v55, %v9915_v10 }
 0x705   : > { %v6037_v44 = vpop.eup %6036  ;;  %v3474_v18 = vadd.f32 1.0, %v6035_v31  ;;  %6062 = vrcp.f32 %v3468_v5  ;;  %v3375_v38 = vadd.f32 %v3315_v12, %v9914_v48  ;;  %v3291_v31 = vpop.f32.mrf.mxu1  ;;  %v5097_v5 = vmul.f32 -1.442695, %v3367_v43 }
 0x706   : > { %v6039_v45 = vpop.eup %6038  ;;  %v3480_v16 = vadd.f32 1.0, %v6037_v44  ;;  %6064 = vrcp.f32 %v3471_v27  ;;  %v3383_v44 = vadd.f32 %v3319_v14, %v9916_v9  ;;  %v9917_v27 = vld [vmem:[#allocation37_spill] sm:$0xff]  ;;  %v5100_v12 = vmul.f32 -1.442695, %v3371_v4 }
 0x707   : > { %v3483_v25 = vadd.f32 1.0, %v6039_v45  ;;  %v8828_v42 = vpop.eup %6040  ;;  %6066 = vrcp.f32 %v3474_v18  ;;  %v3387_v39 = vadd.f32 %v3323_v57, %v9917_v27  ;;  %v5103_v18 = vmul.f32 -1.442695, %v3375_v38  ;;  %v9918_v38 = vld [vmem:[#allocation38_spill] sm:$0xff] }
 0x708   : > { %v8831_v20 = vpop.eup %6042  ;;  %6068 = vrcp.f32 %v3480_v16  ;;  %v3301_v48 = vrot.slane %v3291_v31, 3  ;;  %v5106_v30 = vmul.f32 -1.442695, %v3379_v37  ;;  %v3305_v10 = vrot.slane %v3291_v31, 4  ;;  %v9919_v37 = vld [vmem:[#allocation39_spill] sm:$0xff] }
 0x709   : > { %v8834_v45 = vpop.eup %6044  ;;  %6070 = vrcp.f32 %v3483_v25  ;;  %v5109_v14 = vmul.f32 -1.442695, %v3383_v44  ;;  %v3309_v43 = vrot.slane %v3291_v31, 5  ;;  %v5112_v25 = vmul.f32 -1.442695, %v3387_v39 }
 0x70a   : > { %v8837_v58 = vpop.eup %6046  ;;  %6072 = vpow2.f32 %v5091_v11  ;;  %v3313_v57 = vrot.slane %v3291_v31, 6  ;;  %v3317_v11 = vrot.slane %v3291_v31, 7  ;;  %v3361_v27 = vadd.f32 %v3301_v48, %v9918_v38  ;;  %v9922_v48 = vld [vmem:[#allocation42_spill] sm:$0xff] }
 0x70b   : > { %v8839_v55 = vpop.eup %6048  ;;  %6074 = vpow2.f32 %v5094_v53  ;;  %v3365_v53 = vadd.f32 %v3305_v10, %v9919_v37  ;;  %v3321_v44 = vrot.slane %v3291_v31, 1  ;;  %v3325_v39 = vrot.slane %v3291_v31, 2  ;;  %v9923_v10 = vld [vmem:[#allocation43_spill] sm:$0xff] }
 0x70c   : > { %v8841_v16 = vpop.eup %6050  ;;  %6076 = vpow2.f32 %v5097_v5  ;;  %v9920_v5 = vld [vmem:[#allocation40_spill] sm:$0xff]  ;;  %v3377_v38 = vadd.f32 %v3317_v11, %v9922_v48  ;;  %v3381_v37 = vadd.f32 %v3291_v31, %v9923_v10 }
 0x70d   : > { %v8843_v9 = vpop.eup %6052  ;;  %6078 = vpow2.f32 %v5100_v12  ;;  %v3369_v51 = vadd.f32 %v3309_v43, %v9920_v5  ;;  %v3385_v43 = vadd.f32 %v3321_v44, %v9924_v15 }
 0x70e   : > { %v8845_v4 = vpop.eup %6054  ;;  %6080 = vpow2.f32 %v5103_v18  ;;  %v3373_v18 = vadd.f32 %v3313_v57, %v9921_v61 }
 0x70f   : > { %v8848_v21 = vpop.eup %6056  ;;  %6082 = vpow2.f32 %v5106_v30 }
 0x710   : > { %v8851_v23 = vpop.eup %6058  ;;  %6084 = vpow2.f32 %v5109_v14 }
 0x711   : > { %v8854_v12 = vpop.eup %6060  ;;  %6086 = vpow2.f32 %v5112_v25  ;;  %v9925_v25 = vld [vmem:[#allocation45_spill] sm:$0xff] }
 0x712   : > { %v8857_v22 = vpop.eup %6062  ;;  %6088 = vtanh.f32 %v3361_v27  ;;  %v3389_v33 = vadd.f32 %v3325_v39, %v9925_v25 }
 0x713   : > { %v8860_v30 = vpop.eup %6064  ;;  %6090 = vtanh.f32 %v3365_v53 }
 0x714   : > { %v8863_v14 = vpop.eup %6066  ;;  %6092 = vtanh.f32 %v3369_v51 }
 0x715   : > { %v8866_v5 = vpop.eup %6068  ;;  %6094 = vtanh.f32 %v3373_v18 }
 0x716   : > { %v8869_v57 = vpop.eup %6070  ;;  %6096 = vtanh.f32 %v3377_v38 }
 0x717   : > { %v6073_v11 = vpop.eup %6072  ;;  %6098 = vtanh.f32 %v3381_v37 }
 0x718   : > { %v6075_v27 = vpop.eup %6074  ;;  %v3463_v48 = vadd.f32 1.0, %v6073_v11  ;;  %6100 = vtanh.f32 %v3385_v43 }
 0x719   : > { %v6077_v31 = vpop.eup %6076  ;;  %v3466_v53 = vadd.f32 1.0, %v6075_v27  ;;  %6102 = vtanh.f32 %v3389_v33  ;;  %v3464_v33 = vadd.f32 1.0, %v8828_v42  ;;  %v3551_v42 = vrot.slane %v8583_v34, 7 }
 0x71a   : > { %v6079_v10 = vpop.eup %6078  ;;  %v3469_v61 = vadd.f32 1.0, %v6077_v31  ;;  %6104 = vrcp.f32 %v3463_v48 }
 0x71b   : > { %v6081_v51 = vpop.eup %6080  ;;  %v3472_v44 = vadd.f32 1.0, %v6079_v10  ;;  %6106 = vrcp.f32 %v3466_v53  ;;  %v3467_v10 = vadd.f32 1.0, %v8831_v20 }
 0x71c   : > { %v6083_v15 = vpop.eup %6082  ;;  %v3475_v39 = vadd.f32 1.0, %v6081_v51  ;;  %6108 = vrcp.f32 %v3469_v61  ;;  %v3470_v61 = vadd.f32 1.0, %v8834_v45  ;;  %v3553_v45 = vrot.slane %v8590_v6, 7 }
 0x71d   : > { %v6085_v18 = vpop.eup %6084  ;;  %v3478_v25 = vadd.f32 1.0, %v6083_v15  ;;  %6110 = vrcp.f32 %v3472_v44  ;;  %v3473_v15 = vadd.f32 1.0, %v8837_v58  ;;  %v3476_v44 = vadd.f32 1.0, %v8839_v55 }
 0x71e   : > { %v6087_v38 = vpop.eup %6086  ;;  %v3481_v37 = vadd.f32 1.0, %v6085_v18  ;;  %6112 = vrcp.f32 %v3475_v39  ;;  %v3479_v18 = vadd.f32 1.0, %v8841_v16  ;;  %v3482_v58 = vadd.f32 1.0, %v8843_v9 }
 0x71f   : > { %v6089_v11 = vpop.eup %6088  ;;  %v3484_v43 = vadd.f32 1.0, %v6087_v38  ;;  %6114 = vrcp.f32 %v3478_v25  ;;  %v3550_v25 = vrot.slane %v8580_v7, 7  ;;  %v3552_v38 = vrot.slane %v8586_v24, 7 }
 0x720   : > { %v6091_v27 = vpop.eup %6090  ;;  %6116 = vrcp.f32 %v3481_v37  ;;  %v3554_v55 = vrot.slane %v8594_v47, 7  ;;  %v3485_v7 = vadd.f32 1.0, %v8845_v4  ;;  %v3556_v16 = vrot.slane %v8601_v40, 7 }
 0x721   : > { %v6093_v48 = vpop.eup %6092  ;;  %6118 = vrcp.f32 %v3484_v43  ;;  %v3555_v43 = vrot.slane %v8598_v46, 7  ;;  %v3557_v6 = vrot.slane %v8604_v29, 7  ;;  %v3575_v9 = vmul.f32 %v6091_v27, %v8854_v12 }
 0x722   : > { %v6095_v31 = vpop.eup %6094  ;;  %6120 = vrcp.f32 %v3464_v33  ;;  %v3574_v33 = vmul.f32 %v6089_v11, %v8851_v23  ;;  %v3576_v46 = vmul.f32 %v6093_v48, %v8857_v22 }
 0x723   : > { %v6097_v53 = vpop.eup %6096  ;;  %6122 = vrcp.f32 %v3467_v10  ;;  %v3577_v23 = vmul.f32 %v6095_v31, %v8860_v30 }
 0x724   : > { %v6099_v51 = vpop.eup %6098  ;;  %6124 = vrcp.f32 %v3470_v61 }
 0x725   : > { %v6101_v39 = vpop.eup %6100  ;;  %6126 = vrcp.f32 %v3473_v15  ;;  %v3579_v48 = vmul.f32 %v6099_v51, %v8848_v21 }
 0x726   : > { %v6103_v20 = vpop.eup %6102  ;;  %6128 = vrcp.f32 %v3476_v44  ;;  %v3580_v31 = vmul.f32 %v6101_v39, %v8866_v5 }
 0x727   : > { %v6105_v37 = vpop.eup %6104  ;;  %6130 = vrcp.f32 %v3479_v18 }
 0x728   : > { %v6107_v34 = vpop.eup %6106  ;;  %v3566_v24 = vmul.f32 %v6105_v37, %v3550_v25  ;;  %6132 = vrcp.f32 %v3482_v58  ;;  %v3578_v25 = vmul.f32 %v6097_v53, %v8863_v14  ;;  %v3581_v14 = vmul.f32 %v6103_v20, %v8869_v57 }
 0x729   : > { %v6109_v10 = vpop.eup %6108  ;;  %v3567_v61 = vmul.f32 %v6107_v34, %v3551_v42  ;;  %6134 = vrcp.f32 %v3485_v7 }
 0x72a   : > { %v6111_v47 = vpop.eup %6110  ;;  %v3568_v15 = vmul.f32 %v6109_v10, %v3552_v38  ;;  %v8890_v4 = vadd.f32 %v3574_v33, %v3566_v24 }
 0x72b   : > { %v6113_v63 = vpop.eup %6112  ;;  %v3569_v40 = vmul.f32 %v6111_v47, %v3553_v45  ;;  %v8893_v11 = vadd.f32 %v3575_v9, %v3567_v61 }
 0x72c   : > { %v6115_v44 = vpop.eup %6114  ;;  %v3570_v29 = vmul.f32 %v6113_v63, %v3554_v55  ;;  %v8896_v12 = vadd.f32 %v3576_v46, %v3568_v15  ;;  %6136 = vtanh.f32 %v8890_v4 }
 0x72d   : > { %v6117_v22 = vpop.eup %6116  ;;  %v3571_v27 = vmul.f32 %v6115_v44, %v3555_v43  ;;  %v8900_v42 = vadd.f32 %v3577_v23, %v3569_v40  ;;  %6138 = vtanh.f32 %v8893_v11 }
 0x72e   : > { %v6119_v18 = vpop.eup %6118  ;;  %v3572_v30 = vmul.f32 %v6117_v22, %v3556_v16  ;;  %v8904_v38 = vadd.f32 %v3578_v25, %v3570_v29  ;;  %6140 = vtanh.f32 %v8896_v12 }
 0x72f   : > { %v3573_v63 = vmul.f32 %v6119_v18, %v3557_v6  ;;  %v8908_v53 = vadd.f32 %v3579_v48, %v3571_v27  ;;  %6142 = vtanh.f32 %v8900_v42  ;;  %v6121_v51 = vpop.eup %6120 }
 0x730   : > { %v8911_v21 = vadd.f32 %v3580_v31, %v3572_v30  ;;  %6144 = vtanh.f32 %v8904_v38  ;;  %v6123_v5 = vpop.eup %6122 }
 0x731   : > { %v8914_v45 = vadd.f32 %v3581_v14, %v3573_v63  ;;  %6146 = vtanh.f32 %v8908_v53  ;;  %v6125_v39 = vpop.eup %6124 }
 0x732   : > { %6148 = vtanh.f32 %v8911_v21  ;;  %v6127_v57 = vpop.eup %6126 }
 0x733   : > { %6150 = vtanh.f32 %v8914_v45  ;;  %v6129_v20 = vpop.eup %6128 }
 0x734   : > { %v6131_v58 = vpop.eup %6130 }
 0x735   : > { %v6133_v37 = vpop.eup %6132 }
 0x736   : > { %v6135_v55 = vpop.eup %6134 }
 0x739   : > { %v6137_v43 = vpop.eup %6136 }
 0x73a   : > { %v6139_v7 = vpop.eup %6138  ;;  %v3598_v34 = vmul.f32 %v6137_v43, %v6121_v51  ;;  %v9945_v43 = vld [vmem:[#allocation62_spill] sm:$0xff] }
 0x73b   : > { %v6141_v16 = vpop.eup %6140  ;;  %v3599_v33 = vmul.f32 %v6139_v7, %v6123_v5  ;;  %v9946_v7 = vld [vmem:[#allocation63_spill] sm:$0xff] }
 0x73c   : > { %v6143_v24 = vpop.eup %6142  ;;  %v3600_v10 = vmul.f32 %v6141_v16, %v6125_v39  ;;  %v3614_v6 = vrot.slane %v3598_v34, 5  ;;  %v9947_v34 = vld [vmem:[#allocation64_spill] sm:$0xff]  ;;  %v9948_v16 = vld [vmem:[#allocation65_spill] sm:$0xff] }
 0x73d   : > { %v6145_v9 = vpop.eup %6144  ;;  %v3601_v61 = vmul.f32 %v6143_v24, %v6127_v57  ;;  %v3615_v47 = vrot.slane %v3599_v33, 4  ;;  %v9949_v33 = vld [vmem:[#allocation66_spill] sm:$0xff]  ;;  %v9950_v24 = vld [vmem:[#allocation67_spill] sm:$0xff] }
 0x73e   : > { %v6147_v46 = vpop.eup %6146  ;;  %v3602_v15 = vmul.f32 %v6145_v9, %v6129_v20  ;;  %v3617_v40 = vrot.slane %v3600_v10, 3  ;;  %v9951_v10 = vld [vmem:[#allocation68_spill] sm:$0xff]  ;;  %v9953_v9 = vld [vmem:[#allocation70_spill] sm:$0xff] }
 0x73f   : > { %v6149_v23 = vpop.eup %6148  ;;  %v3616_v44 = vsel %vm1218_vm1, %v3615_v47, %v3614_v6  ;;  %v3619_v29 = vrot.slane %v3601_v61, 2  ;;  %v3603_v18 = vmul.f32 %v6147_v46, %v6131_v58  ;;  %v9942_v58 = vld [vmem:[#allocation59_spill] sm:$0xff]  ;;  %v9952_v6 = vld [vmem:[#allocation69_spill] sm:$0xff]  ;;  %v9955_v47 = vld [vmem:[#allocation72_spill] sm:$0xff] }
 0x740   : > { %v6151_v25 = vpop.eup %6150  ;;  %v3604_v22 = vmul.f32 %v6149_v23, %v6133_v37  ;;  %v3618_v27 = vsel %vm1221_vm2, %v3617_v40, %v3616_v44  ;;  %v3621_v48 = vrot.slane %v3602_v15, 1  ;;  %v9943_v37 = vld [vmem:[#allocation60_spill] sm:$0xff]  ;;  %v9954_v61 = vld [vmem:[#allocation71_spill] sm:$0xff]  ;;  %v9956_v46 = vld [vmem:[#allocation73_spill] sm:$0xff] }
 0x741   : > { %v3605_v30 = vmul.f32 %v6151_v25, %v6135_v55  ;;  %v3620_v31 = vsel %vm1224_vm3, %v3619_v29, %v3618_v27  ;;  %v9944_v55 = vld [vmem:[#allocation61_spill] sm:$0xff]  ;;  %v9957_v15 = vld [vmem:[#allocation74_spill] sm:$0xff]  ;;  %v9958_v40 = vld [vmem:[#allocation75_spill] sm:$0xff] }
 0x742   : > { %v3622_v63 = vsel %vm1227_vm4, %v3621_v48, %v3620_v31  ;;  %v3624_v14 = vrot.slane %v3604_v22, 7  ;;  %v9959_v23 = vld [vmem:[#allocation76_spill] sm:$0xff]  ;;  %v9960_v44 = vld [vmem:[#allocation77_spill] sm:$0xff]  ;;  %v9961_v29 = vld [vmem:[#allocation78_spill] sm:$0xff] }
 0x743   : > { %v3623_v51 = vsel %vm1230_vm5, %v3603_v18, %v3622_v63  ;;  %v3626_v5 = vrot.slane %v3605_v30, 6  ;;  %v9962_v25 = vld [vmem:[#allocation79_spill] sm:$0xff]  ;;  %v9963_v22 = vld [vmem:[#allocation80_spill] sm:$0xff]  ;;  %v9964_v27 = vld [vmem:[#allocation81_spill] sm:$0xff] }
 0x744   : > { %v3625_v39 = vsel %vm1233_vm6, %v3624_v14, %v3623_v51  ;;  %v9965_v48 = vld [vmem:[#allocation82_spill] sm:$0xff]  ;;  %v9966_v18 = vld [vmem:[#allocation83_spill] sm:$0xff]  ;;  %v9967_v30 = vld [vmem:[#allocation84_spill] sm:$0xff] }
 0x745   : > { %v3627_v57 = vsel %vm1236_vm7, %v3626_v5, %v3625_v39  ;;  %v9968_v31 = vld [vmem:[#allocation85_spill] sm:$0xff]  ;;  %v9969_v63 = vld [vmem:[#allocation86_spill] sm:$0xff]  ;;  %v9970_v14 = vld [vmem:[#allocation87_spill] sm:$0xff]  ;;  %v9972_v5 = vmov 0.0  }
 0x746   : > { %v8927_v20 = vadd.f32 %v3627_v57, %v8617_v52  ;;  %3695 = vmatmul.mubr.f32.vlgmr.msra.gmra.mxu0 %v3627_v57  ;;  %3766 = vmatmul.mubr.f32.vlgmr.msra.gmra.mxu1 %v3627_v57  ;;  %v9926_v52 = vld [vmem:[#allocation95_spill] sm:$0xff]  ;;  %v9971_v51 = vld [vmem:[#allocation88_spill] sm:$0xff]  ;;  %v9973_v39 = vld [vmem:[#allocation89_spill] sm:$0xff] }
 0x747   : > { %4109 = vmatpush1.msra.mxu0 %v8619_v32  ;;  %4180 = vmatpush1.msra.mxu1 %v8622_v49  ;;  %v9927_v32 = vld [vmem:[#allocation96_spill] sm:$0xff]  ;;  %v9928_v49 = vld [vmem:[#allocation97_spill] sm:$0xff] }
 0x748   : > { %4110 = vmatprep.subr.mxu0 %v8625_v56  ;;  %4181 = vmatprep.subr.mxu1 %v8628_v13  ;;  %v9929_v56 = vld [vmem:[#allocation46_spill] sm:$0xff]  ;;  %v9930_v13 = vld [vmem:[#allocation47_spill] sm:$0xff] }
 0x749   : > { %4111 = vmatpush1.msra.mxu0 %v8631_v1  ;;  %4182 = vmatpush1.msra.mxu1 %v8634_v26  ;;  %v9931_v1 = vld [vmem:[#allocation48_spill] sm:$0xff]  ;;  %v9932_v26 = vld [vmem:[#allocation49_spill] sm:$0xff] }
 0x74a   : > { %4112 = vmatprep.subr.mxu0 %v8637_v8  ;;  %4183 = vmatprep.subr.mxu1 %v8640_v35  ;;  %v9933_v8 = vld [vmem:[#allocation50_spill] sm:$0xff]  ;;  %v9934_v35 = vld [vmem:[#allocation51_spill] sm:$0xff] }
 0x74b   : > { %4113 = vmatpush1.msra.mxu0 %v8643_v59  ;;  %4184 = vmatpush1.msra.mxu1 %v8646_v19  ;;  %v9935_v59 = vld [vmem:[#allocation52_spill] sm:$0xff]  ;;  %v9936_v19 = vld [vmem:[#allocation53_spill] sm:$0xff] }
 0x74c   : > { %4114 = vmatprep.subr.mxu0 %v8649_v36  ;;  %4185 = vmatprep.subr.mxu1 %v8652_v50  ;;  %v9937_v36 = vld [vmem:[#allocation54_spill] sm:$0xff]  ;;  %v9938_v50 = vld [vmem:[#allocation55_spill] sm:$0xff] }
 0x74d   : > { %4115 = vmatpush1.msra.mxu0 %v8655_v62  ;;  %4186 = vmatpush1.msra.mxu1 %v8658_v3  ;;  %v9939_v62 = vld [vmem:[#allocation56_spill] sm:$0xff]  ;;  %v9940_v3 = vld [vmem:[#allocation57_spill] sm:$0xff] }
 0x74e   : > { %4116 = vmatprep.subr.mxu0 %v8661_v41  ;;  %4187 = vmatprep.subr.mxu1 %v9926_v52  ;;  %v9941_v41 = vld [vmem:[#allocation58_spill] sm:$0xff] }
 0x74f   : > { %4117 = vmatpush1.msra.mxu0 %v9927_v32  ;;  %4188 = vmatpush1.msra.mxu1 %v9928_v49 }
 0x750   : > { %4118 = vmatprep.subr.mxu0 %v9929_v56  ;;  %4189 = vmatprep.subr.mxu1 %v9930_v13 }
 0x751   : > { %4119 = vmatpush1.msra.mxu0 %v9931_v1  ;;  %4190 = vmatpush1.msra.mxu1 %v9932_v26 }
 0x752   : > { %4120 = vmatprep.subr.mxu0 %v9933_v8  ;;  %4191 = vmatprep.subr.mxu1 %v9934_v35 }
 0x753   : > { %4121 = vmatpush1.msra.mxu0 %v9935_v59  ;;  %4192 = vmatpush1.msra.mxu1 %v9936_v19  ;;  %v9974_v59 = vld [vmem:[#allocation19_spill] sm:$0xff] }
 0x754   : > { %4122 = vmatprep.subr.mxu0 %v9937_v36  ;;  %4193 = vmatprep.subr.mxu1 %v9938_v50 }
 0x755   : > { %4123 = vmatpush1.msra.mxu0 %v9939_v62  ;;  %4194 = vmatpush1.msra.mxu1 %v9940_v3 }
 0x756   : > { %4124 = vmatprep.subr.mxu0 %v9941_v41  ;;  %4195 = vmatprep.subr.mxu1 %v9942_v58 }
 0x757   : > { %4125 = vmatpush1.msra.mxu0 %v9943_v37  ;;  %4196 = vmatpush1.msra.mxu1 %v9944_v55  ;;  %v9975_v37 = vld [vmem:[#allocation21_spill] sm:$0xff] }
 0x758   : > { %4126 = vmatprep.subr.mxu0 %v9945_v43  ;;  %4197 = vmatprep.subr.mxu1 %v9946_v7 }
 0x759   : > { %4127 = vmatpush1.msra.mxu0 %v9947_v34  ;;  %4198 = vmatpush1.msra.mxu1 %v9948_v16 }
 0x75a   : > { %4128 = vmatprep.subr.mxu0 %v9949_v33  ;;  %4199 = vmatprep.subr.mxu1 %v9950_v24 }
 0x75b   : > { %4129 = vmatpush1.msra.mxu0 %v9951_v10  ;;  %4200 = vmatpush1.msra.mxu1 %v9952_v6 }
 0x75c   : > { %4130 = vmatprep.subr.mxu0 %v9953_v9  ;;  %4201 = vmatprep.subr.mxu1 %v9954_v61 }
 0x75d   : > { %4131 = vmatpush1.msra.mxu0 %v9955_v47  ;;  %4202 = vmatpush1.msra.mxu1 %v9956_v46 }
 0x75e   : > { %4132 = vmatprep.subr.mxu0 %v9957_v15  ;;  %4203 = vmatprep.subr.mxu1 %v9958_v40  ;;  %v9976_v15 = vld [vmem:[#allocation22_spill] sm:$0xff] }
 0x75f   : > { %4133 = vmatpush1.msra.mxu0 %v9959_v23  ;;  %4204 = vmatpush1.msra.mxu1 %v9960_v44  ;;  %v9977_v44 = vld [vmem:[#allocation23_spill] sm:$0xff] }
 0x760   : > { %4134 = vmatprep.subr.mxu0 %v9961_v29  ;;  %4205 = vmatprep.subr.mxu1 %v9962_v25  ;;  %v9978_v25 = vld [vmem:[#allocation24_spill] sm:$0xff] }
 0x761   : > { %4135 = vmatpush1.msra.mxu0 %v9963_v22  ;;  %4206 = vmatpush1.msra.mxu1 %v9964_v27 }
 0x762   : > { %4136 = vmatprep.subr.mxu0 %v9965_v48  ;;  %4207 = vmatprep.subr.mxu1 %v9966_v18  ;;  %v9979_v48 = vld [vmem:[#allocation25_spill] sm:$0xff] }
 0x763   : > { %4137 = vmatpush1.msra.mxu0 %v9967_v30  ;;  %4208 = vmatpush1.msra.mxu1 %v9968_v31  ;;  %v9980_v30 = vld [vmem:[#allocation26_spill] sm:$0xff] }
 0x764   : > { %4138 = vmatprep.subr.mxu0 %v9969_v63  ;;  %4209 = vmatprep.subr.mxu1 %v9970_v14  ;;  %v9981_v14 = vld [vmem:[#allocation27_spill] sm:$0xff] }
 0x765   : > { %4139 = vmatpush1.msra.mxu0 %v9971_v51  ;;  %4172 = vmatprep.mubr.f32.mxu0 %v9972_v5 }
 0x766   : > { %4210 = vmatpush1.msra.mxu1 %v9973_v39  ;;  %4243 = vmatprep.mubr.f32.mxu1 %v9972_v5  ;;  %v9982_v39 = vld [vmem:[#allocation28_spill] sm:$0xff] }
 0x806   : > { %v3696_v57 = vpop.f32.mrf.mxu0  ;;  %v3767_v58 = vpop.f32.mrf.mxu1 }
 0x807   : > { %v3776_v52 = vrot.slane %v3696_v57, 2  ;;  %v3780_v32 = vrot.slane %v3696_v57, 3  ;;  %v3784_v49 = vrot.slane %v3696_v57, 4  ;;  %v3788_v56 = vrot.slane %v3696_v57, 5 }
 0x808   : > { %v3792_v13 = vrot.slane %v3696_v57, 6  ;;  %v3796_v1 = vrot.slane %v3696_v57, 7  ;;  %v3860_v26 = vadd.f32 %v3696_v57, %v7411_v54  ;;  %v3800_v8 = vrot.slane %v3696_v57, 1 }
 0x809   : > { %v3836_v35 = vadd.f32 %v3776_v52, %v7391_v60  ;;  %v3840_v19 = vadd.f32 %v3780_v32, %v9974_v59  ;;  %v3844_v36 = vadd.f32 %v3784_v49, %v7396_v0  ;;  %v3848_v50 = vadd.f32 %v3788_v56, %v9842_v28  ;;  %v9983_v32 = vld [vmem:[#allocation29_spill] sm:$0xff] }
 0x80a   : > { %v5132_v62 = vmul.f32 -1.442695, %v3860_v26  ;;  %v3852_v3 = vadd.f32 %v3792_v13, %v7400_v2  ;;  %v3856_v55 = vadd.f32 %v3796_v1, %v9975_v37  ;;  %v3864_v7 = vadd.f32 %v3800_v8, %v7414_v17  ;;  %v3698_v8 = vpop.f32.mrf.mxu0 }
 0x80b   : > { %v5114_v41 = vmul.f32 -1.442695, %v3836_v35  ;;  %v5117_v43 = vmul.f32 -1.442695, %v3840_v19  ;;  %v5120_v34 = vmul.f32 -1.442695, %v3844_v36  ;;  %v3862_v57 = vadd.f32 %v3767_v58, %v9982_v39 }
 0x80c   : > { %v5123_v16 = vmul.f32 -1.442695, %v3848_v50  ;;  %6152 = vpow2.f32 %v5132_v62  ;;  %v3778_v33 = vrot.slane %v3767_v58, 2  ;;  %v5126_v24 = vmul.f32 -1.442695, %v3852_v3 }
 0x80d   : > { %6154 = vpow2.f32 %v5114_v41  ;;  %v3782_v10 = vrot.slane %v3767_v58, 3  ;;  %v5129_v6 = vmul.f32 -1.442695, %v3856_v55  ;;  %v3786_v9 = vrot.slane %v3767_v58, 4 }
 0x80e   : > { %6156 = vpow2.f32 %v5117_v43  ;;  %v5135_v61 = vmul.f32 -1.442695, %v3864_v7  ;;  %v3790_v47 = vrot.slane %v3767_v58, 5  ;;  %v3794_v46 = vrot.slane %v3767_v58, 6 }
 0x80f   : > { %6158 = vpow2.f32 %v5120_v34  ;;  %v3838_v40 = vadd.f32 %v3778_v33, %v9976_v15  ;;  %v3798_v23 = vrot.slane %v3767_v58, 7  ;;  %v3842_v29 = vadd.f32 %v3782_v10, %v9977_v44 }
 0x810   : > { %6160 = vpow2.f32 %v5123_v16  ;;  %v3846_v22 = vadd.f32 %v3786_v9, %v9978_v25  ;;  %v3802_v27 = vrot.slane %v3767_v58, 1  ;;  %v3850_v18 = vadd.f32 %v3790_v47, %v9979_v48  ;;  %v9984_v47 = vld [vmem:[#allocation30_spill] sm:$0xff] }
 0x811   : > { %6162 = vpow2.f32 %v5126_v24  ;;  %v3854_v31 = vadd.f32 %v3794_v46, %v9980_v30  ;;  %v5116_v63 = vmul.f32 -1.442695, %v3838_v40  ;;  %v3858_v51 = vadd.f32 %v3798_v23, %v9981_v14 }
 0x812   : > { %6164 = vpow2.f32 %v5129_v6  ;;  %v5119_v5 = vmul.f32 -1.442695, %v3842_v29  ;;  %v5122_v52 = vmul.f32 -1.442695, %v3846_v22  ;;  %v3866_v49 = vadd.f32 %v3802_v27, %v9983_v32  ;;  %v9985_v29 = vld [vmem:[#allocation31_spill] sm:$0xff] }
 0x813   : > { %6166 = vpow2.f32 %v5135_v61  ;;  %v5125_v56 = vmul.f32 -1.442695, %v3850_v18  ;;  %v5128_v13 = vmul.f32 -1.442695, %v3854_v31  ;;  %v5131_v26 = vmul.f32 -1.442695, %v3858_v51 }
 0x814   : > { %6168 = vpow2.f32 %v5116_v63  ;;  %v5134_v19 = vmul.f32 -1.442695, %v3862_v57  ;;  %v5137_v50 = vmul.f32 -1.442695, %v3866_v49  ;;  %v3777_v41 = vrot.slane %v3698_v8, 2  ;;  %v9986_v18 = vld [vmem:[#allocation32_spill] sm:$0xff] }
 0x815   : > { %6170 = vpow2.f32 %v5119_v5  ;;  %v3781_v43 = vrot.slane %v3698_v8, 3  ;;  %v3785_v16 = vrot.slane %v3698_v8, 4  ;;  %v3789_v10 = vrot.slane %v3698_v8, 5  ;;  %v9987_v5 = vld [vmem:[#allocation33_spill] sm:$0xff] }
 0x816   : > { %6172 = vpow2.f32 %v5122_v52  ;;  %v3793_v61 = vrot.slane %v3698_v8, 6  ;;  %v3837_v46 = vadd.f32 %v3777_v41, %v9984_v47  ;;  %v3797_v23 = vrot.slane %v3698_v8, 7  ;;  %v9988_v52 = vld [vmem:[#allocation34_spill] sm:$0xff] }
 0x817   : > { %6174 = vpow2.f32 %v5125_v56  ;;  %v3841_v22 = vadd.f32 %v3781_v43, %v9985_v29  ;;  %v3845_v31 = vadd.f32 %v3785_v16, %v9986_v18  ;;  %v3801_v51 = vrot.slane %v3698_v8, 1 }
 0x818   : > { %6176 = vpow2.f32 %v5128_v13  ;;  %v3849_v57 = vadd.f32 %v3789_v10, %v9987_v5  ;;  %v3853_v49 = vadd.f32 %v3793_v61, %v9988_v52  ;;  %v5115_v56 = vmul.f32 -1.442695, %v3837_v46 }
 0x819   : > { %v6153_v1 = vpop.eup %6152  ;;  %6178 = vpow2.f32 %v5131_v26 }
 0x81a   : > { %v6155_v35 = vpop.eup %6154  ;;  %v3958_v3 = vadd.f32 1.0, %v6153_v1  ;;  %6180 = vpow2.f32 %v5134_v19  ;;  %v9989_v1 = vld [vmem:[#allocation35_spill] sm:$0xff]  ;;  %v3769_v19 = vpop.f32.mrf.mxu1  ;;  %v5124_v43 = vmul.f32 -1.442695, %v3849_v57 }
 0x81b   : > { %v6157_v36 = vpop.eup %6156  ;;  %v3940_v55 = vadd.f32 1.0, %v6155_v35  ;;  %6182 = vpow2.f32 %v5137_v50  ;;  %v3857_v26 = vadd.f32 %v3797_v23, %v9989_v1  ;;  %v5118_v35 = vmul.f32 -1.442695, %v3841_v22  ;;  %v9990_v50 = vld [vmem:[#allocation36_spill] sm:$0xff]  ;;  %v9993_v57 = vld [vmem:[#allocation39_spill] sm:$0xff] }
 0x81c   : > { %v6159_v62 = vpop.eup %6158  ;;  %v3943_v34 = vadd.f32 1.0, %v6157_v36  ;;  %6184 = vrcp.f32 %v3958_v3  ;;  %v5121_v3 = vmul.f32 -1.442695, %v3845_v31  ;;  %v3779_v16 = vrot.slane %v3769_v19, 2 }
 0x81d   : > { %v6161_v58 = vpop.eup %6160  ;;  %v3946_v24 = vadd.f32 1.0, %v6159_v62  ;;  %6186 = vrcp.f32 %v3940_v55  ;;  %v3861_v62 = vadd.f32 %v3698_v8, %v9990_v50  ;;  %v3783_v10 = vrot.slane %v3769_v19, 3 }
 0x81e   : > { %v6163_v7 = vpop.eup %6162  ;;  %v3949_v9 = vadd.f32 1.0, %v6161_v58  ;;  %6188 = vrcp.f32 %v3943_v34  ;;  %v9991_v58 = vld [vmem:[#allocation37_spill] sm:$0xff]  ;;  %v5127_v34 = vmul.f32 -1.442695, %v3853_v49  ;;  %v3795_v22 = vrot.slane %v3769_v19, 6 }
 0x81f   : > { %v6165_v33 = vpop.eup %6164  ;;  %v3952_v40 = vadd.f32 1.0, %v6163_v7  ;;  %6190 = vrcp.f32 %v3946_v24  ;;  %v3865_v55 = vadd.f32 %v3801_v51, %v9991_v58  ;;  %v5130_v24 = vmul.f32 -1.442695, %v3857_v26  ;;  %v9994_v26 = vld [vmem:[#allocation40_spill] sm:$0xff]  ;;  %v9997_v58 = vld [vmem:[#allocation43_spill] sm:$0xff] }
 0x820   : > { %v6167_v6 = vpop.eup %6166  ;;  %v3955_v27 = vadd.f32 1.0, %v6165_v33  ;;  %6192 = vrcp.f32 %v3949_v9  ;;  %v5133_v8 = vmul.f32 -1.442695, %v3861_v62  ;;  %v3787_v9 = vrot.slane %v3769_v19, 4 }
 0x821   : > { %v3961_v63 = vadd.f32 1.0, %v6167_v6  ;;  %v9014_v13 = vpop.eup %6168  ;;  %6194 = vrcp.f32 %v3952_v40  ;;  %v5136_v46 = vmul.f32 -1.442695, %v3865_v55  ;;  %v3791_v40 = vrot.slane %v3769_v19, 5  ;;  %v9995_v55 = vld [vmem:[#allocation41_spill] sm:$0xff] }
 0x822   : > { %v9017_v36 = vpop.eup %6170  ;;  %6196 = vrcp.f32 %v3955_v27  ;;  %v9992_v27 = vld [vmem:[#allocation38_spill] sm:$0xff]  ;;  %v3799_v51 = vrot.slane %v3769_v19, 7  ;;  %v3843_v49 = vadd.f32 %v3783_v10, %v9993_v57 }
 0x823   : > { %v9020_v41 = vpop.eup %6172  ;;  %6198 = vrcp.f32 %v3961_v63  ;;  %v3839_v31 = vadd.f32 %v3779_v16, %v9992_v27  ;;  %v9996_v16 = vld [vmem:[#allocation42_spill] sm:$0xff] }
 0x824   : > { %v9023_v7 = vpop.eup %6174  ;;  %6200 = vpow2.f32 %v5115_v56  ;;  %v3855_v27 = vadd.f32 %v3795_v22, %v9996_v16  ;;  %v3859_v10 = vadd.f32 %v3799_v51, %v9997_v58 }
 0x825   : > { %v9025_v33 = vpop.eup %6176  ;;  %6202 = vpow2.f32 %v5118_v35  ;;  %v3847_v35 = vadd.f32 %v3787_v9, %v9994_v26 }
 0x826   : > { %v9027_v6 = vpop.eup %6178  ;;  %6204 = vpow2.f32 %v5121_v3  ;;  %v3803_v3 = vrot.slane %v3769_v19, 1 }
 0x827   : > { %v9029_v61 = vpop.eup %6180  ;;  %6206 = vpow2.f32 %v5124_v43  ;;  %v3851_v43 = vadd.f32 %v3791_v40, %v9995_v55 }
 0x828   : > { %v9031_v23 = vpop.eup %6182  ;;  %6208 = vpow2.f32 %v5127_v34 }
 0x829   : > { %v9034_v63 = vpop.eup %6184  ;;  %6210 = vpow2.f32 %v5130_v24 }
 0x82a   : > { %v9037_v56 = vpop.eup %6186  ;;  %6212 = vpow2.f32 %v5133_v8  ;;  %v9998_v8 = vld [vmem:[#allocation44_spill] sm:$0xff] }
 0x82b   : > { %v9040_v62 = vpop.eup %6188  ;;  %6214 = vpow2.f32 %v5136_v46  ;;  %v3863_v9 = vadd.f32 %v3769_v19, %v9998_v8  ;;  %v9999_v46 = vld [vmem:[#allocation45_spill] sm:$0xff] }
 0x82c   : > { %v9043_v34 = vpop.eup %6190  ;;  %6216 = vtanh.f32 %v3839_v31  ;;  %v3867_v50 = vadd.f32 %v3803_v3, %v9999_v46 }
 0x82d   : > { %v9046_v24 = vpop.eup %6192  ;;  %6218 = vtanh.f32 %v3843_v49 }
 0x82e   : > { %v9049_v57 = vpop.eup %6194  ;;  %6220 = vtanh.f32 %v3847_v35 }
 0x82f   : > { %v9052_v26 = vpop.eup %6196  ;;  %6222 = vtanh.f32 %v3851_v43 }
 0x830   : > { %v9055_v40 = vpop.eup %6198  ;;  %6224 = vtanh.f32 %v3855_v27 }
 0x831   : > { %v6201_v22 = vpop.eup %6200  ;;  %6226 = vtanh.f32 %v3859_v10 }
 0x832   : > { %v6203_v31 = vpop.eup %6202  ;;  %v3941_v16 = vadd.f32 1.0, %v6201_v22  ;;  %6228 = vtanh.f32 %v3863_v9 }
 0x833   : > { %v6205_v51 = vpop.eup %6204  ;;  %v3944_v49 = vadd.f32 1.0, %v6203_v31  ;;  %6230 = vtanh.f32 %v3867_v50 }
 0x834   : > { %v6207_v58 = vpop.eup %6206  ;;  %v3947_v55 = vadd.f32 1.0, %v6205_v51  ;;  %6232 = vrcp.f32 %v3941_v16  ;;  %v3942_v16 = vadd.f32 1.0, %v9014_v13  ;;  %v3945_v51 = vadd.f32 1.0, %v9017_v36 }
 0x835   : > { %v6209_v19 = vpop.eup %6208  ;;  %v3950_v35 = vadd.f32 1.0, %v6207_v58  ;;  %6234 = vrcp.f32 %v3944_v49  ;;  %v4030_v13 = vrot.slane %v8896_v12, 7  ;;  %v3957_v36 = vadd.f32 1.0, %v9027_v6 }
 0x836   : > { %v6211_v8 = vpop.eup %6210  ;;  %v3953_v3 = vadd.f32 1.0, %v6209_v19  ;;  %6236 = vrcp.f32 %v3947_v55  ;;  %v3948_v55 = vadd.f32 1.0, %v9020_v41  ;;  %v3951_v19 = vadd.f32 1.0, %v9023_v7 }
 0x837   : > { %v6213_v43 = vpop.eup %6212  ;;  %v3956_v46 = vadd.f32 1.0, %v6211_v8  ;;  %6238 = vrcp.f32 %v3950_v35  ;;  %v4033_v7 = vrot.slane %v8908_v53, 7 }
 0x838   : > { %v6215_v27 = vpop.eup %6214  ;;  %v3959_v10 = vadd.f32 1.0, %v6213_v43  ;;  %6240 = vrcp.f32 %v3953_v3  ;;  %v4028_v3 = vrot.slane %v8890_v4, 7  ;;  %v3954_v43 = vadd.f32 1.0, %v9025_v33 }
 0x839   : > { %v6217_v22 = vpop.eup %6216  ;;  %v3962_v9 = vadd.f32 1.0, %v6215_v27  ;;  %6242 = vrcp.f32 %v3956_v46  ;;  %v4029_v46 = vrot.slane %v8893_v11, 7  ;;  %v3963_v4 = vadd.f32 1.0, %v9031_v23 }
 0x83a   : > { %v6219_v31 = vpop.eup %6218  ;;  %6244 = vrcp.f32 %v3959_v10  ;;  %v4031_v10 = vrot.slane %v8900_v42, 7  ;;  %v4034_v33 = vrot.slane %v8911_v21, 7  ;;  %v4035_v42 = vrot.slane %v8914_v45, 7 }
 0x83b   : > { %v6221_v50 = vpop.eup %6220  ;;  %6246 = vrcp.f32 %v3962_v9  ;;  %v4032_v9 = vrot.slane %v8904_v38, 7  ;;  %v4053_v6 = vmul.f32 %v6219_v31, %v9040_v62 }
 0x83c   : > { %v6223_v58 = vpop.eup %6222  ;;  %6248 = vrcp.f32 %v3942_v16  ;;  %v4052_v16 = vmul.f32 %v6217_v22, %v9037_v56  ;;  %v4054_v53 = vmul.f32 %v6221_v50, %v9043_v34 }
 0x83d   : > { %v6225_v49 = vpop.eup %6224  ;;  %6250 = vrcp.f32 %v3945_v51  ;;  %v4055_v56 = vmul.f32 %v6223_v58, %v9046_v24 }
 0x83e   : > { %v6227_v8 = vpop.eup %6226  ;;  %6252 = vrcp.f32 %v3948_v55 }
 0x83f   : > { %v6229_v35 = vpop.eup %6228  ;;  %6254 = vrcp.f32 %v3951_v19 }
 0x840   : > { %v6231_v27 = vpop.eup %6230  ;;  %6256 = vrcp.f32 %v3954_v43  ;;  %v4058_v58 = vmul.f32 %v6229_v35, %v9034_v63 }
 0x841   : > { %v6233_v41 = vpop.eup %6232  ;;  %6258 = vrcp.f32 %v3957_v36 }
 0x842   : > { %v6235_v11 = vpop.eup %6234  ;;  %v4044_v12 = vmul.f32 %v6233_v41, %v4028_v3  ;;  %6260 = vrcp.f32 %v3963_v4  ;;  %v4056_v3 = vmul.f32 %v6225_v49, %v9049_v57  ;;  %v4059_v57 = vmul.f32 %v6231_v27, %v9055_v40 }
 0x843   : > { %v6237_v1 = vpop.eup %6236  ;;  %v4045_v51 = vmul.f32 %v6235_v11, %v4029_v46 }
 0x844   : > { %v6239_v38 = vpop.eup %6238  ;;  %v4046_v55 = vmul.f32 %v6237_v1, %v4030_v13  ;;  %v9075_v23 = vadd.f32 %v4052_v16, %v4044_v12  ;;  %v4057_v1 = vmul.f32 %v6227_v8, %v9052_v26  ;;  %v3960_v26 = vadd.f32 1.0, %v9029_v61 }
 0x845   : > { %v6241_v52 = vpop.eup %6240  ;;  %v4047_v21 = vmul.f32 %v6239_v38, %v4031_v10  ;;  %v9078_v22 = vadd.f32 %v4053_v6, %v4045_v51 }
 0x846   : > { %v6243_v19 = vpop.eup %6242  ;;  %v4048_v45 = vmul.f32 %v6241_v52, %v4032_v9  ;;  %v9081_v62 = vadd.f32 %v4054_v53, %v4046_v55  ;;  %6262 = vtanh.f32 %v9075_v23 }
 0x847   : > { %v6245_v31 = vpop.eup %6244  ;;  %v4049_v34 = vmul.f32 %v6243_v19, %v4033_v7  ;;  %v9085_v50 = vadd.f32 %v4055_v56, %v4047_v21  ;;  %6264 = vtanh.f32 %v9078_v22 }
 0x848   : > { %v6247_v46 = vpop.eup %6246  ;;  %v4050_v24 = vmul.f32 %v6245_v31, %v4034_v33  ;;  %v9089_v43 = vadd.f32 %v4056_v3, %v4048_v45  ;;  %6266 = vtanh.f32 %v9081_v62 }
 0x849   : > { %v4051_v52 = vmul.f32 %v6247_v46, %v4035_v42  ;;  %v9093_v49 = vadd.f32 %v4057_v1, %v4049_v34  ;;  %6268 = vtanh.f32 %v9085_v50  ;;  %v6249_v63 = vpop.eup %6248 }
 0x84a   : > { %v9097_v8 = vadd.f32 %v4058_v58, %v4050_v24  ;;  %6270 = vtanh.f32 %v9089_v43  ;;  %v6251_v35 = vpop.eup %6250 }
 0x84b   : > { %v9100_v13 = vadd.f32 %v4059_v57, %v4051_v52  ;;  %6272 = vtanh.f32 %v9093_v49  ;;  %v6253_v40 = vpop.eup %6252 }
 0x84c   : > { %6274 = vtanh.f32 %v9097_v8  ;;  %v6255_v27 = vpop.eup %6254 }
 0x84d   : > { %6276 = vtanh.f32 %v9100_v13  ;;  %v6257_v10 = vpop.eup %6256 }
 0x84e   : > { %6278 = vrcp.f32 %v3960_v26  ;;  %v6259_v36 = vpop.eup %6258 }
 0x84f   : > { %v6261_v61 = vpop.eup %6260 }
 0x853   : > { %v6263_v41 = vpop.eup %6262 }
 0x854   : > { %v6265_v9 = vpop.eup %6264  ;;  %v4076_v7 = vmul.f32 %v6263_v41, %v6249_v63 }
 0x855   : > { %v6267_v4 = vpop.eup %6266  ;;  %v4077_v11 = vmul.f32 %v6265_v9, %v6251_v35 }
 0x856   : > { %v6269_v33 = vpop.eup %6268  ;;  %v4078_v16 = vmul.f32 %v6267_v4, %v6253_v40  ;;  %v4092_v12 = vrot.slane %v4076_v7, 6 }
 0x857   : > { %v6271_v42 = vpop.eup %6270  ;;  %v4079_v6 = vmul.f32 %v6269_v33, %v6255_v27  ;;  %v4093_v51 = vrot.slane %v4077_v11, 5 }
 0x858   : > { %v6273_v38 = vpop.eup %6272  ;;  %v4080_v53 = vmul.f32 %v6271_v42, %v6257_v10  ;;  %v4095_v55 = vrot.slane %v4078_v16, 4 }
 0x859   : > { %v6275_v21 = vpop.eup %6274  ;;  %v4081_v56 = vmul.f32 %v6273_v38, %v6259_v36  ;;  %v4094_v19 = vsel %vm1218_vm1, %v4093_v51, %v4092_v12  ;;  %v4097_v45 = vrot.slane %v4079_v6, 3 }
 0x85a   : > { %v6277_v3 = vpop.eup %6276  ;;  %v4096_v31 = vsel %vm1221_vm2, %v4095_v55, %v4094_v19  ;;  %v4099_v34 = vrot.slane %v4080_v53, 2 }
 0x85b   : > { %v6279_v1 = vpop.eup %6278  ;;  %v4083_v46 = vmul.f32 %v6277_v3, %v6261_v61  ;;  %v4098_v24 = vsel %vm1224_vm3, %v4097_v45, %v4096_v31  ;;  %v4101_v58 = vrot.slane %v4081_v56, 1 }
 0x85c   : > { %v4082_v52 = vmul.f32 %v6279_v1, %v6275_v21  ;;  %v4100_v57 = vsel %vm1227_vm4, %v4099_v34, %v4098_v24 }
 0x85d   : > { %v4102_v26 = vsel %vm1230_vm5, %v4101_v58, %v4100_v57  ;;  %v4104_v63 = vrot.slane %v4083_v46, 7 }
 0x85e   : > { %v4103_v35 = vsel %vm1233_vm6, %v4082_v52, %v4102_v26 }
 0x85f   : > { %v4105_v40 = vsel %vm1236_vm7, %v4104_v63, %v4103_v35 }
 0x860   : > { %v9113_v27 = vadd.f32 %v4105_v40, %v8927_v20  ;;  %4173 = vmatmul.mubr.f32.vlgmr.msra.gmra.mxu0 %v4105_v40  ;;  %4244 = vmatmul.mubr.f32.vlgmr.msra.gmra.mxu1 %v4105_v40 }
 0x920   : > { %v4174_v10 = vpop.f32.mrf.mxu0  ;;  %v4245_v53 = vpop.f32.mrf.mxu1 }
 0x921   : > { %v4254_v36 = vrot.slane %v4174_v10, 1  ;;  %v4258_v61 = vrot.slane %v4174_v10, 2  ;;  %v4262_v41 = vrot.slane %v4174_v10, 3  ;;  %v4266_v9 = vrot.slane %v4174_v10, 4 }
 0x922   : > { %v4342_v7 = vadd.f32 %v4174_v10, %v7414_v17  ;;  %v4270_v4 = vrot.slane %v4174_v10, 5  ;;  %v4274_v33 = vrot.slane %v4174_v10, 6  ;;  %v4278_v12 = vrot.slane %v4174_v10, 7 }
 0x923   : > { %v4314_v11 = vadd.f32 %v4254_v36, %v7391_v60  ;;  %v4318_v16 = vadd.f32 %v4258_v61, %v9974_v59  ;;  %v4322_v42 = vadd.f32 %v4262_v41, %v7396_v0  ;;  %v4326_v20 = vadd.f32 %v4266_v9, %v9842_v28  ;;  %v4176_v36 = vpop.f32.mrf.mxu0 }
 0x924   : > { %v5159_v6 = vmul.f32 -1.442695, %v4342_v7  ;;  %v4330_v51 = vadd.f32 %v4270_v4, %v7400_v2  ;;  %v4334_v55 = vadd.f32 %v4274_v33, %v9975_v37  ;;  %v4338_v17 = vadd.f32 %v4278_v12, %v7411_v54 }
 0x925   : > { %v5138_v38 = vmul.f32 -1.442695, %v4314_v11  ;;  %v5141_v21 = vmul.f32 -1.442695, %v4318_v16  ;;  %v5144_v56 = vmul.f32 -1.442695, %v4322_v42  ;;  %v4344_v35 = vadd.f32 %v4245_v53, %v9983_v32 }
 0x926   : > { %v5147_v60 = vmul.f32 -1.442695, %v4326_v20  ;;  %6280 = vpow2.f32 %v5159_v6  ;;  %v4256_v19 = vrot.slane %v4245_v53, 1  ;;  %v5150_v59 = vmul.f32 -1.442695, %v4330_v51 }
 0x927   : > { %6282 = vpow2.f32 %v5138_v38  ;;  %v4260_v45 = vrot.slane %v4245_v53, 2  ;;  %v5153_v0 = vmul.f32 -1.442695, %v4334_v55  ;;  %v4264_v28 = vrot.slane %v4245_v53, 3 }
 0x928   : > { %6284 = vpow2.f32 %v5141_v21  ;;  %v5156_v3 = vmul.f32 -1.442695, %v4338_v17  ;;  %v4268_v2 = vrot.slane %v4245_v53, 4  ;;  %v4272_v31 = vrot.slane %v4245_v53, 5 }
 0x929   : > { %6286 = vpow2.f32 %v5144_v56  ;;  %v4316_v37 = vadd.f32 %v4256_v19, %v9976_v15  ;;  %v4276_v34 = vrot.slane %v4245_v53, 6  ;;  %v4320_v54 = vadd.f32 %v4260_v45, %v9977_v44 }
 0x92a   : > { %6288 = vpow2.f32 %v5147_v60  ;;  %v4280_v1 = vrot.slane %v4245_v53, 7  ;;  %v4324_v46 = vadd.f32 %v4264_v28, %v9978_v25  ;;  %v4328_v24 = vadd.f32 %v4268_v2, %v9979_v48 }
 0x92b   : > { %6290 = vpow2.f32 %v5150_v59  ;;  %v4332_v58 = vadd.f32 %v4272_v31, %v9980_v30  ;;  %v5140_v52 = vmul.f32 -1.442695, %v4316_v37  ;;  %v4336_v57 = vadd.f32 %v4276_v34, %v9981_v14 }
 0x92c   : > { %6292 = vpow2.f32 %v5153_v0  ;;  %v5143_v26 = vmul.f32 -1.442695, %v4320_v54  ;;  %v4340_v63 = vadd.f32 %v4280_v1, %v9982_v39  ;;  %v5146_v15 = vmul.f32 -1.442695, %v4324_v46  ;;  %v10000_v0 = vld [vmem:[#allocation34_spill] sm:$0xff]  ;;  %v10002_v54 = vld [vmem:[#allocation36_spill] sm:$0xff] }
 0x92d   : > { %6294 = vpow2.f32 %v5156_v3  ;;  %v5149_v40 = vmul.f32 -1.442695, %v4328_v24  ;;  %v5152_v44 = vmul.f32 -1.442695, %v4332_v58  ;;  %v5155_v25 = vmul.f32 -1.442695, %v4336_v57 }
 0x92e   : > { %6296 = vpow2.f32 %v5140_v52  ;;  %v5158_v48 = vmul.f32 -1.442695, %v4340_v63  ;;  %v5161_v41 = vmul.f32 -1.442695, %v4344_v35  ;;  %v4255_v39 = vrot.slane %v4176_v36, 1 }
 0x92f   : > { %6298 = vpow2.f32 %v5143_v26  ;;  %v4259_v32 = vrot.slane %v4176_v36, 2  ;;  %v4263_v16 = vrot.slane %v4176_v36, 3  ;;  %v4267_v20 = vrot.slane %v4176_v36, 4 }
 0x930   : > { %6300 = vpow2.f32 %v5146_v15  ;;  %v4271_v38 = vrot.slane %v4176_v36, 5  ;;  %v4315_v53 = vadd.f32 %v4255_v39, %v9984_v47  ;;  %v4275_v21 = vrot.slane %v4176_v36, 6  ;;  %v10001_v47 = vld [vmem:[#allocation35_spill] sm:$0xff] }
 0x931   : > { %6302 = vpow2.f32 %v5149_v40  ;;  %v4319_v17 = vadd.f32 %v4259_v32, %v9985_v29  ;;  %v4279_v60 = vrot.slane %v4176_v36, 7  ;;  %v4323_v19 = vadd.f32 %v4263_v16, %v9986_v18  ;;  %v4247_v29 = vpop.f32.mrf.mxu1 }
 0x932   : > { %6304 = vpow2.f32 %v5152_v44  ;;  %v4327_v45 = vadd.f32 %v4267_v20, %v9987_v5  ;;  %v4331_v28 = vadd.f32 %v4271_v38, %v10000_v0  ;;  %v5139_v3 = vmul.f32 -1.442695, %v4315_v53  ;;  %v10003_v5 = vld [vmem:[#allocation37_spill] sm:$0xff] }
 0x933   : > { %v6281_v10 = vpop.eup %6280  ;;  %6306 = vpow2.f32 %v5155_v25  ;;  %v4335_v31 = vadd.f32 %v4275_v21, %v10001_v47  ;;  %v5142_v37 = vmul.f32 -1.442695, %v4319_v17  ;;  %v4339_v18 = vadd.f32 %v4279_v60, %v10002_v54 }
 0x934   : > { %v6283_v61 = vpop.eup %6282  ;;  %v4439_v9 = vadd.f32 1.0, %v6281_v10  ;;  %6308 = vpow2.f32 %v5158_v48  ;;  %v5145_v1 = vmul.f32 -1.442695, %v4323_v19  ;;  %v4343_v24 = vadd.f32 %v4176_v36, %v10003_v5 }
 0x935   : > { %v6285_v30 = vpop.eup %6284  ;;  %v4418_v4 = vadd.f32 1.0, %v6283_v61  ;;  %6310 = vpow2.f32 %v5161_v41  ;;  %v5148_v58 = vmul.f32 -1.442695, %v4327_v45  ;;  %v5151_v57 = vmul.f32 -1.442695, %v4331_v28  ;;  %v10004_v41 = vld [vmem:[#allocation38_spill] sm:$0xff] }
 0x936   : > { %v6287_v14 = vpop.eup %6286  ;;  %v4421_v33 = vadd.f32 1.0, %v6285_v30  ;;  %6312 = vrcp.f32 %v4439_v9  ;;  %v4257_v26 = vrot.slane %v4247_v29, 1  ;;  %v5154_v15 = vmul.f32 -1.442695, %v4335_v31 }
 0x937   : > { %v6289_v7 = vpop.eup %6288  ;;  %v4424_v42 = vadd.f32 1.0, %v6287_v14  ;;  %6314 = vrcp.f32 %v4418_v4  ;;  %v4261_v35 = vrot.slane %v4247_v29, 2  ;;  %v5157_v44 = vmul.f32 -1.442695, %v4339_v18 }
 0x938   : > { %v6291_v11 = vpop.eup %6290  ;;  %v4427_v51 = vadd.f32 1.0, %v6289_v7  ;;  %6316 = vrcp.f32 %v4421_v33  ;;  %v4265_v10 = vrot.slane %v4247_v29, 3  ;;  %v5160_v36 = vmul.f32 -1.442695, %v4343_v24  ;;  %v10005_v7 = vld [vmem:[#allocation39_spill] sm:$0xff]  ;;  %v10006_v33 = vld [vmem:[#allocation40_spill] sm:$0xff] }
 0x939   : > { %v6293_v12 = vpop.eup %6292  ;;  %v4430_v55 = vadd.f32 1.0, %v6291_v11  ;;  %6318 = vrcp.f32 %v4424_v42  ;;  %v4269_v61 = vrot.slane %v4247_v29, 4  ;;  %v4273_v30 = vrot.slane %v4247_v29, 5  ;;  %v10007_v42 = vld [vmem:[#allocation41_spill] sm:$0xff] }
 0x93a   : > { %v6295_v6 = vpop.eup %6294  ;;  %v4433_v56 = vadd.f32 1.0, %v6293_v12  ;;  %6320 = vrcp.f32 %v4427_v51  ;;  %v4317_v14 = vadd.f32 %v4257_v26, %v10004_v41  ;;  %v4277_v39 = vrot.slane %v4247_v29, 6  ;;  %v10008_v51 = vld [vmem:[#allocation42_spill] sm:$0xff] }
 0x93b   : > { %v4436_v59 = vadd.f32 1.0, %v6295_v6  ;;  %v9136_v2 = vpop.eup %6296  ;;  %6322 = vrcp.f32 %v4430_v55  ;;  %v4321_v4 = vadd.f32 %v4261_v35, %v10005_v7  ;;  %v4281_v11 = vrot.slane %v4247_v29, 7  ;;  %v10009_v55 = vld [vmem:[#allocation43_spill] sm:$0xff] }
 0x93c   : > { %v9139_v34 = vpop.eup %6298  ;;  %6324 = vrcp.f32 %v4433_v56  ;;  %v4325_v16 = vadd.f32 %v4265_v10, %v10006_v33  ;;  %v4329_v20 = vadd.f32 %v4269_v61, %v10007_v42  ;;  %v4333_v38 = vadd.f32 %v4273_v30, %v10008_v51  ;;  %v10010_v56 = vld [vmem:[#allocation44_spill] sm:$0xff] }
 0x93d   : > { %v9142_v46 = vpop.eup %6300  ;;  %6326 = vrcp.f32 %v4436_v59  ;;  %v4337_v21 = vadd.f32 %v4277_v39, %v10009_v55  ;;  %v4341_v60 = vadd.f32 %v4281_v11, %v10010_v56  ;;  %v10011_v59 = vld [vmem:[#allocation45_spill] sm:$0xff]  ;;  %v4423_v10 = vadd.f32 1.0, %v9139_v34 }
 0x93e   : > { %v9145_v52 = vpop.eup %6302  ;;  %6328 = vpow2.f32 %v5139_v3  ;;  %v4345_v45 = vadd.f32 %v4247_v29, %v10011_v59  ;;  %v4426_v30 = vadd.f32 1.0, %v9142_v46  ;;  %v4508_v42 = vrot.slane %v9081_v62, 7 }
 0x93f   : > { %v9147_v63 = vpop.eup %6304  ;;  %6330 = vpow2.f32 %v5142_v37  ;;  %v4510_v51 = vrot.slane %v9089_v43, 7  ;;  %v4513_v55 = vrot.slane %v9100_v13, 7 }
 0x940   : > { %v9149_v40 = vpop.eup %6306  ;;  %6332 = vpow2.f32 %v5145_v1  ;;  %v4432_v7 = vadd.f32 1.0, %v9147_v63  ;;  %v4509_v63 = vrot.slane %v9085_v50, 7 }
 0x941   : > { %v9151_v25 = vpop.eup %6308  ;;  %6334 = vpow2.f32 %v5148_v58 }
 0x942   : > { %v9153_v48 = vpop.eup %6310  ;;  %6336 = vpow2.f32 %v5151_v57  ;;  %v4438_v34 = vadd.f32 1.0, %v9151_v25  ;;  %v4511_v25 = vrot.slane %v9093_v49, 7 }
 0x943   : > { %v9156_v9 = vpop.eup %6312  ;;  %6338 = vpow2.f32 %v5154_v15  ;;  %v4420_v15 = vadd.f32 1.0, %v9136_v2  ;;  %v4441_v46 = vadd.f32 1.0, %v9153_v48 }
 0x944   : > { %v9159_v32 = vpop.eup %6314  ;;  %6340 = vpow2.f32 %v5157_v44 }
 0x945   : > { %v9162_v12 = vpop.eup %6316  ;;  %6342 = vpow2.f32 %v5160_v36 }
 0x946   : > { %v9165_v6 = vpop.eup %6318  ;;  %6344 = vtanh.f32 %v4317_v14  ;;  %v4429_v14 = vadd.f32 1.0, %v9145_v52 }
 0x947   : > { %v9168_v53 = vpop.eup %6320  ;;  %6346 = vtanh.f32 %v4321_v4  ;;  %v4435_v4 = vadd.f32 1.0, %v9149_v40 }
 0x948   : > { %v9171_v17 = vpop.eup %6322  ;;  %6348 = vtanh.f32 %v4325_v16  ;;  %v4506_v16 = vrot.slane %v9075_v23, 7 }
 0x949   : > { %v9174_v19 = vpop.eup %6324  ;;  %6350 = vtanh.f32 %v4329_v20  ;;  %v4507_v20 = vrot.slane %v9078_v22, 7 }
 0x94a   : > { %v9177_v0 = vpop.eup %6326  ;;  %6352 = vtanh.f32 %v4333_v38  ;;  %v4512_v38 = vrot.slane %v9097_v8, 7 }
 0x94b   : > { %v6329_v28 = vpop.eup %6328  ;;  %6354 = vtanh.f32 %v4337_v21 }
 0x94c   : > { %v6331_v3 = vpop.eup %6330  ;;  %v4419_v47 = vadd.f32 1.0, %v6329_v28  ;;  %6356 = vtanh.f32 %v4341_v60 }
 0x94d   : > { %v6333_v31 = vpop.eup %6332  ;;  %v4422_v37 = vadd.f32 1.0, %v6331_v3  ;;  %6358 = vtanh.f32 %v4345_v45 }
 0x94e   : > { %v6335_v54 = vpop.eup %6334  ;;  %v4425_v18 = vadd.f32 1.0, %v6333_v31  ;;  %6360 = vrcp.f32 %v4419_v47 }
 0x94f   : > { %v6337_v1 = vpop.eup %6336  ;;  %v4428_v5 = vadd.f32 1.0, %v6335_v54  ;;  %6362 = vrcp.f32 %v4422_v37 }
 0x950   : > { %v6339_v24 = vpop.eup %6338  ;;  %v4431_v29 = vadd.f32 1.0, %v6337_v1  ;;  %6364 = vrcp.f32 %v4425_v18 }
 0x951   : > { %v6341_v58 = vpop.eup %6340  ;;  %v4434_v57 = vadd.f32 1.0, %v6339_v24  ;;  %6366 = vrcp.f32 %v4428_v5 }
 0x952   : > { %v6343_v26 = vpop.eup %6342  ;;  %v4437_v35 = vadd.f32 1.0, %v6341_v58  ;;  %6368 = vrcp.f32 %v4431_v29 }
 0x953   : > { %v6345_v44 = vpop.eup %6344  ;;  %v4440_v36 = vadd.f32 1.0, %v6343_v26  ;;  %6370 = vrcp.f32 %v4434_v57 }
 0x954   : > { %v6347_v61 = vpop.eup %6346  ;;  %6372 = vrcp.f32 %v4437_v35  ;;  %v4530_v62 = vmul.f32 %v6345_v44, %v9159_v32 }
 0x955   : > { %v6349_v41 = vpop.eup %6348  ;;  %6374 = vrcp.f32 %v4440_v36  ;;  %v4531_v22 = vmul.f32 %v6347_v61, %v9162_v12 }
 0x956   : > { %v6351_v39 = vpop.eup %6350  ;;  %6376 = vrcp.f32 %v4420_v15  ;;  %v4532_v56 = vmul.f32 %v6349_v41, %v9165_v6 }
 0x957   : > { %v6353_v2 = vpop.eup %6352  ;;  %6378 = vrcp.f32 %v4423_v10  ;;  %v4533_v49 = vmul.f32 %v6351_v39, %v9168_v53 }
 0x958   : > { %v6355_v11 = vpop.eup %6354  ;;  %6380 = vrcp.f32 %v4426_v30  ;;  %v4534_v8 = vmul.f32 %v6353_v2, %v9171_v17 }
 0x959   : > { %v6357_v33 = vpop.eup %6356  ;;  %6382 = vrcp.f32 %v4429_v14  ;;  %v4535_v28 = vmul.f32 %v6355_v11, %v9174_v19 }
 0x95a   : > { %v6359_v52 = vpop.eup %6358  ;;  %6384 = vrcp.f32 %v4432_v7  ;;  %v4536_v32 = vmul.f32 %v6357_v33, %v9177_v0 }
 0x95b   : > { %v6361_v40 = vpop.eup %6360  ;;  %6386 = vrcp.f32 %v4435_v4  ;;  %v4537_v12 = vmul.f32 %v6359_v52, %v9156_v9 }
 0x95c   : > { %v6363_v48 = vpop.eup %6362  ;;  %6388 = vrcp.f32 %v4438_v34  ;;  %v4522_v23 = vmul.f32 %v6361_v40, %v4506_v16 }
 0x95d   : > { %v6365_v21 = vpop.eup %6364  ;;  %6390 = vrcp.f32 %v4441_v46  ;;  %v4523_v50 = vmul.f32 %v6363_v48, %v4507_v20 }
 0x95e   : > { %v6367_v43 = vpop.eup %6366  ;;  %v4524_v60 = vmul.f32 %v6365_v21, %v4508_v42  ;;  %v4538_v59 = vadd.f32 %v4530_v62, %v4522_v23 }
 0x95f   : > { %v6369_v45 = vpop.eup %6368  ;;  %v4525_v13 = vmul.f32 %v6367_v43, %v4509_v63  ;;  %v4539_v3 = vadd.f32 %v4531_v22, %v4523_v50 }
 0x960   : > { %v6371_v47 = vpop.eup %6370  ;;  %v4526_v31 = vmul.f32 %v6369_v45, %v4510_v51  ;;  %v4540_v37 = vadd.f32 %v4532_v56, %v4524_v60  ;;  %6392 = vtanh.f32 %v4538_v59  ;;  %4626 = vst [vmem:[#allocation3 - $0x7] sm:$0x80] %v4538_v59 }
 0x961   : > { %v6373_v6 = vpop.eup %6372  ;;  %v4527_v54 = vmul.f32 %v6371_v47, %v4511_v25  ;;  %v4541_v53 = vadd.f32 %v4533_v49, %v4525_v13  ;;  %6394 = vtanh.f32 %v4539_v3  ;;  %v4611_v17 = vrot.slane %v4539_v3, 7 }
 0x962   : > { %v6375_v18 = vpop.eup %6374  ;;  %v4528_v1 = vmul.f32 %v6373_v6, %v4512_v38  ;;  %v4542_v5 = vadd.f32 %v4534_v8, %v4526_v31  ;;  %6396 = vtanh.f32 %v4540_v37  ;;  %v4612_v19 = vrot.slane %v4540_v37, 6 }
 0x963   : > { %v6377_v24 = vpop.eup %6376  ;;  %v4529_v0 = vmul.f32 %v6375_v18, %v4513_v55  ;;  %v4543_v29 = vadd.f32 %v4535_v28, %v4527_v54  ;;  %6398 = vtanh.f32 %v4541_v53  ;;  %v4614_v58 = vrot.slane %v4541_v53, 5 }
 0x964   : > { %v6379_v57 = vpop.eup %6378  ;;  %v4544_v9 = vadd.f32 %v4536_v32, %v4528_v1  ;;  %6400 = vtanh.f32 %v4542_v5  ;;  %v4613_v26 = vsel %vm1218_vm1, %v4612_v19, %v4611_v17  ;;  %v4616_v15 = vrot.slane %v4542_v5, 4 }
 0x965   : > { %v6381_v35 = vpop.eup %6380  ;;  %v4545_v44 = vadd.f32 %v4537_v12, %v4529_v0  ;;  %6402 = vtanh.f32 %v4543_v29  ;;  %v4615_v10 = vsel %vm1221_vm2, %v4614_v58, %v4613_v26  ;;  %v4618_v36 = vrot.slane %v4543_v29, 3 }
 0x966   : > { %v6383_v61 = vpop.eup %6382  ;;  %6404 = vtanh.f32 %v4544_v9  ;;  %v4617_v30 = vsel %vm1224_vm3, %v4616_v15, %v4615_v10  ;;  %v4620_v41 = vrot.slane %v4544_v9, 2 }
 0x967   : > { %v6385_v14 = vpop.eup %6384  ;;  %6406 = vtanh.f32 %v4545_v44  ;;  %v4619_v39 = vsel %vm1227_vm4, %v4618_v36, %v4617_v30  ;;  %v4622_v7 = vrot.slane %v4545_v44, 1 }
 0x968   : > { %v6387_v2 = vpop.eup %6386  ;;  %v4621_v4 = vsel %vm1230_vm5, %v4620_v41, %v4619_v39 }
 0x969   : > { %v6389_v11 = vpop.eup %6388  ;;  %v4623_v34 = vsel %vm1233_vm6, %v4622_v7, %v4621_v4 }
 0x96a   : > { %v6391_v33 = vpop.eup %6390  ;;  %4627 = vst [vmem:[#allocation3 + $0x1] sm:$0x7f] %v4623_v34 }
 0x96d   : > { %v6393_v46 = vpop.eup %6392 }
 0x96e   : > { %v6395_v16 = vpop.eup %6394  ;;  %v4554_v52 = vmul.f32 %v6393_v46, %v6377_v24 }
 0x96f   : > { %v6397_v42 = vpop.eup %6396  ;;  %v4555_v63 = vmul.f32 %v6395_v16, %v6379_v57 }
 0x970   : > { %v6399_v20 = vpop.eup %6398  ;;  %v4556_v40 = vmul.f32 %v6397_v42, %v6381_v35  ;;  %v4570_v51 = vrot.slane %v4554_v52, 7  ;;  %4601 = vst [vmem:[#allocation2 - $0x7] sm:$0x80] %v4554_v52 }
 0x971   : > { %v6401_v25 = vpop.eup %6400  ;;  %v4557_v38 = vmul.f32 %v6399_v20, %v6383_v61  ;;  %v4571_v48 = vrot.slane %v4555_v63, 6  ;;  %v4586_v55 = vrot.slane %v4555_v63, 7 }
 0x972   : > { %v6403_v23 = vpop.eup %6402  ;;  %v4558_v62 = vmul.f32 %v6401_v25, %v6385_v14  ;;  %v4573_v21 = vrot.slane %v4556_v40, 5  ;;  %v4587_v50 = vrot.slane %v4556_v40, 6 }
 0x973   : > { %v6405_v22 = vpop.eup %6404  ;;  %v4559_v56 = vmul.f32 %v6403_v23, %v6387_v2  ;;  %v4572_v43 = vsel %vm1218_vm1, %v4571_v48, %v4570_v51  ;;  %v4575_v60 = vrot.slane %v4557_v38, 4  ;;  %v4589_v49 = vrot.slane %v4557_v38, 5 }
 0x974   : > { %v6407_v8 = vpop.eup %6406  ;;  %v4560_v59 = vmul.f32 %v6405_v22, %v6389_v11  ;;  %v4574_v45 = vsel %vm1221_vm2, %v4573_v21, %v4572_v43  ;;  %v4577_v13 = vrot.slane %v4558_v62, 3  ;;  %v4588_v28 = vsel %vm1218_vm1, %v4587_v50, %v4586_v55 }
 0x975   : > { %v4561_v32 = vmul.f32 %v6407_v8, %v6391_v33  ;;  %v4576_v3 = vsel %vm1224_vm3, %v4575_v60, %v4574_v45  ;;  %v4579_v47 = vrot.slane %v4559_v56, 2  ;;  %v4590_v31 = vsel %vm1221_vm2, %v4589_v49, %v4588_v28 }
 0x976   : > { %v4578_v12 = vsel %vm1227_vm4, %v4577_v13, %v4576_v3  ;;  %v4581_v37 = vrot.slane %v4560_v59, 1  ;;  %v4591_v6 = vrot.slane %v4558_v62, 4  ;;  %v4593_v53 = vrot.slane %v4559_v56, 3 }
 0x977   : > { %v4580_v54 = vsel %vm1230_vm5, %v4579_v47, %v4578_v12  ;;  %v4595_v1 = vrot.slane %v4560_v59, 2  ;;  %v4597_v24 = vrot.slane %v4561_v32, 1 }
 0x978   : > { %v4582_v17 = vsel %vm1233_vm6, %v4581_v37, %v4580_v54  ;;  %v4592_v18 = vsel %vm1224_vm3, %v4591_v6, %v4590_v31  ;;  %4632 = sbr.rel (%p5162_p1) target bundleno = 3039 (0xbdf), region = 80 }
 0x979   : > { %v4583_v5 = vsel %vm1236_vm7, %v4561_v32, %v4582_v17  ;;  %v4594_v19 = vsel %vm1227_vm4, %v4593_v53, %v4592_v18 }
 0x97a   : > { %v9221_v0 = vadd.f32 %v4583_v5, %v9113_v27  ;;  %v4596_v29 = vsel %vm1230_vm5, %v4595_v1, %v4594_v19 }
 0x97b   : > { %v4598_v58 = vsel %vm1233_vm6, %v4597_v24, %v4596_v29 }
 0x97c   : > { %4602 = vst [vmem:[#allocation2 + $0x1] sm:$0x7f] %v4598_v58  ;;  %4628 = vst [vmem:[#allocation4] sm:$0xff] %v9221_v0 }
 0x97d   : > { %v4648_v57 = vld [vmem:[#allocation11 + $0x78] sm:$0xff]  ;;  %v6837_v9 = vmov 0.0   ;;  %v4647_v26 = vld [vmem:[#allocation11 + $0x70] sm:$0xff]  ;;  %vm6838_vm8 = vmmov 0   ;;  %v4646_v27 = vld [vmem:[#allocation11 + $0x68] sm:$0xff] }
 0x97e   : > { %5203 = vmatprep.subr.mxu0 %v6837_v9  ;;  %5235 = vmatprep.mubr.msk.f32.mxu0 %vm6838_vm8, %v6837_v9  ;;  %v4645_v15 = vld [vmem:[#allocation11 + $0x60] sm:$0xff]  ;;  %v4742_v35 = vld [vmem:[#allocation13 + $0x78] sm:$0xff]  ;;  %v4741_v44 = vld [vmem:[#allocation13 + $0x70] sm:$0xff] }
 0x97f   : > { %5204 = vmatpush3.msra.mxu0 %v4648_v57  ;;  %5238 = vmatprep.subr.mxu1 %v6837_v9  ;;  %v4644_v10 = vld [vmem:[#allocation11 + $0x58] sm:$0xff]  ;;  %v4740_v36 = vld [vmem:[#allocation13 + $0x68] sm:$0xff]  ;;  %v4643_v61 = vld [vmem:[#allocation11 + $0x50] sm:$0xff] }
 0x980   : > { %5205 = vmatprep.subr.mxu0 %v6837_v9  ;;  %5270 = vmatprep.mubr.msk.f32.mxu1 %vm6838_vm8, %v6837_v9  ;;  %v4739_v30 = vld [vmem:[#allocation13 + $0x60] sm:$0xff]  ;;  %v4642_v41 = vld [vmem:[#allocation11 + $0x48] sm:$0xff]  ;;  %v4738_v14 = vld [vmem:[#allocation13 + $0x58] sm:$0xff] }
 0x981   : > { %5206 = vmatpush3.msra.mxu0 %v4647_v26  ;;  %5239 = vmatpush3.msra.mxu1 %v4742_v35  ;;  %v4641_v39 = vld [vmem:[#allocation11 + $0x40] sm:$0xff]  ;;  %v4737_v7 = vld [vmem:[#allocation13 + $0x50] sm:$0xff]  ;;  %v4640_v2 = vld [vmem:[#allocation11 + $0x38] sm:$0xff] }
 0x982   : > { %5207 = vmatprep.subr.mxu0 %v6837_v9  ;;  %5240 = vmatprep.subr.mxu1 %v6837_v9  ;;  %v4736_v4 = vld [vmem:[#allocation13 + $0x48] sm:$0xff]  ;;  %v4639_v11 = vld [vmem:[#allocation11 + $0x30] sm:$0xff]  ;;  %v4637_v33 = vld [vmem:[#allocation11 + $0x20] sm:$0xff] }
 0x983   : > { %5208 = vmatpush3.msra.mxu0 %v4646_v27  ;;  %5241 = vmatpush3.msra.mxu1 %v4741_v44  ;;  %v4638_v34 = vld [vmem:[#allocation11 + $0x28] sm:$0xff]  ;;  %v4636_v46 = vld [vmem:[#allocation11 + $0x18] sm:$0xff]  ;;  %v4635_v16 = vld [vmem:[#allocation11 + $0x10] sm:$0xff] }
 0x984   : > { %5209 = vmatprep.subr.mxu0 %v6837_v9  ;;  %5242 = vmatprep.subr.mxu1 %v6837_v9  ;;  %v4634_v52 = vld [vmem:[#allocation11 + $0x8] sm:$0xff]  ;;  %v4633_v42 = vld [vmem:[#allocation11] sm:$0xff]  ;;  %v4734_v20 = vld [vmem:[#allocation13 + $0x38] sm:$0xff] }
 0x985   : > { %5210 = vmatpush3.msra.mxu0 %v4645_v15  ;;  %5243 = vmatpush3.msra.mxu1 %v4740_v36  ;;  %v4735_v63 = vld [vmem:[#allocation13 + $0x40] sm:$0xff]  ;;  %v4733_v40 = vld [vmem:[#allocation13 + $0x30] sm:$0xff]  ;;  %v4732_v51 = vld [vmem:[#allocation13 + $0x28] sm:$0xff] }
 0x986   : > { %5211 = vmatprep.subr.mxu0 %v6837_v9  ;;  %5244 = vmatprep.subr.mxu1 %v6837_v9  ;;  %v4731_v25 = vld [vmem:[#allocation13 + $0x20] sm:$0xff]  ;;  %v4730_v38 = vld [vmem:[#allocation13 + $0x18] sm:$0xff]  ;;  %v4729_v48 = vld [vmem:[#allocation13 + $0x10] sm:$0xff] }
 0x987   : > { %5212 = vmatpush3.msra.mxu0 %v4644_v10  ;;  %5245 = vmatpush3.msra.mxu1 %v4739_v30  ;;  %v4728_v55 = vld [vmem:[#allocation13 + $0x8] sm:$0xff]  ;;  %v4727_v23 = vld [vmem:[#allocation13] sm:$0xff] }
 0x988   : > { %5213 = vmatprep.subr.mxu0 %v6837_v9  ;;  %5246 = vmatprep.subr.mxu1 %v6837_v9  ;;  %v5163_v62 = vld [vmem:[%s9308_s5] ss:$0 sm:$0xff] }
 0x989   : > { %5214 = vmatpush3.msra.mxu0 %v4643_v61  ;;  %5247 = vmatpush3.msra.mxu1 %v4738_v14  ;;  %v5164_v43 = vld [vmem:[%s9310_s7] ss:$0 sm:$0xff] }
 0x98a   : > { %5215 = vmatprep.subr.mxu0 %v6837_v9  ;;  %5248 = vmatprep.subr.mxu1 %v6837_v9 }
 0x98b   : > { %5216 = vmatpush3.msra.mxu0 %v4642_v41  ;;  %5249 = vmatpush3.msra.mxu1 %v4737_v7 }
 0x98c   : > { %5217 = vmatprep.subr.mxu0 %v6837_v9  ;;  %5250 = vmatprep.subr.mxu1 %v6837_v9 }
 0x98d   : > { %5218 = vmatpush3.msra.mxu0 %v4641_v39  ;;  %5251 = vmatpush3.msra.mxu1 %v4736_v4 }
 0x98e   : > { %5219 = vmatprep.subr.mxu0 %v6837_v9  ;;  %5252 = vmatprep.subr.mxu1 %v6837_v9 }
 0x98f   : > { %5220 = vmatpush3.msra.mxu0 %v4640_v2  ;;  %5253 = vmatpush3.msra.mxu1 %v4735_v63 }
 0x990   : > { %5221 = vmatprep.subr.mxu0 %v6837_v9  ;;  %5254 = vmatprep.subr.mxu1 %v6837_v9 }
 0x991   : > { %5222 = vmatpush3.msra.mxu0 %v4639_v11  ;;  %5255 = vmatpush3.msra.mxu1 %v4734_v20 }
 0x992   : > { %5223 = vmatprep.subr.mxu0 %v6837_v9  ;;  %5256 = vmatprep.subr.mxu1 %v6837_v9 }
 0x993   : > { %5224 = vmatpush3.msra.mxu0 %v4638_v34  ;;  %5257 = vmatpush3.msra.mxu1 %v4733_v40 }
 0x994   : > { %5225 = vmatprep.subr.mxu0 %v6837_v9  ;;  %5258 = vmatprep.subr.mxu1 %v6837_v9 }
 0x995   : > { %5226 = vmatpush3.msra.mxu0 %v4637_v33  ;;  %5259 = vmatpush3.msra.mxu1 %v4732_v51 }
 0x996   : > { %5227 = vmatprep.subr.mxu0 %v6837_v9  ;;  %5260 = vmatprep.subr.mxu1 %v6837_v9 }
 0x997   : > { %5228 = vmatpush3.msra.mxu0 %v4636_v46  ;;  %5261 = vmatpush3.msra.mxu1 %v4731_v25 }
 0x998   : > { %5229 = vmatprep.subr.mxu0 %v6837_v9  ;;  %5262 = vmatprep.subr.mxu1 %v6837_v9 }
 0x999   : > { %5230 = vmatpush3.msra.mxu0 %v4635_v16  ;;  %5263 = vmatpush3.msra.mxu1 %v4730_v38 }
 0x99a   : > { %5231 = vmatprep.subr.mxu0 %v6837_v9  ;;  %5264 = vmatprep.subr.mxu1 %v6837_v9 }
 0x99b   : > { %5232 = vmatpush3.msra.mxu0 %v4634_v52  ;;  %5265 = vmatpush3.msra.mxu1 %v4729_v48 }
 0x99c   : > { %5233 = vmatprep.subr.mxu0 %v6837_v9  ;;  %5266 = vmatprep.subr.mxu1 %v6837_v9 }
 0x99d   : > { %5234 = vmatpush3.msra.mxu0 %v4633_v42  ;;  %5267 = vmatpush3.msra.mxu1 %v4728_v55 }
 0x99e   : > { %5236 = vmatmul.mubr.f32.vlgmr.msra.gmra.mxu0 %v9221_v0  ;;  %5268 = vmatprep.subr.mxu1 %v6837_v9 }
 0x99f   : > { %5269 = vmatpush3.msra.mxu1 %v4727_v23 }
 0xa5e   : > { %v4722_v21 = vpop.f32.mrf.mxu0 }
 0xa5f   : > { %v4723_v50 = vadd.f32 %v5163_v62, %v4722_v21 }
 0xa60   : > { %v5237_v22 = vpop.f32.mrf.mxu0 }
 0xa61   : > { %6600 = vtanh.f32 %v4723_v50 }
 0xa6e   : > { %v6601_v56 = vpop.eup %6600 }
 0xa6f   : > { %5271 = vmatmul.mubr.f32.vlgmr.msra.gmra.mxu1 %v6601_v56 }
 0xb2f   : > { %v4816_v60 = vpop.f32.mrf.mxu1 }
 0xb30   : > { %v4817_v49 = vadd.f32 %v5164_v43, %v4816_v60 }
 0xb31   : > { %v5272_v8 = vpop.f32.mrf.mxu1 }
 0xb32   : > { %6602 = vtanh.f32 %v4817_v49 }
 0xb3f   : > { %v6603_v59 = vpop.eup %6602 }
 0xb40   : > { %v4821_v45 = vmul.f32 %v6603_v59, %v6603_v59 }
 0xb42   : > { %4822 = vadd.xlane.f32.xlu0 %v4821_v45 }
 0xbcb   : > { %v4823_v13 = vpop.xlane.xlu0 %4822 }
 0xbcc   : > { %v4824_v28 = vadd.f32 1e-12, %v4823_v13 }
 0xbce   : > { %6604 = vrsqrt.f32 %v4824_v28 }
 0xbdb   : > { %v6605_v32 = vpop.eup %6604 }
 0xbdc   : > { %v4826_v3 = vmul.f32 %v6605_v32, %v6603_v59 }
 0xbde   : > { %4827 = vst [vmem:[#allocation14] sm:$0xff] %v4826_v3 }
 0xbdf PF: > { %s10012_s21 = sadd.s32 4294967295, %s6824_s10   ;;  %s6839_s27 = smov [#allocation14]  }
 0xbe0   : > { %p9270_p4 = scmp.eq.s32.totalorder %s10012_s21, 3  ;;  %s4837_s23 = sshll.u32 %s6839_s27, 4  ;;  %s4838_s23 = int_to_ptr.vmem [resolvable:$true] %s4837_s23 }
 0xbe1   : > { %s6738_s25 = scalar_lea.vmem %s4838_s23, 128  ;;  %p6745_p2 = scmp.lt.s32.totalorder %s4838_s23, %s4838_s23 }
 0xbe2   : > { %p6739_p12 = scmp.ne.s32.totalorder %s4838_s23, %s6738_s25  ;;  %p6746_p6 = scmp.lt.s32.totalorder %s6738_s25, %s6738_s25 }
 0xbe4   : > { %p6740_p13 = pnand %p6739_p12, %p9270_p4  ;;  %p6747_p3 = por %p6746_p6, %p6745_p2 }
 0xbe6   : > { %p6741_p7 = pneg %p6740_p13 }
 0xbe8   : > { %p6748_p9 = pnand %p6747_p3, %p6741_p7 }
 0xbea   : > { %6751 = shalt.err (!%p6748_p9)
}
 0xbeb   : > { %5292 = dma.vmem_to_hbm [thread:$0]  (%p9270_p4), %s4838_s23, 128, %s9311_s8, [#allocation7]  }
 0xbec   : > { %6799 = dma.done.wait (%p9270_p4), [#allocation7], 128  }
 0xbed   : > { %6801 = vsyncadd (%p9270_p4), [#allocation7], 4294967168 }
 0xbee PF: > { %s24_s10 = sadd.s32 1, %s6824_s10   ;;  %s10014_s27 = smov %s6808_s28 }
 0xbef   : > { %p21_p8 = scmp.ge.s32.totalorder %s24_s10, 6   ;;  %s10015_s28 = smov %s6812_s29 }
 0xbf0   : > { %s10016_s29 = smov %s7000_s16  ;;  %s10017_s30 = smov %s6820_s9 }
 0xbf1   : > { %s10018_s9 = smov %s10020_s22  ;;  %23 = sbr.rel (!%p21_p8) target bundleno = 10 (0xa), region = 114 }
 0xbf6   :  { %4850 = vsyncpa [#allocation6], 1 }
 0xbf7   :  { %4852 = vsyncpa [#allocation6 + $0x1], 1 }
 0xbf8   :  { %4853 = vsyncpa [#allocation9], 1 }
 0xbf9   :  { %4854 = vsyncpa [#allocation12], 1 }
 0xbfa   :  { %4855 = vsyncpa [#allocation7], 1 }
 0xbfb   :  { %4857 = vsyncpa [#allocation7 + $0x1], 1 }

</bundles_post_ra>
